<compile_context>
chip_gen: v5e
topology: v5e:2x2
jax: 0.10.0
libtpu: 0.0.40
codegen_flags: <defaults>
</compile_context>

<pallas_src>
import functools

import jax
import jax.numpy as jnp
from jax.experimental import pallas as pl
from jax.experimental.pallas import tpu as pltpu


# ---------------------------------------------------------------------------
# Fused SNA kernel
# ---------------------------------------------------------------------------

def _sna_fused_kernel(x_ref, m_ref, coord_ref, wqkv_ref, wred_ref, wproj_ref,
                      o_ref, stage_ref, s_ref, *, num_heads, ksize, H, W):
    """One batch element per grid step.

    Refs (channels on sublanes, flattened pixels on lanes):
      x_ref    : (1, C, H*W)        bf16 input activations
      m_ref    : (1, K*K, H*W)      bf16 superpixel mask (1 = neighbor shares query's cell)
      coord_ref: (2, H*W)           int32 [row; col] pixel coordinates (resident)
      wqkv_ref : (3C, C)            bf16 stacked [Wq*scale; Wk; Wv] (out, in)
      wred_ref : (nh_pad, C)        bf16 per-head 0/1 reduction matrix
      wproj_ref: (C, C)             bf16 output projection (out, in)
      o_ref    : (1, C, H*W)        f32 output
      stage_ref: (C, K*K*H*W)       bf16 staged q*k_neighbor products
      s_ref    : (nh_pad, K*K*H*W)  f32 per-head logits
    """
    C = wproj_ref.shape[0]
    HW = H * W
    KK = ksize * ksize
    Dh = C // num_heads
    c = ksize // 2

    row_id = coord_ref[0:1]                                   # (1, HW) int32
    col_id = coord_ref[1:2]                                   # (1, HW) int32
    # hoisted boundary masks (reused across both passes and every window offset)
    row_is = {b: row_id == b for b in list(range(c)) + list(range(H - c, H))}
    col_is = {b: col_id == b for b in list(range(c)) + list(range(W - c, W))}

    # --- fused qkv projection (bf16 MXU, f32 accumulation) ------------------
    qkv = jnp.dot(wqkv_ref[...], x_ref[0],
                  preferred_element_type=jnp.float32)          # (3C, HW) f32
    q = qkv[0:C]                                               # scale already folded in
    k = qkv[C:2 * C]
    v = qkv[2 * C:3 * C]

    def clamped_variants(t, size, stride, edge_is):
        """All `ksize` NATTEN clamped-window views of `t` along one image axis
        (extent `size`, embedded in the lane axis with step `stride`).  Distinct lane
        rolls (2*ksize-1 of them) are cached and shared across the ksize offsets.
        pltpu.roll follows jnp.roll semantics: out[..., i] = t[..., i - shift]."""
        cache = {}

        def get(sh):
            sh = sh % HW
            if sh not in cache:
                cache[sh] = t if sh == 0 else pltpu.roll(t, sh, axis=1)
            return cache[sh]

        outs = []
        for d in range(ksize):
            out = get((c - d) * stride)                                    # interior
            for b in range(c):                                             # leading edge
                out = jnp.where(edge_is[b], get((b - d) * stride), out)
            for b in range(size - c, size):                                # trailing edge
                out = jnp.where(edge_is[b],
                                get((b - (size - ksize + d)) * stride), out)
            outs.append(out)
        return outs

    def expand_heads(t):
        """(nh_pad, HW) -> (C, HW): replicate each head's row over its head_dim."""
        return jnp.concatenate(
            [jnp.broadcast_to(t[h:h + 1], (Dh, HW)) for h in range(num_heads)], axis=0)

    # --- pass 1: stage all K*K q*k_neighbor products, one wide MXU reduction ---
    k_rows = clamped_variants(k, H, W, row_is)
    idx = 0
    for di in range(ksize):
        k_cols = clamped_variants(k_rows[di], W, 1, col_is)
        for dj in range(ksize):
            stage_ref[:, idx * HW:(idx + 1) * HW] = (
                q * k_cols[dj]).astype(stage_ref.dtype)
            idx += 1

    # per-head logits for every window slot: (nh_pad, KK*HW) in one matmul
    s_ref[...] = jnp.dot(wred_ref[...], stage_ref[...],
                         preferred_element_type=jnp.float32)

    # unmasked per-head max over the K*K window slots
    smax = s_ref[:, 0:HW]
    for idx in range(1, KK):
        smax = jnp.maximum(smax, s_ref[:, idx * HW:(idx + 1) * HW])

    # --- pass 2: masked softmax (eps renorm) + value aggregation -------------
    mask = m_ref[0]                                            # (KK, HW) bf16
    nh_pad = s_ref.shape[0]
    l_sum = jnp.zeros((nh_pad, HW), jnp.float32)
    acc = jnp.zeros((C, HW), jnp.float32)

    v_rows = clamped_variants(v, H, W, row_is)
    idx = 0
    for di in range(ksize):
        v_cols = clamped_variants(v_rows[di], W, 1, col_is)
        for dj in range(ksize):
            p = jnp.exp(s_ref[:, idx * HW:(idx + 1) * HW] - smax)
            p = p * mask[idx:idx + 1].astype(jnp.float32)      # (nh_pad, HW)
            l_sum = l_sum + p
            acc = acc + expand_heads(p) * v_cols[dj]
            idx += 1

    attn = acc * expand_heads(1.0 / (l_sum + 1e-6))            # exact eps renorm

    # --- fused output projection (bf16 MXU), lane-dense f32 store ------------
    o_ref[0] = jnp.dot(wproj_ref[...], attn.astype(wproj_ref.dtype),
                       preferred_element_type=jnp.float32).astype(o_ref.dtype)


# ---------------------------------------------------------------------------
# Glue (plain JAX): superpixel mask construction, parameters, wrapper
# ---------------------------------------------------------------------------

def build_superpixel_mask(sims, H, W, ksize):
    """mask[b, di*k+dj, i*W+j] = 1 iff the clamped-window neighbor's argmax superpixel
    equals the query pixel's home grid cell (get_indices, PyTorch 'nearest')."""
    B = sims.shape[0]
    sH, sW = sims.shape[-2:]
    c = ksize // 2

    # hard assignment per pixel (== one_hot(argmax) in the reference module)
    assign = jnp.argmax(sims.reshape(B, H, W, sH * sW), axis=-1)            # (B,H,W)

    # get_indices: nearest upsample of the sH x sW label grid
    ri = jnp.floor(jnp.arange(H) * (sH / H)).astype(jnp.int32)
    ci = jnp.floor(jnp.arange(W) * (sW / W)).astype(jnp.int32)
    home = ri[:, None] * sW + ci[None, :]                                   # (H,W)

    # NATTEN clamped-window neighbor coordinates
    ni = jnp.clip(jnp.arange(H) - c, 0, H - ksize)[:, None] + jnp.arange(ksize)[None, :]
    nj = jnp.clip(jnp.arange(W) - c, 0, W - ksize)[:, None] + jnp.arange(ksize)[None, :]

    a = assign[:, ni, :]                        # (B, H, K, W)
    a = a[:, :, :, nj]                          # (B, H, K, W, K)
    eq = (a == home[None, :, None, :, None])    # (B, H, K, W, K)
    mask = jnp.transpose(eq, (0, 2, 4, 1, 3))   # (B, K, K, H, W)
    return mask.reshape(B, ksize * ksize, H * W).astype(jnp.bfloat16)


def init_params(key, dim):
    k1, k2 = jax.random.split(key, 2)
    std = 0.02  # deterministic synthetic init (trunc_normal_-like scale)
    return {
        # [Wq; Wk; Wv] stacked once (hoisted), nn.Linear (out_features, in_features)
        "w_qkv": std * jax.random.normal(k1, (3 * dim, dim), jnp.float32),
        "w_proj": std * jax.random.normal(k2, (dim, dim), jnp.float32),
    }


def sna_forward(params, x_nchw, sims, *, num_heads, ksize):
    B, C, H, W = x_nchw.shape
    assert C % num_heads == 0
    assert H >= ksize and W >= ksize, "spatial dims must be >= kernel_size"
    HW = H * W
    assert HW % 128 == 0, "lane-dense layout assumes H*W % 128 == 0"
    KK = ksize * ksize
    Dh = C // num_heads
    scale = Dh ** -0.5
    nh_pad = -(-num_heads // 8) * 8            # pad reduction rows to the sublane tile

    # bf16 MXU operands (f32 accumulation happens inside the kernel)
    x_flat = x_nchw.reshape(B, C, HW).astype(jnp.bfloat16)
    w_qkv = params["w_qkv"]
    # fold the softmax scale into Wq so the per-head reduce matrix is an exact 0/1 matrix
    w_qkv_scaled = jnp.concatenate([w_qkv[0:C] * scale, w_qkv[C:]], axis=0
                                   ).astype(jnp.bfloat16)
    w_proj = params["w_proj"].astype(jnp.bfloat16)

    # per-head 0/1 reduction matrix and pixel coordinates (grid-step invariants,
    # passed as tiny resident inputs instead of being rebuilt every grid step)
    head_of_c = jnp.arange(C, dtype=jnp.int32) // Dh
    w_red = (head_of_c[None, :] == jnp.arange(nh_pad, dtype=jnp.int32)[:, None]
             ).astype(jnp.bfloat16)                                        # (nh_pad, C)
    pix = jnp.arange(HW, dtype=jnp.int32)
    coords = jnp.stack([pix // W, pix % W], axis=0)                        # (2, HW)

    mask = build_superpixel_mask(sims, H, W, ksize)                        # (B,KK,HW) bf16

    kernel = functools.partial(_sna_fused_kernel,
                               num_heads=num_heads, ksize=ksize, H=H, W=W)

    out = pl.pallas_call(
        kernel,
        out_shape=jax.ShapeDtypeStruct((B, C, HW), jnp.float32),
        grid=(B,),
        in_specs=[
            pl.BlockSpec((1, C, HW), lambda b: (b, 0, 0)),      # x (bf16)
            pl.BlockSpec((1, KK, HW), lambda b: (b, 0, 0)),     # mask (bf16)
            pl.BlockSpec((2, HW), lambda b: (0, 0)),            # coords (resident)
            pl.BlockSpec((3 * C, C), lambda b: (0, 0)),         # w_qkv (resident)
            pl.BlockSpec((nh_pad, C), lambda b: (0, 0)),        # w_red (resident)
            pl.BlockSpec((C, C), lambda b: (0, 0)),             # w_proj (resident)
        ],
        out_specs=pl.BlockSpec((1, C, HW), lambda b: (b, 0, 0)),
        scratch_shapes=[
            pltpu.VMEM((C, KK * HW), jnp.bfloat16),             # staged q*k products
            pltpu.VMEM((nh_pad, KK * HW), jnp.float32),         # per-head logits
        ],
        compiler_params=pltpu.CompilerParams(
            dimension_semantics=("parallel",),    # batch axis: megacore-shardable
        ),
    )(x_flat, mask, coords, w_qkv_scaled, w_red, w_proj)

    return out.reshape(B, C, H, W)


# ---------------------------------------------------------------------------
# Pure-JAX f32 reference (correctness check)
# ---------------------------------------------------------------------------

def sna_reference(params, x_nchw, sims, *, num_heads, ksize):
    B, C, H, W = x_nchw.shape
    Dh = C // num_heads
    scale = Dh ** -0.5
    c = ksize // 2
    KK = ksize * ksize
    hp = jax.lax.Precision.HIGHEST

    x = jnp.transpose(x_nchw, (0, 2, 3, 1))                                  # (B,H,W,C)
    qkv = jnp.einsum('bijc,oc->bijo', x, params['w_qkv'], precision=hp)       # (B,H,W,3C)
    q, k, v = jnp.split(qkv, 3, axis=-1)
    q = q.reshape(B, H, W, num_heads, Dh)
    k = k.reshape(B, H, W, num_heads, Dh)
    v = v.reshape(B, H, W, num_heads, Dh)

    ni = jnp.clip(jnp.arange(H) - c, 0, H - ksize)[:, None] + jnp.arange(ksize)[None, :]
    nj = jnp.clip(jnp.arange(W) - c, 0, W - ksize)[:, None] + jnp.arange(ksize)[None, :]
    kn = k[:, ni][:, :, :, nj]                                                # (B,H,K,W,K,nh,Dh)
    vn = v[:, ni][:, :, :, nj]
    kn = jnp.transpose(kn, (0, 1, 3, 2, 4, 5, 6)).reshape(B, H, W, KK, num_heads, Dh)
    vn = jnp.transpose(vn, (0, 1, 3, 2, 4, 5, 6)).reshape(B, H, W, KK, num_heads, Dh)

    s = jnp.einsum('bijnd,bijknd->bijkn', q, kn, precision=hp) * scale        # (B,H,W,KK,nh)
    mask = build_superpixel_mask(sims, H, W, ksize).astype(jnp.float32)       # (B,KK,HW)
    mask = jnp.transpose(mask.reshape(B, KK, H, W), (0, 2, 3, 1))             # (B,H,W,KK)

    smax = jnp.max(s, axis=3, keepdims=True)
    p = jnp.exp(s - smax) * mask[..., None]
    attn = p / (jnp.sum(p, axis=3, keepdims=True) + 1e-6)
    out = jnp.einsum('bijkn,bijknd->bijnd', attn, vn, precision=hp)           # (B,H,W,nh,Dh)
    out = out.reshape(B, H, W, C)
    out = jnp.einsum('bijc,oc->bijo', out, params['w_proj'], precision=hp)
    return jnp.transpose(out, (0, 3, 1, 2))


# ---------------------------------------------------------------------------

if __name__ == "__main__":
    key = jax.random.PRNGKey(0)
    kx, ks, kw = jax.random.split(key, 3)

    B, C, H, W = 2, 32, 16, 16
    num_heads, ksize = 4, 3
    sH, sW = 4, 4

    x = jax.random.normal(kx, (B, C, H, W), jnp.float32)
    sims = jax.nn.softmax(
        jax.random.normal(ks, (B, H, W, sH * sW), jnp.float32), axis=-1
    ).reshape(B, H, W, sH, sW)

    params = init_params(kw, C)

    out = sna_forward(params, x, sims, num_heads=num_heads, ksize=ksize)
    out = jax.block_until_ready(out)
    assert out.shape == (B, C, H, W)

    ref = sna_reference(params, x, sims, num_heads=num_heads, ksize=ksize)
    ref = jax.block_until_ready(ref)

    max_err = float(jnp.max(jnp.abs(out - ref)))
    # kernel uses bf16 MXU operands (f32 accumulation) -> tolerance reflects bf16 inputs
    assert jnp.allclose(out, ref, atol=2e-3, rtol=2e-2), f"max abs err {max_err}"
    print("KERNEL_OK")
</pallas_src>

<mosaic_0001>
module attributes {stable_mosaic.version = 11 : i64} {
  func.func @_sna_fused_kernel(%arg0: i32, %arg1: memref<1x32x256xbf16, #tpu.memory_space<vmem>>, %arg2: memref<1x9x256xbf16, #tpu.memory_space<vmem>>, %arg3: memref<2x256xi32, #tpu.memory_space<vmem>>, %arg4: memref<96x32xbf16, #tpu.memory_space<vmem>>, %arg5: memref<8x32xbf16, #tpu.memory_space<vmem>>, %arg6: memref<32x32xbf16, #tpu.memory_space<vmem>>, %arg7: memref<1x32x256xf32, #tpu.memory_space<vmem>>, %arg8: memref<32x2304xbf16, #tpu.memory_space<vmem>>, %arg9: memref<8x2304xf32, #tpu.memory_space<vmem>>) attributes {dimension_semantics = [#tpu.dimension_semantics<parallel>], iteration_bounds = array<i64: 2>, scalar_prefetch = 0 : i64, scratch_operands = 2 : i64, tpu.core_type = #tpu.core_type<tc>, window_params = [{transform_indices = @transform_0, window_bounds = array<i64: 1, 32, 256>}, {transform_indices = @transform_1, window_bounds = array<i64: 1, 9, 256>}, {pipeline_mode = #tpu.pipeline_mode<synchronous>, transform_indices = @transform_2, window_bounds = array<i64: 2, 256>}, {pipeline_mode = #tpu.pipeline_mode<synchronous>, transform_indices = @transform_3, window_bounds = array<i64: 96, 32>}, {pipeline_mode = #tpu.pipeline_mode<synchronous>, transform_indices = @transform_4, window_bounds = array<i64: 8, 32>}, {pipeline_mode = #tpu.pipeline_mode<synchronous>, transform_indices = @transform_5, window_bounds = array<i64: 32, 32>}, {transform_indices = @transform_6, window_bounds = array<i64: 1, 32, 256>}]} {
    %c0 = arith.constant 0 : index
    %c0_0 = arith.constant 0 : index
    %0 = vector.load %arg3[%c0, %c0_0] : memref<2x256xi32, #tpu.memory_space<vmem>>, vector<1x256xi32>
    %c1 = arith.constant 1 : index
    %c0_1 = arith.constant 0 : index
    %1 = vector.load %arg3[%c1, %c0_1] : memref<2x256xi32, #tpu.memory_space<vmem>>, vector<1x256xi32>
    %c0_i32 = arith.constant 0 : i32
    %2 = vector.broadcast %c0_i32 : i32 to vector<1x256xi32>
    %3 = arith.cmpi eq, %0, %2 : vector<1x256xi32>
    %c15_i32 = arith.constant 15 : i32
    %4 = vector.broadcast %c15_i32 : i32 to vector<1x256xi32>
    %5 = arith.cmpi eq, %0, %4 : vector<1x256xi32>
    %c0_i32_2 = arith.constant 0 : i32
    %6 = vector.broadcast %c0_i32_2 : i32 to vector<1x256xi32>
    %7 = arith.cmpi eq, %1, %6 : vector<1x256xi32>
    %c15_i32_3 = arith.constant 15 : i32
    %8 = vector.broadcast %c15_i32_3 : i32 to vector<1x256xi32>
    %9 = arith.cmpi eq, %1, %8 : vector<1x256xi32>
    %c0_4 = arith.constant 0 : index
    %c0_5 = arith.constant 0 : index
    %10 = vector.load %arg4[%c0_4, %c0_5] : memref<96x32xbf16, #tpu.memory_space<vmem>>, vector<96x32xbf16>
    %c0_6 = arith.constant 0 : index
    %c0_7 = arith.constant 0 : index
    %c0_8 = arith.constant 0 : index
    %11 = vector.load %arg1[%c0_6, %c0_7, %c0_8] : memref<1x32x256xbf16, #tpu.memory_space<vmem>>, vector<1x32x256xbf16>
    %12 = vector.shape_cast %11 : vector<1x32x256xbf16> to vector<32x256xbf16>
    %cst = arith.constant dense<0.000000e+00> : vector<96x256xf32>
    %13 = tpu.matmul %10, %12, %cst {dimension_numbers = #tpu.dot_dimension_numbers<[1], [0], [0], [1], [0, 0, 1, 1], [], []>} : vector<96x32xbf16>, vector<32x256xbf16>, vector<96x256xf32> -> vector<96x256xf32>
    %14 = vector.extract_strided_slice %13 {offsets = [0, 0], sizes = [32, 256], strides = [1, 1]} : vector<96x256xf32> to vector<32x256xf32>
    %15 = vector.extract_strided_slice %13 {offsets = [32, 0], sizes = [32, 256], strides = [1, 1]} : vector<96x256xf32> to vector<32x256xf32>
    %16 = vector.extract_strided_slice %13 {offsets = [64, 0], sizes = [32, 256], strides = [1, 1]} : vector<96x256xf32> to vector<32x256xf32>
    %c16_i32 = arith.constant 16 : i32
    %17 = tpu.dynamic_rotate %15 by %c16_i32 dim 1 : vector<32x256xf32>, i32 -> vector<32x256xf32>
    %18 = vector.shape_cast %3 : vector<1x256xi1> to vector<1x256xi1>
    %19 = vector.broadcast %18 : vector<1x256xi1> to vector<32x256xi1>
    %20 = arith.select %19, %15, %17 : vector<32x256xi1>, vector<32x256xf32>
    %c32_i32 = arith.constant 32 : i32
    %21 = tpu.dynamic_rotate %15 by %c32_i32 dim 1 : vector<32x256xf32>, i32 -> vector<32x256xf32>
    %22 = vector.shape_cast %5 : vector<1x256xi1> to vector<1x256xi1>
    %23 = vector.broadcast %22 : vector<1x256xi1> to vector<32x256xi1>
    %24 = arith.select %23, %21, %20 : vector<32x256xi1>, vector<32x256xf32>
    %c240_i32 = arith.constant 240 : i32
    %25 = tpu.dynamic_rotate %15 by %c240_i32 dim 1 : vector<32x256xf32>, i32 -> vector<32x256xf32>
    %26 = vector.shape_cast %3 : vector<1x256xi1> to vector<1x256xi1>
    %27 = vector.broadcast %26 : vector<1x256xi1> to vector<32x256xi1>
    %28 = arith.select %27, %25, %15 : vector<32x256xi1>, vector<32x256xf32>
    %29 = vector.shape_cast %5 : vector<1x256xi1> to vector<1x256xi1>
    %30 = vector.broadcast %29 : vector<1x256xi1> to vector<32x256xi1>
    %31 = arith.select %30, %17, %28 : vector<32x256xi1>, vector<32x256xf32>
    %c224_i32 = arith.constant 224 : i32
    %32 = tpu.dynamic_rotate %15 by %c224_i32 dim 1 : vector<32x256xf32>, i32 -> vector<32x256xf32>
    %33 = vector.shape_cast %3 : vector<1x256xi1> to vector<1x256xi1>
    %34 = vector.broadcast %33 : vector<1x256xi1> to vector<32x256xi1>
    %35 = arith.select %34, %32, %25 : vector<32x256xi1>, vector<32x256xf32>
    %36 = vector.shape_cast %5 : vector<1x256xi1> to vector<1x256xi1>
    %37 = vector.broadcast %36 : vector<1x256xi1> to vector<32x256xi1>
    %38 = arith.select %37, %15, %35 : vector<32x256xi1>, vector<32x256xf32>
    %c1_i32 = arith.constant 1 : i32
    %39 = tpu.dynamic_rotate %24 by %c1_i32 dim 1 : vector<32x256xf32>, i32 -> vector<32x256xf32>
    %40 = vector.shape_cast %7 : vector<1x256xi1> to vector<1x256xi1>
    %41 = vector.broadcast %40 : vector<1x256xi1> to vector<32x256xi1>
    %42 = arith.select %41, %24, %39 : vector<32x256xi1>, vector<32x256xf32>
    %c2_i32 = arith.constant 2 : i32
    %43 = tpu.dynamic_rotate %24 by %c2_i32 dim 1 : vector<32x256xf32>, i32 -> vector<32x256xf32>
    %44 = vector.shape_cast %9 : vector<1x256xi1> to vector<1x256xi1>
    %45 = vector.broadcast %44 : vector<1x256xi1> to vector<32x256xi1>
    %46 = arith.select %45, %43, %42 : vector<32x256xi1>, vector<32x256xf32>
    %c255_i32 = arith.constant 255 : i32
    %47 = tpu.dynamic_rotate %24 by %c255_i32 dim 1 : vector<32x256xf32>, i32 -> vector<32x256xf32>
    %48 = vector.shape_cast %7 : vector<1x256xi1> to vector<1x256xi1>
    %49 = vector.broadcast %48 : vector<1x256xi1> to vector<32x256xi1>
    %50 = arith.select %49, %47, %24 : vector<32x256xi1>, vector<32x256xf32>
    %51 = vector.shape_cast %9 : vector<1x256xi1> to vector<1x256xi1>
    %52 = vector.broadcast %51 : vector<1x256xi1> to vector<32x256xi1>
    %53 = arith.select %52, %39, %50 : vector<32x256xi1>, vector<32x256xf32>
    %c254_i32 = arith.constant 254 : i32
    %54 = tpu.dynamic_rotate %24 by %c254_i32 dim 1 : vector<32x256xf32>, i32 -> vector<32x256xf32>
    %55 = vector.shape_cast %7 : vector<1x256xi1> to vector<1x256xi1>
    %56 = vector.broadcast %55 : vector<1x256xi1> to vector<32x256xi1>
    %57 = arith.select %56, %54, %47 : vector<32x256xi1>, vector<32x256xf32>
    %58 = vector.shape_cast %9 : vector<1x256xi1> to vector<1x256xi1>
    %59 = vector.broadcast %58 : vector<1x256xi1> to vector<32x256xi1>
    %60 = arith.select %59, %24, %57 : vector<32x256xi1>, vector<32x256xf32>
    %61 = arith.mulf %14, %46 : vector<32x256xf32>
    %62 = arith.truncf %61 : vector<32x256xf32> to vector<32x256xbf16>
    %c0_9 = arith.constant 0 : index
    %c0_10 = arith.constant 0 : index
    %63 = vector.load %arg8[%c0_9, %c0_10] : memref<32x2304xbf16, #tpu.memory_space<vmem>>, vector<32x256xbf16>
    tpu.vector_store %arg8[%c0_9, %c0_10], %62 {strides = array<i32>} : memref<32x2304xbf16, #tpu.memory_space<vmem>>, vector<32x256xbf16>,
    %64 = arith.mulf %14, %53 : vector<32x256xf32>
    %65 = arith.truncf %64 : vector<32x256xf32> to vector<32x256xbf16>
    %c0_11 = arith.constant 0 : index
    %c256 = arith.constant 256 : index
    %66 = vector.load %arg8[%c0_11, %c256] : memref<32x2304xbf16, #tpu.memory_space<vmem>>, vector<32x256xbf16>
    tpu.vector_store %arg8[%c0_11, %c256], %65 {strides = array<i32>} : memref<32x2304xbf16, #tpu.memory_space<vmem>>, vector<32x256xbf16>,
    %67 = arith.mulf %14, %60 : vector<32x256xf32>
    %68 = arith.truncf %67 : vector<32x256xf32> to vector<32x256xbf16>
    %c0_12 = arith.constant 0 : index
    %c512 = arith.constant 512 : index
    %69 = vector.load %arg8[%c0_12, %c512] : memref<32x2304xbf16, #tpu.memory_space<vmem>>, vector<32x256xbf16>
    tpu.vector_store %arg8[%c0_12, %c512], %68 {strides = array<i32>} : memref<32x2304xbf16, #tpu.memory_space<vmem>>, vector<32x256xbf16>,
    %c1_i32_13 = arith.constant 1 : i32
    %70 = tpu.dynamic_rotate %31 by %c1_i32_13 dim 1 : vector<32x256xf32>, i32 -> vector<32x256xf32>
    %71 = vector.shape_cast %7 : vector<1x256xi1> to vector<1x256xi1>
    %72 = vector.broadcast %71 : vector<1x256xi1> to vector<32x256xi1>
    %73 = arith.select %72, %31, %70 : vector<32x256xi1>, vector<32x256xf32>
    %c2_i32_14 = arith.constant 2 : i32
    %74 = tpu.dynamic_rotate %31 by %c2_i32_14 dim 1 : vector<32x256xf32>, i32 -> vector<32x256xf32>
    %75 = vector.shape_cast %9 : vector<1x256xi1> to vector<1x256xi1>
    %76 = vector.broadcast %75 : vector<1x256xi1> to vector<32x256xi1>
    %77 = arith.select %76, %74, %73 : vector<32x256xi1>, vector<32x256xf32>
    %c255_i32_15 = arith.constant 255 : i32
    %78 = tpu.dynamic_rotate %31 by %c255_i32_15 dim 1 : vector<32x256xf32>, i32 -> vector<32x256xf32>
    %79 = vector.shape_cast %7 : vector<1x256xi1> to vector<1x256xi1>
    %80 = vector.broadcast %79 : vector<1x256xi1> to vector<32x256xi1>
    %81 = arith.select %80, %78, %31 : vector<32x256xi1>, vector<32x256xf32>
    %82 = vector.shape_cast %9 : vector<1x256xi1> to vector<1x256xi1>
    %83 = vector.broadcast %82 : vector<1x256xi1> to vector<32x256xi1>
    %84 = arith.select %83, %70, %81 : vector<32x256xi1>, vector<32x256xf32>
    %c254_i32_16 = arith.constant 254 : i32
    %85 = tpu.dynamic_rotate %31 by %c254_i32_16 dim 1 : vector<32x256xf32>, i32 -> vector<32x256xf32>
    %86 = vector.shape_cast %7 : vector<1x256xi1> to vector<1x256xi1>
    %87 = vector.broadcast %86 : vector<1x256xi1> to vector<32x256xi1>
    %88 = arith.select %87, %85, %78 : vector<32x256xi1>, vector<32x256xf32>
    %89 = vector.shape_cast %9 : vector<1x256xi1> to vector<1x256xi1>
    %90 = vector.broadcast %89 : vector<1x256xi1> to vector<32x256xi1>
    %91 = arith.select %90, %31, %88 : vector<32x256xi1>, vector<32x256xf32>
    %92 = arith.mulf %14, %77 : vector<32x256xf32>
    %93 = arith.truncf %92 : vector<32x256xf32> to vector<32x256xbf16>
    %c0_17 = arith.constant 0 : index
    %c768 = arith.constant 768 : index
    %94 = vector.load %arg8[%c0_17, %c768] : memref<32x2304xbf16, #tpu.memory_space<vmem>>, vector<32x256xbf16>
    tpu.vector_store %arg8[%c0_17, %c768], %93 {strides = array<i32>} : memref<32x2304xbf16, #tpu.memory_space<vmem>>, vector<32x256xbf16>,
    %95 = arith.mulf %14, %84 : vector<32x256xf32>
    %96 = arith.truncf %95 : vector<32x256xf32> to vector<32x256xbf16>
    %c0_18 = arith.constant 0 : index
    %c1024 = arith.constant 1024 : index
    %97 = vector.load %arg8[%c0_18, %c1024] : memref<32x2304xbf16, #tpu.memory_space<vmem>>, vector<32x256xbf16>
    tpu.vector_store %arg8[%c0_18, %c1024], %96 {strides = array<i32>} : memref<32x2304xbf16, #tpu.memory_space<vmem>>, vector<32x256xbf16>,
    %98 = arith.mulf %14, %91 : vector<32x256xf32>
    %99 = arith.truncf %98 : vector<32x256xf32> to vector<32x256xbf16>
    %c0_19 = arith.constant 0 : index
    %c1280 = arith.constant 1280 : index
    %100 = vector.load %arg8[%c0_19, %c1280] : memref<32x2304xbf16, #tpu.memory_space<vmem>>, vector<32x256xbf16>
    tpu.vector_store %arg8[%c0_19, %c1280], %99 {strides = array<i32>} : memref<32x2304xbf16, #tpu.memory_space<vmem>>, vector<32x256xbf16>,
    %c1_i32_20 = arith.constant 1 : i32
    %101 = tpu.dynamic_rotate %38 by %c1_i32_20 dim 1 : vector<32x256xf32>, i32 -> vector<32x256xf32>
    %102 = vector.shape_cast %7 : vector<1x256xi1> to vector<1x256xi1>
    %103 = vector.broadcast %102 : vector<1x256xi1> to vector<32x256xi1>
    %104 = arith.select %103, %38, %101 : vector<32x256xi1>, vector<32x256xf32>
    %c2_i32_21 = arith.constant 2 : i32
    %105 = tpu.dynamic_rotate %38 by %c2_i32_21 dim 1 : vector<32x256xf32>, i32 -> vector<32x256xf32>
    %106 = vector.shape_cast %9 : vector<1x256xi1> to vector<1x256xi1>
    %107 = vector.broadcast %106 : vector<1x256xi1> to vector<32x256xi1>
    %108 = arith.select %107, %105, %104 : vector<32x256xi1>, vector<32x256xf32>
    %c255_i32_22 = arith.constant 255 : i32
    %109 = tpu.dynamic_rotate %38 by %c255_i32_22 dim 1 : vector<32x256xf32>, i32 -> vector<32x256xf32>
    %110 = vector.shape_cast %7 : vector<1x256xi1> to vector<1x256xi1>
    %111 = vector.broadcast %110 : vector<1x256xi1> to vector<32x256xi1>
    %112 = arith.select %111, %109, %38 : vector<32x256xi1>, vector<32x256xf32>
    %113 = vector.shape_cast %9 : vector<1x256xi1> to vector<1x256xi1>
    %114 = vector.broadcast %113 : vector<1x256xi1> to vector<32x256xi1>
    %115 = arith.select %114, %101, %112 : vector<32x256xi1>, vector<32x256xf32>
    %c254_i32_23 = arith.constant 254 : i32
    %116 = tpu.dynamic_rotate %38 by %c254_i32_23 dim 1 : vector<32x256xf32>, i32 -> vector<32x256xf32>
    %117 = vector.shape_cast %7 : vector<1x256xi1> to vector<1x256xi1>
    %118 = vector.broadcast %117 : vector<1x256xi1> to vector<32x256xi1>
    %119 = arith.select %118, %116, %109 : vector<32x256xi1>, vector<32x256xf32>
    %120 = vector.shape_cast %9 : vector<1x256xi1> to vector<1x256xi1>
    %121 = vector.broadcast %120 : vector<1x256xi1> to vector<32x256xi1>
    %122 = arith.select %121, %38, %119 : vector<32x256xi1>, vector<32x256xf32>
    %123 = arith.mulf %14, %108 : vector<32x256xf32>
    %124 = arith.truncf %123 : vector<32x256xf32> to vector<32x256xbf16>
    %c0_24 = arith.constant 0 : index
    %c1536 = arith.constant 1536 : index
    %125 = vector.load %arg8[%c0_24, %c1536] : memref<32x2304xbf16, #tpu.memory_space<vmem>>, vector<32x256xbf16>
    tpu.vector_store %arg8[%c0_24, %c1536], %124 {strides = array<i32>} : memref<32x2304xbf16, #tpu.memory_space<vmem>>, vector<32x256xbf16>,
    %126 = arith.mulf %14, %115 : vector<32x256xf32>
    %127 = arith.truncf %126 : vector<32x256xf32> to vector<32x256xbf16>
    %c0_25 = arith.constant 0 : index
    %c1792 = arith.constant 1792 : index
    %128 = vector.load %arg8[%c0_25, %c1792] : memref<32x2304xbf16, #tpu.memory_space<vmem>>, vector<32x256xbf16>
    tpu.vector_store %arg8[%c0_25, %c1792], %127 {strides = array<i32>} : memref<32x2304xbf16, #tpu.memory_space<vmem>>, vector<32x256xbf16>,
    %129 = arith.mulf %14, %122 : vector<32x256xf32>
    %130 = arith.truncf %129 : vector<32x256xf32> to vector<32x256xbf16>
    %c0_26 = arith.constant 0 : index
    %c2048 = arith.constant 2048 : index
    %131 = vector.load %arg8[%c0_26, %c2048] : memref<32x2304xbf16, #tpu.memory_space<vmem>>, vector<32x256xbf16>
    tpu.vector_store %arg8[%c0_26, %c2048], %130 {strides = array<i32>} : memref<32x2304xbf16, #tpu.memory_space<vmem>>, vector<32x256xbf16>,
    %c0_27 = arith.constant 0 : index
    %c0_28 = arith.constant 0 : index
    %132 = vector.load %arg5[%c0_27, %c0_28] : memref<8x32xbf16, #tpu.memory_space<vmem>>, vector<8x32xbf16>
    %c0_29 = arith.constant 0 : index
    %c0_30 = arith.constant 0 : index
    %133 = vector.load %arg8[%c0_29, %c0_30] : memref<32x2304xbf16, #tpu.memory_space<vmem>>, vector<32x2304xbf16>
    %cst_31 = arith.constant dense<0.000000e+00> : vector<8x2304xf32>
    %134 = tpu.matmul %132, %133, %cst_31 {dimension_numbers = #tpu.dot_dimension_numbers<[1], [0], [0], [1], [0, 0, 1, 1], [], []>} : vector<8x32xbf16>, vector<32x2304xbf16>, vector<8x2304xf32> -> vector<8x2304xf32>
    %c0_32 = arith.constant 0 : index
    %c0_33 = arith.constant 0 : index
    %135 = vector.load %arg9[%c0_32, %c0_33] : memref<8x2304xf32, #tpu.memory_space<vmem>>, vector<8x2304xf32>
    tpu.vector_store %arg9[%c0_32, %c0_33], %134 {strides = array<i32>} : memref<8x2304xf32, #tpu.memory_space<vmem>>, vector<8x2304xf32>,
    %c0_34 = arith.constant 0 : index
    %c0_35 = arith.constant 0 : index
    %136 = vector.load %arg9[%c0_34, %c0_35] : memref<8x2304xf32, #tpu.memory_space<vmem>>, vector<8x256xf32>
    %c0_36 = arith.constant 0 : index
    %c256_37 = arith.constant 256 : index
    %137 = vector.load %arg9[%c0_36, %c256_37] : memref<8x2304xf32, #tpu.memory_space<vmem>>, vector<8x256xf32>
    %138 = arith.maximumf %136, %137 : vector<8x256xf32>
    %c0_38 = arith.constant 0 : index
    %c512_39 = arith.constant 512 : index
    %139 = vector.load %arg9[%c0_38, %c512_39] : memref<8x2304xf32, #tpu.memory_space<vmem>>, vector<8x256xf32>
    %140 = arith.maximumf %138, %139 : vector<8x256xf32>
    %c0_40 = arith.constant 0 : index
    %c768_41 = arith.constant 768 : index
    %141 = vector.load %arg9[%c0_40, %c768_41] : memref<8x2304xf32, #tpu.memory_space<vmem>>, vector<8x256xf32>
    %142 = arith.maximumf %140, %141 : vector<8x256xf32>
    %c0_42 = arith.constant 0 : index
    %c1024_43 = arith.constant 1024 : index
    %143 = vector.load %arg9[%c0_42, %c1024_43] : memref<8x2304xf32, #tpu.memory_space<vmem>>, vector<8x256xf32>
    %144 = arith.maximumf %142, %143 : vector<8x256xf32>
    %c0_44 = arith.constant 0 : index
    %c1280_45 = arith.constant 1280 : index
    %145 = vector.load %arg9[%c0_44, %c1280_45] : memref<8x2304xf32, #tpu.memory_space<vmem>>, vector<8x256xf32>
    %146 = arith.maximumf %144, %145 : vector<8x256xf32>
    %c0_46 = arith.constant 0 : index
    %c1536_47 = arith.constant 1536 : index
    %147 = vector.load %arg9[%c0_46, %c1536_47] : memref<8x2304xf32, #tpu.memory_space<vmem>>, vector<8x256xf32>
    %148 = arith.maximumf %146, %147 : vector<8x256xf32>
    %c0_48 = arith.constant 0 : index
    %c1792_49 = arith.constant 1792 : index
    %149 = vector.load %arg9[%c0_48, %c1792_49] : memref<8x2304xf32, #tpu.memory_space<vmem>>, vector<8x256xf32>
    %150 = arith.maximumf %148, %149 : vector<8x256xf32>
    %c0_50 = arith.constant 0 : index
    %c2048_51 = arith.constant 2048 : index
    %151 = vector.load %arg9[%c0_50, %c2048_51] : memref<8x2304xf32, #tpu.memory_space<vmem>>, vector<8x256xf32>
    %152 = arith.maximumf %150, %151 : vector<8x256xf32>
    %c0_52 = arith.constant 0 : index
    %c0_53 = arith.constant 0 : index
    %c0_54 = arith.constant 0 : index
    %153 = vector.load %arg2[%c0_52, %c0_53, %c0_54] : memref<1x9x256xbf16, #tpu.memory_space<vmem>>, vector<1x9x256xbf16>
    %154 = vector.shape_cast %153 : vector<1x9x256xbf16> to vector<9x256xbf16>
    %cst_55 = arith.constant 0.000000e+00 : f32
    %155 = vector.broadcast %cst_55 : f32 to vector<8x256xf32>
    %cst_56 = arith.constant 0.000000e+00 : f32
    %156 = vector.broadcast %cst_56 : f32 to vector<32x256xf32>
    %c16_i32_57 = arith.constant 16 : i32
    %157 = tpu.dynamic_rotate %16 by %c16_i32_57 dim 1 : vector<32x256xf32>, i32 -> vector<32x256xf32>
    %158 = vector.shape_cast %3 : vector<1x256xi1> to vector<1x256xi1>
    %159 = vector.broadcast %158 : vector<1x256xi1> to vector<32x256xi1>
    %160 = arith.select %159, %16, %157 : vector<32x256xi1>, vector<32x256xf32>
    %c32_i32_58 = arith.constant 32 : i32
    %161 = tpu.dynamic_rotate %16 by %c32_i32_58 dim 1 : vector<32x256xf32>, i32 -> vector<32x256xf32>
    %162 = vector.shape_cast %5 : vector<1x256xi1> to vector<1x256xi1>
    %163 = vector.broadcast %162 : vector<1x256xi1> to vector<32x256xi1>
    %164 = arith.select %163, %161, %160 : vector<32x256xi1>, vector<32x256xf32>
    %c240_i32_59 = arith.constant 240 : i32
    %165 = tpu.dynamic_rotate %16 by %c240_i32_59 dim 1 : vector<32x256xf32>, i32 -> vector<32x256xf32>
    %166 = vector.shape_cast %3 : vector<1x256xi1> to vector<1x256xi1>
    %167 = vector.broadcast %166 : vector<1x256xi1> to vector<32x256xi1>
    %168 = arith.select %167, %165, %16 : vector<32x256xi1>, vector<32x256xf32>
    %169 = vector.shape_cast %5 : vector<1x256xi1> to vector<1x256xi1>
    %170 = vector.broadcast %169 : vector<1x256xi1> to vector<32x256xi1>
    %171 = arith.select %170, %157, %168 : vector<32x256xi1>, vector<32x256xf32>
    %c224_i32_60 = arith.constant 224 : i32
    %172 = tpu.dynamic_rotate %16 by %c224_i32_60 dim 1 : vector<32x256xf32>, i32 -> vector<32x256xf32>
    %173 = vector.shape_cast %3 : vector<1x256xi1> to vector<1x256xi1>
    %174 = vector.broadcast %173 : vector<1x256xi1> to vector<32x256xi1>
    %175 = arith.select %174, %172, %165 : vector<32x256xi1>, vector<32x256xf32>
    %176 = vector.shape_cast %5 : vector<1x256xi1> to vector<1x256xi1>
    %177 = vector.broadcast %176 : vector<1x256xi1> to vector<32x256xi1>
    %178 = arith.select %177, %16, %175 : vector<32x256xi1>, vector<32x256xf32>
    %c1_i32_61 = arith.constant 1 : i32
    %179 = tpu.dynamic_rotate %164 by %c1_i32_61 dim 1 : vector<32x256xf32>, i32 -> vector<32x256xf32>
    %180 = vector.shape_cast %7 : vector<1x256xi1> to vector<1x256xi1>
    %181 = vector.broadcast %180 : vector<1x256xi1> to vector<32x256xi1>
    %182 = arith.select %181, %164, %179 : vector<32x256xi1>, vector<32x256xf32>
    %c2_i32_62 = arith.constant 2 : i32
    %183 = tpu.dynamic_rotate %164 by %c2_i32_62 dim 1 : vector<32x256xf32>, i32 -> vector<32x256xf32>
    %184 = vector.shape_cast %9 : vector<1x256xi1> to vector<1x256xi1>
    %185 = vector.broadcast %184 : vector<1x256xi1> to vector<32x256xi1>
    %186 = arith.select %185, %183, %182 : vector<32x256xi1>, vector<32x256xf32>
    %c255_i32_63 = arith.constant 255 : i32
    %187 = tpu.dynamic_rotate %164 by %c255_i32_63 dim 1 : vector<32x256xf32>, i32 -> vector<32x256xf32>
    %188 = vector.shape_cast %7 : vector<1x256xi1> to vector<1x256xi1>
    %189 = vector.broadcast %188 : vector<1x256xi1> to vector<32x256xi1>
    %190 = arith.select %189, %187, %164 : vector<32x256xi1>, vector<32x256xf32>
    %191 = vector.shape_cast %9 : vector<1x256xi1> to vector<1x256xi1>
    %192 = vector.broadcast %191 : vector<1x256xi1> to vector<32x256xi1>
    %193 = arith.select %192, %179, %190 : vector<32x256xi1>, vector<32x256xf32>
    %c254_i32_64 = arith.constant 254 : i32
    %194 = tpu.dynamic_rotate %164 by %c254_i32_64 dim 1 : vector<32x256xf32>, i32 -> vector<32x256xf32>
    %195 = vector.shape_cast %7 : vector<1x256xi1> to vector<1x256xi1>
    %196 = vector.broadcast %195 : vector<1x256xi1> to vector<32x256xi1>
    %197 = arith.select %196, %194, %187 : vector<32x256xi1>, vector<32x256xf32>
    %198 = vector.shape_cast %9 : vector<1x256xi1> to vector<1x256xi1>
    %199 = vector.broadcast %198 : vector<1x256xi1> to vector<32x256xi1>
    %200 = arith.select %199, %164, %197 : vector<32x256xi1>, vector<32x256xf32>
    %c0_65 = arith.constant 0 : index
    %c0_66 = arith.constant 0 : index
    %201 = vector.load %arg9[%c0_65, %c0_66] : memref<8x2304xf32, #tpu.memory_space<vmem>>, vector<8x256xf32>
    %202 = arith.subf %201, %152 : vector<8x256xf32>
    %203 = math.exp %202 : vector<8x256xf32>
    %204 = vector.extract_strided_slice %154 {offsets = [0, 0], sizes = [1, 256], strides = [1, 1]} : vector<9x256xbf16> to vector<1x256xbf16>
    %205 = arith.extf %204 : vector<1x256xbf16> to vector<1x256xf32>
    %206 = vector.broadcast %205 : vector<1x256xf32> to vector<8x256xf32>
    %207 = arith.mulf %203, %206 : vector<8x256xf32>
    %208 = arith.addf %155, %207 : vector<8x256xf32>
    %209 = vector.extract_strided_slice %207 {offsets = [0, 0], sizes = [1, 256], strides = [1, 1]} : vector<8x256xf32> to vector<1x256xf32>
    %210 = vector.shape_cast %209 : vector<1x256xf32> to vector<1x256xf32>
    %211 = vector.broadcast %210 : vector<1x256xf32> to vector<8x256xf32>
    %212 = vector.extract_strided_slice %207 {offsets = [1, 0], sizes = [1, 256], strides = [1, 1]} : vector<8x256xf32> to vector<1x256xf32>
    %213 = vector.shape_cast %212 : vector<1x256xf32> to vector<1x256xf32>
    %214 = vector.broadcast %213 : vector<1x256xf32> to vector<8x256xf32>
    %215 = vector.extract_strided_slice %207 {offsets = [2, 0], sizes = [1, 256], strides = [1, 1]} : vector<8x256xf32> to vector<1x256xf32>
    %216 = vector.shape_cast %215 : vector<1x256xf32> to vector<1x256xf32>
    %217 = vector.broadcast %216 : vector<1x256xf32> to vector<8x256xf32>
    %218 = vector.extract_strided_slice %207 {offsets = [3, 0], sizes = [1, 256], strides = [1, 1]} : vector<8x256xf32> to vector<1x256xf32>
    %219 = vector.shape_cast %218 : vector<1x256xf32> to vector<1x256xf32>
    %220 = vector.broadcast %219 : vector<1x256xf32> to vector<8x256xf32>
    %221 = tpu.concatenate %211, %214, %217, %220 in 0 : vector<8x256xf32>, vector<8x256xf32>, vector<8x256xf32>, vector<8x256xf32> -> vector<32x256xf32>
    %222 = arith.mulf %221, %186 : vector<32x256xf32>
    %223 = arith.addf %156, %222 : vector<32x256xf32>
    %c0_67 = arith.constant 0 : index
    %c256_68 = arith.constant 256 : index
    %224 = vector.load %arg9[%c0_67, %c256_68] : memref<8x2304xf32, #tpu.memory_space<vmem>>, vector<8x256xf32>
    %225 = arith.subf %224, %152 : vector<8x256xf32>
    %226 = math.exp %225 : vector<8x256xf32>
    %227 = vector.extract_strided_slice %154 {offsets = [1, 0], sizes = [1, 256], strides = [1, 1]} : vector<9x256xbf16> to vector<1x256xbf16>
    %228 = arith.extf %227 : vector<1x256xbf16> to vector<1x256xf32>
    %229 = vector.broadcast %228 : vector<1x256xf32> to vector<8x256xf32>
    %230 = arith.mulf %226, %229 : vector<8x256xf32>
    %231 = arith.addf %208, %230 : vector<8x256xf32>
    %232 = vector.extract_strided_slice %230 {offsets = [0, 0], sizes = [1, 256], strides = [1, 1]} : vector<8x256xf32> to vector<1x256xf32>
    %233 = vector.shape_cast %232 : vector<1x256xf32> to vector<1x256xf32>
    %234 = vector.broadcast %233 : vector<1x256xf32> to vector<8x256xf32>
    %235 = vector.extract_strided_slice %230 {offsets = [1, 0], sizes = [1, 256], strides = [1, 1]} : vector<8x256xf32> to vector<1x256xf32>
    %236 = vector.shape_cast %235 : vector<1x256xf32> to vector<1x256xf32>
    %237 = vector.broadcast %236 : vector<1x256xf32> to vector<8x256xf32>
    %238 = vector.extract_strided_slice %230 {offsets = [2, 0], sizes = [1, 256], strides = [1, 1]} : vector<8x256xf32> to vector<1x256xf32>
    %239 = vector.shape_cast %238 : vector<1x256xf32> to vector<1x256xf32>
    %240 = vector.broadcast %239 : vector<1x256xf32> to vector<8x256xf32>
    %241 = vector.extract_strided_slice %230 {offsets = [3, 0], sizes = [1, 256], strides = [1, 1]} : vector<8x256xf32> to vector<1x256xf32>
    %242 = vector.shape_cast %241 : vector<1x256xf32> to vector<1x256xf32>
    %243 = vector.broadcast %242 : vector<1x256xf32> to vector<8x256xf32>
    %244 = tpu.concatenate %234, %237, %240, %243 in 0 : vector<8x256xf32>, vector<8x256xf32>, vector<8x256xf32>, vector<8x256xf32> -> vector<32x256xf32>
    %245 = arith.mulf %244, %193 : vector<32x256xf32>
    %246 = arith.addf %223, %245 : vector<32x256xf32>
    %c0_69 = arith.constant 0 : index
    %c512_70 = arith.constant 512 : index
    %247 = vector.load %arg9[%c0_69, %c512_70] : memref<8x2304xf32, #tpu.memory_space<vmem>>, vector<8x256xf32>
    %248 = arith.subf %247, %152 : vector<8x256xf32>
    %249 = math.exp %248 : vector<8x256xf32>
    %250 = vector.extract_strided_slice %154 {offsets = [2, 0], sizes = [1, 256], strides = [1, 1]} : vector<9x256xbf16> to vector<1x256xbf16>
    %251 = arith.extf %250 : vector<1x256xbf16> to vector<1x256xf32>
    %252 = vector.broadcast %251 : vector<1x256xf32> to vector<8x256xf32>
    %253 = arith.mulf %249, %252 : vector<8x256xf32>
    %254 = arith.addf %231, %253 : vector<8x256xf32>
    %255 = vector.extract_strided_slice %253 {offsets = [0, 0], sizes = [1, 256], strides = [1, 1]} : vector<8x256xf32> to vector<1x256xf32>
    %256 = vector.shape_cast %255 : vector<1x256xf32> to vector<1x256xf32>
    %257 = vector.broadcast %256 : vector<1x256xf32> to vector<8x256xf32>
    %258 = vector.extract_strided_slice %253 {offsets = [1, 0], sizes = [1, 256], strides = [1, 1]} : vector<8x256xf32> to vector<1x256xf32>
    %259 = vector.shape_cast %258 : vector<1x256xf32> to vector<1x256xf32>
    %260 = vector.broadcast %259 : vector<1x256xf32> to vector<8x256xf32>
    %261 = vector.extract_strided_slice %253 {offsets = [2, 0], sizes = [1, 256], strides = [1, 1]} : vector<8x256xf32> to vector<1x256xf32>
    %262 = vector.shape_cast %261 : vector<1x256xf32> to vector<1x256xf32>
    %263 = vector.broadcast %262 : vector<1x256xf32> to vector<8x256xf32>
    %264 = vector.extract_strided_slice %253 {offsets = [3, 0], sizes = [1, 256], strides = [1, 1]} : vector<8x256xf32> to vector<1x256xf32>
    %265 = vector.shape_cast %264 : vector<1x256xf32> to vector<1x256xf32>
    %266 = vector.broadcast %265 : vector<1x256xf32> to vector<8x256xf32>
    %267 = tpu.concatenate %257, %260, %263, %266 in 0 : vector<8x256xf32>, vector<8x256xf32>, vector<8x256xf32>, vector<8x256xf32> -> vector<32x256xf32>
    %268 = arith.mulf %267, %200 : vector<32x256xf32>
    %269 = arith.addf %246, %268 : vector<32x256xf32>
    %c1_i32_71 = arith.constant 1 : i32
    %270 = tpu.dynamic_rotate %171 by %c1_i32_71 dim 1 : vector<32x256xf32>, i32 -> vector<32x256xf32>
    %271 = vector.shape_cast %7 : vector<1x256xi1> to vector<1x256xi1>
    %272 = vector.broadcast %271 : vector<1x256xi1> to vector<32x256xi1>
    %273 = arith.select %272, %171, %270 : vector<32x256xi1>, vector<32x256xf32>
    %c2_i32_72 = arith.constant 2 : i32
    %274 = tpu.dynamic_rotate %171 by %c2_i32_72 dim 1 : vector<32x256xf32>, i32 -> vector<32x256xf32>
    %275 = vector.shape_cast %9 : vector<1x256xi1> to vector<1x256xi1>
    %276 = vector.broadcast %275 : vector<1x256xi1> to vector<32x256xi1>
    %277 = arith.select %276, %274, %273 : vector<32x256xi1>, vector<32x256xf32>
    %c255_i32_73 = arith.constant 255 : i32
    %278 = tpu.dynamic_rotate %171 by %c255_i32_73 dim 1 : vector<32x256xf32>, i32 -> vector<32x256xf32>
    %279 = vector.shape_cast %7 : vector<1x256xi1> to vector<1x256xi1>
    %280 = vector.broadcast %279 : vector<1x256xi1> to vector<32x256xi1>
    %281 = arith.select %280, %278, %171 : vector<32x256xi1>, vector<32x256xf32>
    %282 = vector.shape_cast %9 : vector<1x256xi1> to vector<1x256xi1>
    %283 = vector.broadcast %282 : vector<1x256xi1> to vector<32x256xi1>
    %284 = arith.select %283, %270, %281 : vector<32x256xi1>, vector<32x256xf32>
    %c254_i32_74 = arith.constant 254 : i32
    %285 = tpu.dynamic_rotate %171 by %c254_i32_74 dim 1 : vector<32x256xf32>, i32 -> vector<32x256xf32>
    %286 = vector.shape_cast %7 : vector<1x256xi1> to vector<1x256xi1>
    %287 = vector.broadcast %286 : vector<1x256xi1> to vector<32x256xi1>
    %288 = arith.select %287, %285, %278 : vector<32x256xi1>, vector<32x256xf32>
    %289 = vector.shape_cast %9 : vector<1x256xi1> to vector<1x256xi1>
    %290 = vector.broadcast %289 : vector<1x256xi1> to vector<32x256xi1>
    %291 = arith.select %290, %171, %288 : vector<32x256xi1>, vector<32x256xf32>
    %c0_75 = arith.constant 0 : index
    %c768_76 = arith.constant 768 : index
    %292 = vector.load %arg9[%c0_75, %c768_76] : memref<8x2304xf32, #tpu.memory_space<vmem>>, vector<8x256xf32>
    %293 = arith.subf %292, %152 : vector<8x256xf32>
    %294 = math.exp %293 : vector<8x256xf32>
    %295 = vector.extract_strided_slice %154 {offsets = [3, 0], sizes = [1, 256], strides = [1, 1]} : vector<9x256xbf16> to vector<1x256xbf16>
    %296 = arith.extf %295 : vector<1x256xbf16> to vector<1x256xf32>
    %297 = vector.broadcast %296 : vector<1x256xf32> to vector<8x256xf32>
    %298 = arith.mulf %294, %297 : vector<8x256xf32>
    %299 = arith.addf %254, %298 : vector<8x256xf32>
    %300 = vector.extract_strided_slice %298 {offsets = [0, 0], sizes = [1, 256], strides = [1, 1]} : vector<8x256xf32> to vector<1x256xf32>
    %301 = vector.shape_cast %300 : vector<1x256xf32> to vector<1x256xf32>
    %302 = vector.broadcast %301 : vector<1x256xf32> to vector<8x256xf32>
    %303 = vector.extract_strided_slice %298 {offsets = [1, 0], sizes = [1, 256], strides = [1, 1]} : vector<8x256xf32> to vector<1x256xf32>
    %304 = vector.shape_cast %303 : vector<1x256xf32> to vector<1x256xf32>
    %305 = vector.broadcast %304 : vector<1x256xf32> to vector<8x256xf32>
    %306 = vector.extract_strided_slice %298 {offsets = [2, 0], sizes = [1, 256], strides = [1, 1]} : vector<8x256xf32> to vector<1x256xf32>
    %307 = vector.shape_cast %306 : vector<1x256xf32> to vector<1x256xf32>
    %308 = vector.broadcast %307 : vector<1x256xf32> to vector<8x256xf32>
    %309 = vector.extract_strided_slice %298 {offsets = [3, 0], sizes = [1, 256], strides = [1, 1]} : vector<8x256xf32> to vector<1x256xf32>
    %310 = vector.shape_cast %309 : vector<1x256xf32> to vector<1x256xf32>
    %311 = vector.broadcast %310 : vector<1x256xf32> to vector<8x256xf32>
    %312 = tpu.concatenate %302, %305, %308, %311 in 0 : vector<8x256xf32>, vector<8x256xf32>, vector<8x256xf32>, vector<8x256xf32> -> vector<32x256xf32>
    %313 = arith.mulf %312, %277 : vector<32x256xf32>
    %314 = arith.addf %269, %313 : vector<32x256xf32>
    %c0_77 = arith.constant 0 : index
    %c1024_78 = arith.constant 1024 : index
    %315 = vector.load %arg9[%c0_77, %c1024_78] : memref<8x2304xf32, #tpu.memory_space<vmem>>, vector<8x256xf32>
    %316 = arith.subf %315, %152 : vector<8x256xf32>
    %317 = math.exp %316 : vector<8x256xf32>
    %318 = vector.extract_strided_slice %154 {offsets = [4, 0], sizes = [1, 256], strides = [1, 1]} : vector<9x256xbf16> to vector<1x256xbf16>
    %319 = arith.extf %318 : vector<1x256xbf16> to vector<1x256xf32>
    %320 = vector.broadcast %319 : vector<1x256xf32> to vector<8x256xf32>
    %321 = arith.mulf %317, %320 : vector<8x256xf32>
    %322 = arith.addf %299, %321 : vector<8x256xf32>
    %323 = vector.extract_strided_slice %321 {offsets = [0, 0], sizes = [1, 256], strides = [1, 1]} : vector<8x256xf32> to vector<1x256xf32>
    %324 = vector.shape_cast %323 : vector<1x256xf32> to vector<1x256xf32>
    %325 = vector.broadcast %324 : vector<1x256xf32> to vector<8x256xf32>
    %326 = vector.extract_strided_slice %321 {offsets = [1, 0], sizes = [1, 256], strides = [1, 1]} : vector<8x256xf32> to vector<1x256xf32>
    %327 = vector.shape_cast %326 : vector<1x256xf32> to vector<1x256xf32>
    %328 = vector.broadcast %327 : vector<1x256xf32> to vector<8x256xf32>
    %329 = vector.extract_strided_slice %321 {offsets = [2, 0], sizes = [1, 256], strides = [1, 1]} : vector<8x256xf32> to vector<1x256xf32>
    %330 = vector.shape_cast %329 : vector<1x256xf32> to vector<1x256xf32>
    %331 = vector.broadcast %330 : vector<1x256xf32> to vector<8x256xf32>
    %332 = vector.extract_strided_slice %321 {offsets = [3, 0], sizes = [1, 256], strides = [1, 1]} : vector<8x256xf32> to vector<1x256xf32>
    %333 = vector.shape_cast %332 : vector<1x256xf32> to vector<1x256xf32>
    %334 = vector.broadcast %333 : vector<1x256xf32> to vector<8x256xf32>
    %335 = tpu.concatenate %325, %328, %331, %334 in 0 : vector<8x256xf32>, vector<8x256xf32>, vector<8x256xf32>, vector<8x256xf32> -> vector<32x256xf32>
    %336 = arith.mulf %335, %284 : vector<32x256xf32>
    %337 = arith.addf %314, %336 : vector<32x256xf32>
    %c0_79 = arith.constant 0 : index
    %c1280_80 = arith.constant 1280 : index
    %338 = vector.load %arg9[%c0_79, %c1280_80] : memref<8x2304xf32, #tpu.memory_space<vmem>>, vector<8x256xf32>
    %339 = arith.subf %338, %152 : vector<8x256xf32>
    %340 = math.exp %339 : vector<8x256xf32>
    %341 = vector.extract_strided_slice %154 {offsets = [5, 0], sizes = [1, 256], strides = [1, 1]} : vector<9x256xbf16> to vector<1x256xbf16>
    %342 = arith.extf %341 : vector<1x256xbf16> to vector<1x256xf32>
    %343 = vector.broadcast %342 : vector<1x256xf32> to vector<8x256xf32>
    %344 = arith.mulf %340, %343 : vector<8x256xf32>
    %345 = arith.addf %322, %344 : vector<8x256xf32>
    %346 = vector.extract_strided_slice %344 {offsets = [0, 0], sizes = [1, 256], strides = [1, 1]} : vector<8x256xf32> to vector<1x256xf32>
    %347 = vector.shape_cast %346 : vector<1x256xf32> to vector<1x256xf32>
    %348 = vector.broadcast %347 : vector<1x256xf32> to vector<8x256xf32>
    %349 = vector.extract_strided_slice %344 {offsets = [1, 0], sizes = [1, 256], strides = [1, 1]} : vector<8x256xf32> to vector<1x256xf32>
    %350 = vector.shape_cast %349 : vector<1x256xf32> to vector<1x256xf32>
    %351 = vector.broadcast %350 : vector<1x256xf32> to vector<8x256xf32>
    %352 = vector.extract_strided_slice %344 {offsets = [2, 0], sizes = [1, 256], strides = [1, 1]} : vector<8x256xf32> to vector<1x256xf32>
    %353 = vector.shape_cast %352 : vector<1x256xf32> to vector<1x256xf32>
    %354 = vector.broadcast %353 : vector<1x256xf32> to vector<8x256xf32>
    %355 = vector.extract_strided_slice %344 {offsets = [3, 0], sizes = [1, 256], strides = [1, 1]} : vector<8x256xf32> to vector<1x256xf32>
    %356 = vector.shape_cast %355 : vector<1x256xf32> to vector<1x256xf32>
    %357 = vector.broadcast %356 : vector<1x256xf32> to vector<8x256xf32>
    %358 = tpu.concatenate %348, %351, %354, %357 in 0 : vector<8x256xf32>, vector<8x256xf32>, vector<8x256xf32>, vector<8x256xf32> -> vector<32x256xf32>
    %359 = arith.mulf %358, %291 : vector<32x256xf32>
    %360 = arith.addf %337, %359 : vector<32x256xf32>
    %c1_i32_81 = arith.constant 1 : i32
    %361 = tpu.dynamic_rotate %178 by %c1_i32_81 dim 1 : vector<32x256xf32>, i32 -> vector<32x256xf32>
    %362 = vector.shape_cast %7 : vector<1x256xi1> to vector<1x256xi1>
    %363 = vector.broadcast %362 : vector<1x256xi1> to vector<32x256xi1>
    %364 = arith.select %363, %178, %361 : vector<32x256xi1>, vector<32x256xf32>
    %c2_i32_82 = arith.constant 2 : i32
    %365 = tpu.dynamic_rotate %178 by %c2_i32_82 dim 1 : vector<32x256xf32>, i32 -> vector<32x256xf32>
    %366 = vector.shape_cast %9 : vector<1x256xi1> to vector<1x256xi1>
    %367 = vector.broadcast %366 : vector<1x256xi1> to vector<32x256xi1>
    %368 = arith.select %367, %365, %364 : vector<32x256xi1>, vector<32x256xf32>
    %c255_i32_83 = arith.constant 255 : i32
    %369 = tpu.dynamic_rotate %178 by %c255_i32_83 dim 1 : vector<32x256xf32>, i32 -> vector<32x256xf32>
    %370 = vector.shape_cast %7 : vector<1x256xi1> to vector<1x256xi1>
    %371 = vector.broadcast %370 : vector<1x256xi1> to vector<32x256xi1>
    %372 = arith.select %371, %369, %178 : vector<32x256xi1>, vector<32x256xf32>
    %373 = vector.shape_cast %9 : vector<1x256xi1> to vector<1x256xi1>
    %374 = vector.broadcast %373 : vector<1x256xi1> to vector<32x256xi1>
    %375 = arith.select %374, %361, %372 : vector<32x256xi1>, vector<32x256xf32>
    %c254_i32_84 = arith.constant 254 : i32
    %376 = tpu.dynamic_rotate %178 by %c254_i32_84 dim 1 : vector<32x256xf32>, i32 -> vector<32x256xf32>
    %377 = vector.shape_cast %7 : vector<1x256xi1> to vector<1x256xi1>
    %378 = vector.broadcast %377 : vector<1x256xi1> to vector<32x256xi1>
    %379 = arith.select %378, %376, %369 : vector<32x256xi1>, vector<32x256xf32>
    %380 = vector.shape_cast %9 : vector<1x256xi1> to vector<1x256xi1>
    %381 = vector.broadcast %380 : vector<1x256xi1> to vector<32x256xi1>
    %382 = arith.select %381, %178, %379 : vector<32x256xi1>, vector<32x256xf32>
    %c0_85 = arith.constant 0 : index
    %c1536_86 = arith.constant 1536 : index
    %383 = vector.load %arg9[%c0_85, %c1536_86] : memref<8x2304xf32, #tpu.memory_space<vmem>>, vector<8x256xf32>
    %384 = arith.subf %383, %152 : vector<8x256xf32>
    %385 = math.exp %384 : vector<8x256xf32>
    %386 = vector.extract_strided_slice %154 {offsets = [6, 0], sizes = [1, 256], strides = [1, 1]} : vector<9x256xbf16> to vector<1x256xbf16>
    %387 = arith.extf %386 : vector<1x256xbf16> to vector<1x256xf32>
    %388 = vector.broadcast %387 : vector<1x256xf32> to vector<8x256xf32>
    %389 = arith.mulf %385, %388 : vector<8x256xf32>
    %390 = arith.addf %345, %389 : vector<8x256xf32>
    %391 = vector.extract_strided_slice %389 {offsets = [0, 0], sizes = [1, 256], strides = [1, 1]} : vector<8x256xf32> to vector<1x256xf32>
    %392 = vector.shape_cast %391 : vector<1x256xf32> to vector<1x256xf32>
    %393 = vector.broadcast %392 : vector<1x256xf32> to vector<8x256xf32>
    %394 = vector.extract_strided_slice %389 {offsets = [1, 0], sizes = [1, 256], strides = [1, 1]} : vector<8x256xf32> to vector<1x256xf32>
    %395 = vector.shape_cast %394 : vector<1x256xf32> to vector<1x256xf32>
    %396 = vector.broadcast %395 : vector<1x256xf32> to vector<8x256xf32>
    %397 = vector.extract_strided_slice %389 {offsets = [2, 0], sizes = [1, 256], strides = [1, 1]} : vector<8x256xf32> to vector<1x256xf32>
    %398 = vector.shape_cast %397 : vector<1x256xf32> to vector<1x256xf32>
    %399 = vector.broadcast %398 : vector<1x256xf32> to vector<8x256xf32>
    %400 = vector.extract_strided_slice %389 {offsets = [3, 0], sizes = [1, 256], strides = [1, 1]} : vector<8x256xf32> to vector<1x256xf32>
    %401 = vector.shape_cast %400 : vector<1x256xf32> to vector<1x256xf32>
    %402 = vector.broadcast %401 : vector<1x256xf32> to vector<8x256xf32>
    %403 = tpu.concatenate %393, %396, %399, %402 in 0 : vector<8x256xf32>, vector<8x256xf32>, vector<8x256xf32>, vector<8x256xf32> -> vector<32x256xf32>
    %404 = arith.mulf %403, %368 : vector<32x256xf32>
    %405 = arith.addf %360, %404 : vector<32x256xf32>
    %c0_87 = arith.constant 0 : index
    %c1792_88 = arith.constant 1792 : index
    %406 = vector.load %arg9[%c0_87, %c1792_88] : memref<8x2304xf32, #tpu.memory_space<vmem>>, vector<8x256xf32>
    %407 = arith.subf %406, %152 : vector<8x256xf32>
    %408 = math.exp %407 : vector<8x256xf32>
    %409 = vector.extract_strided_slice %154 {offsets = [7, 0], sizes = [1, 256], strides = [1, 1]} : vector<9x256xbf16> to vector<1x256xbf16>
    %410 = arith.extf %409 : vector<1x256xbf16> to vector<1x256xf32>
    %411 = vector.broadcast %410 : vector<1x256xf32> to vector<8x256xf32>
    %412 = arith.mulf %408, %411 : vector<8x256xf32>
    %413 = arith.addf %390, %412 : vector<8x256xf32>
    %414 = vector.extract_strided_slice %412 {offsets = [0, 0], sizes = [1, 256], strides = [1, 1]} : vector<8x256xf32> to vector<1x256xf32>
    %415 = vector.shape_cast %414 : vector<1x256xf32> to vector<1x256xf32>
    %416 = vector.broadcast %415 : vector<1x256xf32> to vector<8x256xf32>
    %417 = vector.extract_strided_slice %412 {offsets = [1, 0], sizes = [1, 256], strides = [1, 1]} : vector<8x256xf32> to vector<1x256xf32>
    %418 = vector.shape_cast %417 : vector<1x256xf32> to vector<1x256xf32>
    %419 = vector.broadcast %418 : vector<1x256xf32> to vector<8x256xf32>
    %420 = vector.extract_strided_slice %412 {offsets = [2, 0], sizes = [1, 256], strides = [1, 1]} : vector<8x256xf32> to vector<1x256xf32>
    %421 = vector.shape_cast %420 : vector<1x256xf32> to vector<1x256xf32>
    %422 = vector.broadcast %421 : vector<1x256xf32> to vector<8x256xf32>
    %423 = vector.extract_strided_slice %412 {offsets = [3, 0], sizes = [1, 256], strides = [1, 1]} : vector<8x256xf32> to vector<1x256xf32>
    %424 = vector.shape_cast %423 : vector<1x256xf32> to vector<1x256xf32>
    %425 = vector.broadcast %424 : vector<1x256xf32> to vector<8x256xf32>
    %426 = tpu.concatenate %416, %419, %422, %425 in 0 : vector<8x256xf32>, vector<8x256xf32>, vector<8x256xf32>, vector<8x256xf32> -> vector<32x256xf32>
    %427 = arith.mulf %426, %375 : vector<32x256xf32>
    %428 = arith.addf %405, %427 : vector<32x256xf32>
    %c0_89 = arith.constant 0 : index
    %c2048_90 = arith.constant 2048 : index
    %429 = vector.load %arg9[%c0_89, %c2048_90] : memref<8x2304xf32, #tpu.memory_space<vmem>>, vector<8x256xf32>
    %430 = arith.subf %429, %152 : vector<8x256xf32>
    %431 = math.exp %430 : vector<8x256xf32>
    %432 = vector.extract_strided_slice %154 {offsets = [8, 0], sizes = [1, 256], strides = [1, 1]} : vector<9x256xbf16> to vector<1x256xbf16>
    %433 = arith.extf %432 : vector<1x256xbf16> to vector<1x256xf32>
    %434 = vector.broadcast %433 : vector<1x256xf32> to vector<8x256xf32>
    %435 = arith.mulf %431, %434 : vector<8x256xf32>
    %436 = arith.addf %413, %435 : vector<8x256xf32>
    %437 = vector.extract_strided_slice %435 {offsets = [0, 0], sizes = [1, 256], strides = [1, 1]} : vector<8x256xf32> to vector<1x256xf32>
    %438 = vector.shape_cast %437 : vector<1x256xf32> to vector<1x256xf32>
    %439 = vector.broadcast %438 : vector<1x256xf32> to vector<8x256xf32>
    %440 = vector.extract_strided_slice %435 {offsets = [1, 0], sizes = [1, 256], strides = [1, 1]} : vector<8x256xf32> to vector<1x256xf32>
    %441 = vector.shape_cast %440 : vector<1x256xf32> to vector<1x256xf32>
    %442 = vector.broadcast %441 : vector<1x256xf32> to vector<8x256xf32>
    %443 = vector.extract_strided_slice %435 {offsets = [2, 0], sizes = [1, 256], strides = [1, 1]} : vector<8x256xf32> to vector<1x256xf32>
    %444 = vector.shape_cast %443 : vector<1x256xf32> to vector<1x256xf32>
    %445 = vector.broadcast %444 : vector<1x256xf32> to vector<8x256xf32>
    %446 = vector.extract_strided_slice %435 {offsets = [3, 0], sizes = [1, 256], strides = [1, 1]} : vector<8x256xf32> to vector<1x256xf32>
    %447 = vector.shape_cast %446 : vector<1x256xf32> to vector<1x256xf32>
    %448 = vector.broadcast %447 : vector<1x256xf32> to vector<8x256xf32>
    %449 = tpu.concatenate %439, %442, %445, %448 in 0 : vector<8x256xf32>, vector<8x256xf32>, vector<8x256xf32>, vector<8x256xf32> -> vector<32x256xf32>
    %450 = arith.mulf %449, %382 : vector<32x256xf32>
    %451 = arith.addf %428, %450 : vector<32x256xf32>
    %cst_91 = arith.constant 9.99999997E-7 : f32
    %452 = vector.broadcast %cst_91 : f32 to vector<8x256xf32>
    %453 = arith.addf %436, %452 : vector<8x256xf32>
    %cst_92 = arith.constant 1.000000e+00 : f32
    %454 = vector.broadcast %cst_92 : f32 to vector<8x256xf32>
    %455 = arith.divf %454, %453 : vector<8x256xf32>
    %456 = vector.extract_strided_slice %455 {offsets = [0, 0], sizes = [1, 256], strides = [1, 1]} : vector<8x256xf32> to vector<1x256xf32>
    %457 = vector.shape_cast %456 : vector<1x256xf32> to vector<1x256xf32>
    %458 = vector.broadcast %457 : vector<1x256xf32> to vector<8x256xf32>
    %459 = vector.extract_strided_slice %455 {offsets = [1, 0], sizes = [1, 256], strides = [1, 1]} : vector<8x256xf32> to vector<1x256xf32>
    %460 = vector.shape_cast %459 : vector<1x256xf32> to vector<1x256xf32>
    %461 = vector.broadcast %460 : vector<1x256xf32> to vector<8x256xf32>
    %462 = vector.extract_strided_slice %455 {offsets = [2, 0], sizes = [1, 256], strides = [1, 1]} : vector<8x256xf32> to vector<1x256xf32>
    %463 = vector.shape_cast %462 : vector<1x256xf32> to vector<1x256xf32>
    %464 = vector.broadcast %463 : vector<1x256xf32> to vector<8x256xf32>
    %465 = vector.extract_strided_slice %455 {offsets = [3, 0], sizes = [1, 256], strides = [1, 1]} : vector<8x256xf32> to vector<1x256xf32>
    %466 = vector.shape_cast %465 : vector<1x256xf32> to vector<1x256xf32>
    %467 = vector.broadcast %466 : vector<1x256xf32> to vector<8x256xf32>
    %468 = tpu.concatenate %458, %461, %464, %467 in 0 : vector<8x256xf32>, vector<8x256xf32>, vector<8x256xf32>, vector<8x256xf32> -> vector<32x256xf32>
    %469 = arith.mulf %451, %468 : vector<32x256xf32>
    %c0_93 = arith.constant 0 : index
    %c0_94 = arith.constant 0 : index
    %470 = vector.load %arg6[%c0_93, %c0_94] : memref<32x32xbf16, #tpu.memory_space<vmem>>, vector<32x32xbf16>
    %471 = arith.truncf %469 : vector<32x256xf32> to vector<32x256xbf16>
    %cst_95 = arith.constant dense<0.000000e+00> : vector<32x256xf32>
    %472 = tpu.matmul %470, %471, %cst_95 {dimension_numbers = #tpu.dot_dimension_numbers<[1], [0], [0], [1], [0, 0, 1, 1], [], []>} : vector<32x32xbf16>, vector<32x256xbf16>, vector<32x256xf32> -> vector<32x256xf32>
    %c0_96 = arith.constant 0 : index
    %c0_97 = arith.constant 0 : index
    %c0_98 = arith.constant 0 : index
    %473 = vector.load %arg7[%c0_96, %c0_97, %c0_98] : memref<1x32x256xf32, #tpu.memory_space<vmem>>, vector<1x32x256xf32>
    %474 = vector.shape_cast %473 : vector<1x32x256xf32> to vector<32x256xf32>
    %475 = vector.shape_cast %472 : vector<32x256xf32> to vector<1x32x256xf32>
    tpu.vector_store %arg7[%c0_96, %c0_97, %c0_98], %475 {strides = array<i32>} : memref<1x32x256xf32, #tpu.memory_space<vmem>>, vector<1x32x256xf32>,
    return
  }
  func.func @transform_0(%arg0: i32) -> (i32, i32, i32) {
    %c0_i32 = arith.constant 0 : i32
    %c0_i32_0 = arith.constant 0 : i32
    %c0_i32_1 = arith.constant 0 : i32
    return %arg0, %c0_i32, %c0_i32_0 : i32, i32, i32
  }
  func.func @transform_1(%arg0: i32) -> (i32, i32, i32) {
    %c0_i32 = arith.constant 0 : i32
    %c0_i32_0 = arith.constant 0 : i32
    %c0_i32_1 = arith.constant 0 : i32
    return %arg0, %c0_i32, %c0_i32_0 : i32, i32, i32
  }
  func.func @transform_2(%arg0: i32) -> (i32, i32) {
    %c0_i32 = arith.constant 0 : i32
    %c0_i32_0 = arith.constant 0 : i32
    %c0_i32_1 = arith.constant 0 : i32
    return %c0_i32, %c0_i32_0 : i32, i32
  }
  func.func @transform_3(%arg0: i32) -> (i32, i32) {
    %c0_i32 = arith.constant 0 : i32
    %c0_i32_0 = arith.constant 0 : i32
    %c0_i32_1 = arith.constant 0 : i32
    return %c0_i32, %c0_i32_0 : i32, i32
  }
  func.func @transform_4(%arg0: i32) -> (i32, i32) {
    %c0_i32 = arith.constant 0 : i32
    %c0_i32_0 = arith.constant 0 : i32
    %c0_i32_1 = arith.constant 0 : i32
    return %c0_i32, %c0_i32_0 : i32, i32
  }
  func.func @transform_5(%arg0: i32) -> (i32, i32) {
    %c0_i32 = arith.constant 0 : i32
    %c0_i32_0 = arith.constant 0 : i32
    %c0_i32_1 = arith.constant 0 : i32
    return %c0_i32, %c0_i32_0 : i32, i32
  }
  func.func @transform_6(%arg0: i32) -> (i32, i32, i32) {
    %c0_i32 = arith.constant 0 : i32
    %c0_i32_0 = arith.constant 0 : i32
    %c0_i32_1 = arith.constant 0 : i32
    return %arg0, %c0_i32, %c0_i32_0 : i32, i32, i32
  }
}

</mosaic_0001>

<bundles_post_ra>
// kernel: tpu_custom_call.1
= control target key start
LH: loop header
LB: loop body
LE: loop exit
PB: predicated region body
PF: predicated region fallthrough
CT: control target
= control target key end

     0   :  { %11 = vsyncpa [#allocation5], 0  ;;  %s6680_s0 = inlined_call_operand.vmem [shape: bf16[2,32,256], index: 0, kind: input, shape index: {}]   ;;  %s6681_s1 = inlined_call_operand.vmem [shape: bf16[2,9,256], index: 1, kind: input, shape index: {}]   ;;  %s6682_s2 = inlined_call_operand.vmem [shape: s32[2,256], index: 2, kind: input, shape index: {}]   ;;  %s6683_s3 = inlined_call_operand.vmem [shape: bf16[96,32], index: 3, kind: input, shape index: {}]   ;;  %s6684_s4 = inlined_call_operand.vmem [shape: bf16[8,32], index: 4, kind: input, shape index: {}]   ;;  %s6685_s5 = inlined_call_operand.vmem [shape: bf16[32,32], index: 5, kind: input, shape index: {}]   ;;  %s6686_s6 = inlined_call_operand.hbm [shape: f32[2,32,256], index: 6, kind: output, shape index: {}]  }
   0x1   :  { %13 = vsyncpa [#allocation5 + $0x1], 0  ;;  %s3301_s21 = smov 0   ;;  %s3303_s22 = smov 0  }
   0x2   :  { %s3305_s23 = smov 0   ;;  %s3307_s24 = smov 0  }
   0x3 LB: > { %s3322_s25 = sadd.s32 4294967295, %s3254_s24   ;;  %s2811_s26 = sadd.s32 4294967294, %s3254_s24   ;;  %s3254_s24 = sphi %s3307_s24, %s6972_s24   ;;  %s3250_s23 = sphi %s3305_s23, %s6971_s23   ;;  %s3246_s22 = sphi %s3303_s22, %s6970_s22   ;;  %s3242_s21 = sphi %s3301_s21, %s6969_s21  }
   0x4   : > { %s3326_s27 = sadd.s32 1, %s3254_s24   ;;  %s162_s28 = sadd.s32 1, %s3250_s23 }
   0x5   : > { %s159_s29 = ssub.s32 %s3254_s24, %s3326_s27  ;;  %p172_p0 = scmp.ne.s32.totalorder %s3250_s23, %s3246_s22 }
   0x6   : > { %p160_p1 = scmp.eq.s32.totalorder %s159_s29, 0  ;;  %p173_p2 = scmp.eq.s32.totalorder %s3322_s25, 1 }
   0x7   : > { %p178_p3 = scmp.ne.s32.totalorder %s3246_s22, %s3242_s21  ;;  %p179_p4 = scmp.eq.s32.totalorder %s2811_s26, 1 }
   0x8   : > { %s3337_s30 = scalar_select %p160_p1, %s3250_s23, %s162_s28  }
   0x9   : > { %p3339_p5 = por %p173_p2, %p172_p0  ;;  %p3343_p6 = por %p179_p4, %p178_p3 }
   0xa   : > { %p2814_p7 = scmp.ge.s32.totalorder %s3254_s24, 1  ;;  %p225_p8 = scmp.lt.s32.totalorder %s3254_s24, 3 }
   0xc   : > { %p226_p9 = pnand %p2814_p7, %p225_p8 }
   0xe   : > { %229 = sbr.rel (%p226_p9) target bundleno = 1263 (0x4ef), region = 44 }
  0x13   : > { %p260_p10 = scmp.lt.s32.totalorder %s3322_s25, 1  ;;  %v3054_v12 = vld [vmem:[%s6683_s3] sm:$0xff]  ;;  %vm6689_vm0 = vcmask 261120   ;;  %v3055_v13 = vld [vmem:[%s6683_s3 + $0x8] sm:$0xff]  ;;  %v3056_v14 = vld [vmem:[%s6683_s3 + $0x10] sm:$0xff]  ;;  %s3256_s28 = smov 112   ;;  %v457_v33 = vlaneseq }
  0x14   : > { %v3057_v15 = vld [vmem:[%s6683_s3 + $0x18] sm:$0xff]  ;;  %s3257_s29 = smov 16   ;;  %s3259_s11 = smov 32   ;;  %v271_v32 = vld [vmem:[%s6682_s2] ss:$2 sm:$0x3] }
  0x15   : > { %s3351_s9 = scalar_select %p260_p10, %s3322_s25, 1  ;;  %vm274_vm1 = vcmp.eq.s32.totalorder %v271_v32, 0  ;;  %v3260_v35 = vmov 0   ;;  %vm275_vm2 = vcmp.eq.s32.totalorder %v271_v32, 15  ;;  %v3477_v37 = vand.u32 127, %v457_v33 }
  0x16   : > { %v468_v36 = vsel %vm274_vm1, 1, %v3260_v35  ;;  %v506_v40 = vsel %vm275_vm2, 1, %v3260_v35  ;;  %v6770_v44 = vmov 0  ;;  %v6773_v45 = vmov 0  ;;  %s3261_s14 = smov 1   ;;  %s3262_s15 = smov 2  }
  0x17   : > { %s3052_s10 = sshll.u32 %s3351_s9, 5  ;;  %v469_v39 = vperm.slane %v468_v36, 0  ;;  %v470_v41 = vperm.slane %v468_v36, 1  ;;  %vm459_vm3 = vcmp.lt.s32.totalorder %v3477_v37, 16  ;;  %v507_v42 = vperm.slane %v506_v40, 0  ;;  %s3263_s16 = smov 127  }
  0x18   : > { %s264_s13 = scalar_lea.vmem %s6680_s0, %s3052_s10  ;;  %s3258_s10 = smov 96   ;;  %v508_v43 = vperm.slane %v506_v40, 1  ;;  %vm497_vm6 = vcmp.lt.s32.totalorder %v3477_v37, 32  ;;  %v6778_v50 = vmov 0  ;;  %vm6691_vm9 = vcmp.lt.s32.totalorder %v3477_v37, 112 }
  0x19   : > { %v2855_v0 = vld [vmem:[%s264_s13 + $0x10] sm:$0xf]  ;;  %v3063_v1 = vld [vmem:[%s264_s13 + $0x14] sm:$0xf0]  ;;  %v3062_v2 = vld [vmem:[%s264_s13 + $0x14] sm:$0xf] }
  0x1a   : > { %v2856_v3 = vor.u32 %v3063_v1, %v2855_v0  ;;  %v2857_v4 = vld [vmem:[%s264_s13 + $0x18] sm:$0xf0]  ;;  %v2847_v5 = vld [vmem:[%s264_s13] sm:$0xf]  ;;  %v3061_v6 = vld [vmem:[%s264_s13 + $0x4] sm:$0xf0] }
  0x1b   : > { %v2860_v7 = vor.u32 %v3062_v2, %v2857_v4  ;;  %v3060_v8 = vld [vmem:[%s264_s13 + $0x4] sm:$0xf]  ;;  %v2849_v9 = vld [vmem:[%s264_s13 + $0x8] sm:$0xf0]  ;;  %v2848_v10 = vor.u32 %v3061_v6, %v2847_v5  ;;  %vm3481_vm4 = vcmp.eq.s32.totalorder %v469_v39, 1  ;;  %vm3485_vm5 = vcmp.eq.s32.totalorder %v470_v41, 1 }
  0x1c   : > { %369 = vmatpush.bf16.msra.mxu0 %v2856_v3  ;;  %v2852_v11 = vor.u32 %v3060_v8, %v2849_v9  ;;  %v6771_v44 = vsel %vm3481_vm4, 4294967295, %v6770_v44  ;;  %v6774_v45 = vsel %vm3485_vm5, 4294967295, %v6773_v45  ;;  %vm3494_vm7 = vcmp.eq.s32.totalorder %v507_v42, 1  ;;  %s3264_s17 = smov 126   ;;  %s257_s20 = sand.u32 1, %s3246_s22  }
  0x1d   : > { %408 = vmatpush.bf16.msra.mxu1 %v2860_v7  ;;  %6772 = vst [vmem:[#allocation9_spill] sm:$0xff] %v6771_v44  ;;  %vm3498_vm8 = vcmp.eq.s32.totalorder %v508_v43, 1  ;;  %vm6690_vm10 = vcmp.lt.s32.totalorder %v3477_v37, 96  ;;  %vm617_vm13 = vcmp.lt.s32.totalorder %v3477_v37, 1  ;;  %vm655_vm14 = vcmp.lt.s32.totalorder %v3477_v37, 2  ;;  %s2815_s26 = sshll.u32 %s257_s20, 6 }
  0x1e   : > { %6775 = vst [vmem:[#allocation10_spill] sm:$0xff] %v6774_v45  ;;  %v6779_v50 = vsel %vm3498_vm8, 4294967295, %v6778_v50  ;;  %s259_s12 = scalar_lea.vmem [#allocation4], %s2815_s26  ;;  %s3102_s13 = sshll.u32 %s3322_s25, 6 }
  0x1f   : > { %6780 = vst [vmem:[#allocation11_spill] sm:$0xff] %v6779_v50 }
  0x20   : > { %370 = vmatpush.bf16.msra.mxu0 %v2848_v10 }
  0x21   : > { %409 = vmatpush.bf16.msra.mxu1 %v2852_v11 }
  0x23   : > { %2861 = vmatmul.msk.bf16.vlgmr.msra.gmra.mxu0 %vm6689_vm0, %v3054_v12 }
  0x24   : > { %2867 = vmatmul.msk.bf16.vlgmr.msra.gmra.mxu1 %vm6689_vm0, %v3054_v12 }
  0x33   : > { %2862 = vmatmul.msk.bf16.gmra.mxu0 %vm6689_vm0, %v3055_v13 }
  0x34   : > { %2868 = vmatmul.msk.bf16.gmra.mxu1 %vm6689_vm0, %v3055_v13 }
  0x43   : > { %2863 = vmatmul.msk.bf16.gmra.mxu0 %vm6689_vm0, %v3056_v14 }
  0x44   : > { %2869 = vmatmul.msk.bf16.gmra.mxu1 %vm6689_vm0, %v3056_v14 }
  0x53   : > { %2864 = vmatmul.msk.bf16.gmra.mxu0 %vm6689_vm0, %v3057_v15 }
  0x54   : > { %2870 = vmatmul.msk.bf16.gmra.mxu1 %vm6689_vm0, %v3057_v15 }
  0xa0   : > { %v3377_v16 = vpop.f32.mrf.mxu0 }
  0xa1   : > { %v3379_v17 = vpop.f32.mrf.mxu1 }
  0xa8   : > { %v3381_v18 = vpop.f32.mrf.mxu0 }
  0xa9   : > { %v3383_v19 = vpop.f32.mrf.mxu1 }
  0xb0   : > { %v3385_v20 = vpop.f32.mrf.mxu0 }
  0xb1   : > { %v3387_v21 = vpop.f32.mrf.mxu1 }
  0xb8   : > { %v3389_v22 = vpop.f32.mrf.mxu0 }
  0xb9   : > { %6768 = vst [vmem:[#allocation7_spill] sm:$0xff] %v3389_v22  ;;  %v3391_v23 = vpop.f32.mrf.mxu1 }
  0xba   : > { %6769 = vst [vmem:[#allocation8_spill] sm:$0xff] %v3391_v23 }
  0xc0   : > { %v3393_v24 = vpop.f32.mrf.mxu0 }
  0xc1   : > { %v3395_v25 = vpop.f32.mrf.mxu1  ;;  %519 = vrot.lane.b32.xlu1 %v3393_v24, %s3256_s28  ;;  %441 = vrot.lane.b32.xlu0 %v3393_v24, %s3257_s29 }
  0xc2   : > { %449 = vrot.lane.b32.xlu2 %v3395_v25, %s3257_s29 }
  0xc8   : > { %v3417_v27 = vpop.f32.mrf.mxu0 }
  0xc9   : > { %568 = vrot.lane.b32.xlu1 %v3395_v25, %s3258_s10  ;;  %489 = vrot.lane.b32.xlu0 %v3395_v25, %s3259_s11  ;;  %v3409_v26 = vpop.f32.mrf.mxu1 }
  0xca   : > { %481 = vrot.lane.b32.xlu2 %v3393_v24, %s3259_s11 }
  0xd0   : > { %v3425_v28 = vpop.f32.mrf.mxu0 }
  0xd1   : > { %560 = vrot.lane.b32.xlu0 %v3393_v24, %s3258_s10  ;;  %491 = vrot.lane.b32.xlu1 %v3409_v26, %s3259_s11  ;;  %v3439_v29 = vpop.f32.mrf.mxu1 }
  0xd2   : > { %527 = vrot.lane.b32.xlu2 %v3395_v25, %s3256_s28 }
  0xd8   : > { %v3447_v30 = vpop.f32.mrf.mxu0 }
  0xd9   : > { %443 = vrot.lane.b32.xlu0 %v3417_v27, %s3257_s29  ;;  %562 = vrot.lane.b32.xlu1 %v3417_v27, %s3258_s10  ;;  %v3455_v31 = vpop.f32.mrf.mxu1 }
  0xda   : > { %451 = vrot.lane.b32.xlu2 %v3409_v26, %s3257_s29 }
  0xe1   : > { %483 = vrot.lane.b32.xlu0 %v3417_v27, %s3259_s11  ;;  %445 = vrot.lane.b32.xlu1 %v3425_v28, %s3257_s29 }
  0xe2   : > { %521 = vrot.lane.b32.xlu2 %v3417_v27, %s3256_s28 }
  0xe9   : > { %529 = vrot.lane.b32.xlu0 %v3409_v26, %s3256_s28  ;;  %485 = vrot.lane.b32.xlu1 %v3425_v28, %s3259_s11 }
  0xea   : > { %570 = vrot.lane.b32.xlu2 %v3409_v26, %s3258_s10 }
  0xf1   : > { %531 = vrot.lane.b32.xlu1 %v3439_v29, %s3256_s28  ;;  %453 = vrot.lane.b32.xlu0 %v3439_v29, %s3257_s29 }
  0xf2   : > { %493 = vrot.lane.b32.xlu2 %v3439_v29, %s3259_s11 }
  0xf9   : > { %447 = vrot.lane.b32.xlu1 %v3447_v30, %s3257_s29  ;;  %523 = vrot.lane.b32.xlu0 %v3425_v28, %s3256_s28 }
  0xfa   : > { %564 = vrot.lane.b32.xlu2 %v3425_v28, %s3258_s10 }
 0x101   : > { %572 = vrot.lane.b32.xlu0 %v3439_v29, %s3258_s10  ;;  %455 = vrot.lane.b32.xlu1 %v3455_v31, %s3257_s29 }
 0x102   : > { %487 = vrot.lane.b32.xlu2 %v3447_v30, %s3259_s11 }
 0x109   : > { %495 = vrot.lane.b32.xlu0 %v3455_v31, %s3259_s11  ;;  %525 = vrot.lane.b32.xlu1 %v3447_v30, %s3256_s28 }
 0x10a   : > { %533 = vrot.lane.b32.xlu2 %v3455_v31, %s3256_s28 }
 0x111   : > { %566 = vrot.lane.b32.xlu0 %v3447_v30, %s3258_s10  ;;  %574 = vrot.lane.b32.xlu1 %v3455_v31, %s3258_s10 }
 0x11c   : > { %v450_v34 = vpop.permute.xlu2 %449 }
 0x124   : > { %v482_v48 = vpop.permute.xlu2 %481 }
 0x12c   : > { %v528_v59 = vpop.permute.xlu2 %527 }
 0x133   : > { %v442_v38 = vpop.permute.xlu0 %441  ;;  %v520_v58 = vpop.permute.xlu1 %519 }
 0x134   : > { %v460_v46 = vsel %vm459_vm3, %v442_v38, %v450_v34  ;;  %v464_v47 = vsel %vm459_vm3, %v450_v34, %v442_v38  ;;  %v536_v60 = vsel %vm6691_vm9, %v520_v58, %v528_v59  ;;  %v540_v63 = vsel %vm6691_vm9, %v528_v59, %v520_v58  ;;  %v452_v3 = vpop.permute.xlu2 %451 }
 0x135   : > { %v473_v52 = vsel %vm3481_vm4, %v3393_v24, %v464_v47  ;;  %v474_v53 = vsel %vm3485_vm5, %v3395_v25, %v460_v46  ;;  %v544_v61 = vsel %vm3481_vm4, %v536_v60, %v3393_v24  ;;  %v545_v1 = vsel %vm3485_vm5, %v540_v63, %v3395_v25 }
 0x136   : > { %v3540_v62 = vsel %vm3494_vm7, %v464_v47, %v544_v61  ;;  %v3555_v2 = vsel %vm3498_vm8, %v460_v46, %v545_v1 }
 0x13b   : > { %v490_v51 = vpop.permute.xlu0 %489  ;;  %v569_v0 = vpop.permute.xlu1 %568 }
 0x13c   : > { %v498_v54 = vsel %vm497_vm6, %v482_v48, %v490_v51  ;;  %v502_v55 = vsel %vm497_vm6, %v490_v51, %v482_v48  ;;  %v522_v8 = vpop.permute.xlu2 %521 }
 0x13d   : > { %v3514_v56 = vsel %vm3494_vm7, %v502_v55, %v473_v52  ;;  %v3518_v57 = vsel %vm3498_vm8, %v498_v54, %v474_v53  ;;  %v3058_v53 = vld [vmem:[%s6683_s3 + $0x20] sm:$0xff] }
 0x13e   : > { %601 = vrot.lane.b32.xlu2 %v3514_v56, %s3261_s14  ;;  %609 = vrot.lane.b32.xlu0 %v3518_v57, %s3261_s14 }
 0x13f   : > { %639 = vrot.lane.b32.xlu1 %v3514_v56, %s3262_s15  ;;  %2865 = vmatmul.msk.bf16.gmra.mxu0 %vm6689_vm0, %v3058_v53 }
 0x140   : > { %2871 = vmatmul.msk.bf16.gmra.mxu1 %vm6689_vm0, %v3058_v53 }
 0x143   : > { %v561_v4 = vpop.permute.xlu0 %560  ;;  %v492_v5 = vpop.permute.xlu1 %491 }
 0x144   : > { %v577_v6 = vsel %vm6690_vm10, %v561_v4, %v569_v0  ;;  %v581_v7 = vsel %vm6690_vm10, %v569_v0, %v561_v4  ;;  %v3596_v15 = vpop.permute.xlu2 %570 }
 0x145   : > { %v585_v10 = vsel %vm3481_vm4, %v577_v6, %v536_v60  ;;  %v586_v11 = vsel %vm3485_vm5, %v581_v7, %v540_v63 }
 0x146   : > { %647 = vrot.lane.b32.xlu2 %v3518_v57, %s3262_s15  ;;  %677 = vrot.lane.b32.xlu0 %v3514_v56, %s3263_s16  ;;  %v3583_v13 = vsel %vm3494_vm7, %v3393_v24, %v585_v10  ;;  %v3588_v14 = vsel %vm3498_vm8, %v3395_v25, %v586_v11 }
 0x147   : > { %685 = vrot.lane.b32.xlu1 %v3518_v57, %s3263_s16 }
 0x14b   : > { %v444_v9 = vpop.permute.xlu0 %443  ;;  %v3578_v12 = vpop.permute.xlu1 %562 }
 0x14c   : > { %v461_v24 = vsel %vm459_vm3, %v444_v9, %v452_v3  ;;  %v465_v25 = vsel %vm459_vm3, %v452_v3, %v444_v9  ;;  %v3614_v38 = vpop.permute.xlu2 %493  ;;  %v578_v7 = vsel %vm6690_vm10, %v3578_v12, %v3596_v15 }
 0x14d   : > { %v475_v39 = vsel %vm3481_vm4, %v3417_v27, %v465_v25  ;;  %v476_v40 = vsel %vm3485_vm5, %v3409_v26, %v461_v24 }
 0x14e   : > { %718 = vrot.lane.b32.xlu2 %v3514_v56, %s3264_s17  ;;  %726 = vrot.lane.b32.xlu0 %v3518_v57, %s3264_s17 }
 0x14f   : > { %807 = vrot.lane.b32.xlu1 %v3540_v62, %s3261_s14 }
 0x153   : > { %v484_v32 = vpop.permute.xlu0 %483  ;;  %v3598_v33 = vpop.permute.xlu1 %445 }
 0x154   : > { %v499_v34 = vsel %vm497_vm6, %v484_v32, %v492_v5  ;;  %v503_v36 = vsel %vm497_vm6, %v492_v5, %v484_v32  ;;  %v3638_v47 = vpop.permute.xlu2 %564  ;;  %v3059_v5 = vld [vmem:[%s6683_s3 + $0x28] sm:$0xff] }
 0x155   : > { %v3624_v41 = vsel %vm3494_vm7, %v503_v36, %v475_v39  ;;  %v3628_v42 = vsel %vm3498_vm8, %v499_v34, %v476_v40  ;;  %2866 = vmatmul.msk.bf16.gmra.mxu0 %vm6689_vm0, %v3059_v5  ;;  %2872 = vmatmul.msk.bf16.gmra.mxu1 %vm6689_vm0, %v3059_v5  ;;  %vm734_vm0 = vcmp.lt.s32.totalorder %v3477_v37, 126 }
 0x156   : > { %815 = vrot.lane.b32.xlu2 %v3555_v2, %s3261_s14  ;;  %839 = vrot.lane.b32.xlu0 %v3540_v62, %s3262_s15 }
 0x157   : > { %847 = vrot.lane.b32.xlu1 %v3555_v2, %s3262_s15 }
 0x15b   : > { %v530_v43 = vpop.permute.xlu0 %529  ;;  %v3632_v46 = vpop.permute.xlu1 %485 }
 0x15c   : > { %v537_v52 = vsel %vm6691_vm9, %v522_v8, %v530_v43  ;;  %v541_v54 = vsel %vm6691_vm9, %v530_v43, %v522_v8  ;;  %v3663_v55 = vpop.permute.xlu2 %487  ;;  %v504_v53 = vsel %vm497_vm6, %v3614_v38, %v3632_v46 }
 0x15d   : > { %v546_v58 = vsel %vm3481_vm4, %v537_v52, %v3417_v27  ;;  %v547_v60 = vsel %vm3485_vm5, %v541_v54, %v3409_v26  ;;  %v587_v8 = vsel %vm3481_vm4, %v578_v7, %v537_v52 }
 0x15e   : > { %871 = vrot.lane.b32.xlu2 %v3540_v62, %s3263_s16  ;;  %879 = vrot.lane.b32.xlu0 %v3555_v2, %s3263_s16  ;;  %v3679_v63 = vsel %vm3494_vm7, %v465_v25, %v546_v58  ;;  %v3683_v0 = vsel %vm3498_vm8, %v461_v24, %v547_v60  ;;  %v3717_v9 = vsel %vm3494_vm7, %v3417_v27, %v587_v8  ;;  %v2820_v24 = vld [vmem:[%s6682_s2 + $0x1] ss:$2 sm:$0x3] }
 0x15f   : > { %911 = vrot.lane.b32.xlu1 %v3540_v62, %s3264_s17  ;;  %v582_v27 = vsel %vm6690_vm10, %v3596_v15, %v3578_v12  ;;  %vm276_vm11 = vcmp.eq.s32.totalorder %v2820_v24, 0  ;;  %vm277_vm12 = vcmp.eq.s32.totalorder %v2820_v24, 15  ;;  %v3100_v8 = vld [vmem:[%s6685_s5] sm:$0xff] }
 0x160   : > { %v588_v25 = vsel %vm3485_vm5, %v582_v27, %v541_v54  ;;  %v626_v12 = vsel %vm276_vm11, 1, %v3260_v35  ;;  %v664_v39 = vsel %vm277_vm12, 1, %v3260_v35  ;;  %vm6692_vm12 = vcmp.lt.s32.totalorder %v3477_v37, 127  ;;  %v3101_v27 = vld [vmem:[%s6685_s5 + $0x8] sm:$0xff] }
 0x161   : > { %v3741_v34 = vsel %vm3498_vm8, %v3409_v26, %v588_v25  ;;  %v627_v43 = vperm.slane %v626_v12, 0  ;;  %v628_v52 = vperm.slane %v626_v12, 1  ;;  %v665_v58 = vperm.slane %v664_v39, 0 }
 0x162   : > { %v666_v60 = vperm.slane %v664_v39, 1 }
 0x163   : > { %v3646_v48 = vpop.permute.xlu0 %453  ;;  %v3648_v51 = vpop.permute.xlu1 %531  ;;  %vm3776_vm15 = vcmp.eq.s32.totalorder %v627_v43, 1  ;;  %vm3780_vm1 = vcmp.eq.s32.totalorder %v628_v52, 1  ;;  %vm3788_vm2 = vcmp.eq.s32.totalorder %v665_v58, 1 }
 0x164   : > { %v3691_v1 = vpop.permute.xlu2 %533  ;;  %v466_v15 = vsel %vm459_vm3, %v3646_v48, %v3598_v33  ;;  %vm3792_vm11 = vcmp.eq.s32.totalorder %v666_v60, 1  ;;  %v462_v24 = vsel %vm459_vm3, %v3598_v33, %v3646_v48 }
 0x165   : > { %v477_v54 = vsel %vm3481_vm4, %v3425_v28, %v466_v15  ;;  %v478_v58 = vsel %vm3485_vm5, %v3439_v29, %v462_v24 }
 0x166   : > { %919 = vrot.lane.b32.xlu2 %v3555_v2, %s3264_s17  ;;  %999 = vrot.lane.b32.xlu0 %v3583_v13, %s3261_s14  ;;  %v3771_v35 = vsel %vm3494_vm7, %v504_v53, %v477_v54 }
 0x167   : > { %1007 = vrot.lane.b32.xlu1 %v3588_v14, %s3261_s14 }
 0x16b   : > { %v3670_v59 = vpop.permute.xlu0 %523  ;;  %v3675_v61 = vpop.permute.xlu1 %447 }
 0x16e   : > { %1031 = vrot.lane.b32.xlu2 %v3583_v13, %s3262_s15  ;;  %1039 = vrot.lane.b32.xlu0 %v3588_v14, %s3262_s15 }
 0x16f   : > { %1063 = vrot.lane.b32.xlu1 %v3583_v13, %s3263_s16 }
 0x173   : > { %v3693_v3 = vpop.permute.xlu0 %572  ;;  %v3695_v4 = vpop.permute.xlu1 %455 }
 0x176   : > { %1071 = vrot.lane.b32.xlu2 %v3588_v14, %s3263_s16  ;;  %603 = vrot.lane.b32.xlu0 %v3624_v41, %s3261_s14 }
 0x177   : > { %611 = vrot.lane.b32.xlu1 %v3628_v42, %s3261_s14 }
 0x17b   : > { %v3719_v10 = vpop.permute.xlu0 %495  ;;  %v3723_v11 = vpop.permute.xlu1 %525 }
 0x17e   : > { %641 = vrot.lane.b32.xlu2 %v3624_v41, %s3262_s15  ;;  %649 = vrot.lane.b32.xlu0 %v3628_v42, %s3262_s15 }
 0x17f   : > { %679 = vrot.lane.b32.xlu1 %v3624_v41, %s3263_s16 }
 0x183   : > { %v3754_v36 = vpop.permute.xlu0 %566  ;;  %v3759_v40 = vpop.permute.xlu1 %574 }
 0x186   : > { %687 = vrot.lane.b32.xlu2 %v3628_v42, %s3263_s16  ;;  %720 = vrot.lane.b32.xlu0 %v3624_v41, %s3264_s17 }
 0x187   : > { %728 = vrot.lane.b32.xlu1 %v3628_v42, %s3264_s17 }
 0x18e   : > { %809 = vrot.lane.b32.xlu2 %v3679_v63, %s3261_s14  ;;  %817 = vrot.lane.b32.xlu0 %v3683_v0, %s3261_s14 }
 0x18f   : > { %841 = vrot.lane.b32.xlu1 %v3679_v63, %s3262_s15 }
 0x196   : > { %849 = vrot.lane.b32.xlu2 %v3683_v0, %s3262_s15  ;;  %873 = vrot.lane.b32.xlu0 %v3679_v63, %s3263_s16 }
 0x197   : > { %881 = vrot.lane.b32.xlu1 %v3683_v0, %s3263_s16 }
 0x198   : > { %v602_v6 = vpop.permute.xlu2 %601 }
 0x19e   : > { %913 = vrot.lane.b32.xlu2 %v3679_v63, %s3264_s17  ;;  %921 = vrot.lane.b32.xlu0 %v3683_v0, %s3264_s17 }
 0x19f   : > { %1001 = vrot.lane.b32.xlu1 %v3717_v9, %s3261_s14 }
 0x1a0   : > { %v648_v32 = vpop.permute.xlu2 %647 }
 0x1a6   : > { %1009 = vrot.lane.b32.xlu2 %v3741_v34, %s3261_s14  ;;  %1033 = vrot.lane.b32.xlu0 %v3717_v9, %s3262_s15 }
 0x1a7   : > { %1041 = vrot.lane.b32.xlu1 %v3741_v34, %s3262_s15 }
 0x1a8   : > { %v3756_v26 = vpop.permute.xlu2 %718 }
 0x1ae   : > { %1065 = vrot.lane.b32.xlu2 %v3717_v9, %s3263_s16  ;;  %643 = vrot.lane.b32.xlu0 %v3771_v35, %s3262_s15 }
 0x1af   : > { %605 = vrot.lane.b32.xlu1 %v3771_v35, %s3261_s14 }
 0x1b0   : > { %v816_v25 = vpop.permute.xlu2 %815  ;;  %v610_v12 = vpop.permute.xlu0 %609 }
 0x1b1   : > { %v618_v39 = vsel %vm617_vm13, %v602_v6, %v610_v12  ;;  %v622_v43 = vsel %vm617_vm13, %v610_v12, %v602_v6  ;;  %v640_v52 = vpop.permute.xlu1 %639  ;;  %v500_v6 = vsel %vm497_vm6, %v3632_v46, %v3614_v38  ;;  %v3842_v38 = vsel %vm6691_vm9, %v3670_v59, %v3648_v51 }
 0x1b2   : > { %v631_v53 = vsel %vm3776_vm15, %v3514_v56, %v622_v43  ;;  %v632_v54 = vsel %vm3780_vm1, %v3518_v57, %v618_v39  ;;  %v656_v33 = vsel %vm655_vm14, %v640_v52, %v648_v32  ;;  %v660_v48 = vsel %vm655_vm14, %v648_v32, %v640_v52 }
 0x1b3   : > { %v669_v60 = vsel %vm3788_vm2, %v660_v48, %v631_v53  ;;  %v670_v12 = vsel %vm3792_vm11, %v656_v33, %v632_v54  ;;  %v3829_v32 = vsel %vm3498_vm8, %v500_v6, %v478_v58  ;;  %v548_v33 = vsel %vm3481_vm4, %v3842_v38, %v3425_v28 }
 0x1b4   : > { %v759_v23 = vmul.f32 %v669_v60, %v3377_v16  ;;  %v760_v22 = vmul.f32 %v670_v12, %v3379_v17 }
 0x1b6   : > { %v767_v52 = vpack.c.bf16 %v760_v22, %v759_v23  ;;  %1073 = vrot.lane.b32.xlu2 %v3741_v34, %s3263_s16  ;;  %689 = vrot.lane.b32.xlu0 %v3829_v32, %s3263_s16 }
 0x1b7   : > { %651 = vrot.lane.b32.xlu1 %v3829_v32, %s3262_s15 }
 0x1b8   : > { %771 = vst [vmem:[#allocation2] sm:$0xff] %v767_v52  ;;  %v3844_v46 = vpop.permute.xlu2 %871  ;;  %v678_v22 = vpop.permute.xlu0 %677 }
 0x1b9   : > { %v686_v23 = vpop.permute.xlu1 %685 }
 0x1ba   : > { %v694_v53 = vsel %vm6692_vm12, %v678_v22, %v686_v23  ;;  %v698_v54 = vsel %vm6692_vm12, %v686_v23, %v678_v22  ;;  %v3869_v22 = vsel %vm3494_vm7, %v466_v15, %v548_v33 }
 0x1bb   : > { %v702_v48 = vsel %vm3776_vm15, %v694_v53, %v3514_v56  ;;  %v703_v6 = vsel %vm3780_vm1, %v698_v54, %v3518_v57 }
 0x1bc   : > { %v710_v58 = vsel %vm3788_vm2, %v622_v43, %v702_v48  ;;  %v711_v60 = vsel %vm3792_vm11, %v618_v39, %v703_v6  ;;  %v542_v39 = vsel %vm6691_vm9, %v3648_v51, %v3670_v59 }
 0x1bd   : > { %v775_v12 = vmul.f32 %v710_v58, %v3377_v16  ;;  %v776_v52 = vmul.f32 %v711_v60, %v3379_v17  ;;  %v549_v51 = vsel %vm3485_vm5, %v542_v39, %v3439_v29 }
 0x1be   : > { %613 = vrot.lane.b32.xlu2 %v3829_v32, %s3261_s14  ;;  %811 = vrot.lane.b32.xlu0 %v3869_v22, %s3261_s14 }
 0x1bf   : > { %v783_v23 = vpack.c.bf16 %v776_v52, %v775_v12  ;;  %722 = vrot.lane.b32.xlu1 %v3771_v35, %s3264_s17 }
 0x1c0   : > { %v920_v43 = vpop.permute.xlu2 %919  ;;  %v727_v48 = vpop.permute.xlu0 %726 }
 0x1c1   : > { %787 = vst [vmem:[#allocation2 + $0x8] sm:$0xff] %v783_v23  ;;  %v735_v15 = vsel %vm734_vm0, %v3756_v26, %v727_v48  ;;  %v739_v33 = vsel %vm734_vm0, %v727_v48, %v3756_v26  ;;  %v808_v6 = vpop.permute.xlu1 %807 }
 0x1c2   : > { %v743_v58 = vsel %vm3776_vm15, %v735_v15, %v694_v53  ;;  %v744_v60 = vsel %vm3780_vm1, %v739_v33, %v698_v54  ;;  %v3904_v53 = vsel %vm3498_vm8, %v462_v24, %v549_v51  ;;  %v823_v23 = vsel %vm617_vm13, %v808_v6, %v816_v25 }
 0x1c3   : > { %v751_v59 = vsel %vm3788_vm2, %v3514_v56, %v743_v58  ;;  %v752_v12 = vsel %vm3792_vm11, %v3518_v57, %v744_v60  ;;  %v827_v56 = vsel %vm617_vm13, %v816_v25, %v808_v6  ;;  %v832_v33 = vsel %vm3780_vm1, %v3555_v2, %v823_v23 }
 0x1c4   : > { %v791_v26 = vmul.f32 %v751_v59, %v3377_v16  ;;  %v792_v52 = vmul.f32 %v752_v12, %v3379_v17  ;;  %v831_v15 = vsel %vm3776_vm15, %v3540_v62, %v827_v56  ;;  %v583_v12 = vsel %vm6690_vm10, %v3693_v3, %v3638_v47 }
 0x1c6   : > { %v799_v54 = vpack.c.bf16 %v792_v52, %v791_v26  ;;  %681 = vrot.lane.b32.xlu2 %v3771_v35, %s3263_s16  ;;  %851 = vrot.lane.b32.xlu0 %v3904_v53, %s3262_s15 }
 0x1c7   : > { %819 = vrot.lane.b32.xlu1 %v3904_v53, %s3261_s14 }
 0x1c8   : > { %803 = vst [vmem:[#allocation2 + $0x10] sm:$0xff] %v799_v54  ;;  %v3916_v57 = vpop.permute.xlu2 %1031  ;;  %v840_v24 = vpop.permute.xlu0 %839  ;;  %v590_v54 = vsel %vm3485_vm5, %v583_v12, %v542_v39 }
 0x1c9   : > { %v848_v48 = vpop.permute.xlu1 %847 }
 0x1ca   : > { %v855_v25 = vsel %vm655_vm14, %v840_v24, %v848_v48  ;;  %v859_v6 = vsel %vm655_vm14, %v848_v48, %v840_v24 }
 0x1cb   : > { %v863_v58 = vsel %vm3788_vm2, %v859_v6, %v831_v15  ;;  %v864_v60 = vsel %vm3792_vm11, %v855_v25, %v832_v33 }
 0x1cc   : > { %v951_v51 = vmul.f32 %v863_v58, %v3377_v16  ;;  %v952_v59 = vmul.f32 %v864_v60, %v3379_v17 }
 0x1ce   : > { %v959_v26 = vpack.c.bf16 %v952_v59, %v951_v51  ;;  %730 = vrot.lane.b32.xlu2 %v3829_v32, %s3264_s17  ;;  %915 = vrot.lane.b32.xlu0 %v3869_v22, %s3264_s17 }
 0x1cf   : > { %875 = vrot.lane.b32.xlu1 %v3869_v22, %s3263_s16 }
 0x1d0   : > { %963 = vst [vmem:[#allocation2 + $0x18] sm:$0xff] %v959_v26  ;;  %v1072_v52 = vpop.permute.xlu2 %1071  ;;  %v880_v24 = vpop.permute.xlu0 %879 }
 0x1d1   : > { %v912_v48 = vpop.permute.xlu1 %911  ;;  %v887_v15 = vsel %vm6692_vm12, %v3844_v46, %v880_v24  ;;  %v891_v33 = vsel %vm6692_vm12, %v880_v24, %v3844_v46 }
 0x1d2   : > { %v927_v25 = vsel %vm734_vm0, %v912_v48, %v920_v43  ;;  %v931_v6 = vsel %vm734_vm0, %v920_v43, %v912_v48  ;;  %v895_v39 = vsel %vm3776_vm15, %v887_v15, %v3540_v62  ;;  %v896_v58 = vsel %vm3780_vm1, %v891_v33, %v3555_v2 }
 0x1d3   : > { %v935_v60 = vsel %vm3776_vm15, %v927_v25, %v887_v15  ;;  %v936_v46 = vsel %vm3780_vm1, %v931_v6, %v891_v33  ;;  %v903_v51 = vsel %vm3788_vm2, %v827_v56, %v895_v39  ;;  %v904_v43 = vsel %vm3792_vm11, %v823_v23, %v896_v58 }
 0x1d4   : > { %v943_v59 = vsel %vm3788_vm2, %v3540_v62, %v935_v60  ;;  %v944_v12 = vsel %vm3792_vm11, %v3555_v2, %v936_v46  ;;  %v967_v26 = vmul.f32 %v903_v51, %v3377_v16  ;;  %v968_v24 = vmul.f32 %v904_v43, %v3379_v17 }
 0x1d5   : > { %v983_v48 = vmul.f32 %v943_v59, %v3377_v16  ;;  %v984_v15 = vmul.f32 %v944_v12, %v3379_v17  ;;  %v3983_v23 = vsel %vm3498_vm8, %v3439_v29, %v590_v54  ;;  %v579_v2 = vsel %vm6690_vm10, %v3638_v47, %v3693_v3 }
 0x1d6   : > { %843 = vrot.lane.b32.xlu2 %v3869_v22, %s3262_s15  ;;  %v975_v62 = vpack.c.bf16 %v968_v24, %v967_v26  ;;  %1011 = vrot.lane.b32.xlu0 %v3983_v23, %s3261_s14  ;;  %v589_v25 = vsel %vm3481_vm4, %v579_v2, %v3842_v38  ;;  %v505_v38 = vsel %vm497_vm6, %v3719_v10, %v3663_v55 }
 0x1d7   : > { %v991_v56 = vpack.c.bf16 %v984_v15, %v983_v48  ;;  %923 = vrot.lane.b32.xlu1 %v3904_v53, %s3264_s17  ;;  %v4003_v6 = vsel %vm3494_vm7, %v3425_v28, %v589_v25  ;;  %v4019_v28 = vsel %vm459_vm3, %v3695_v4, %v3675_v61 }
 0x1d8   : > { %v3995_v33 = vpop.permute.xlu2 %641  ;;  %979 = vst [vmem:[#allocation2 + $0x20] sm:$0xff] %v975_v62  ;;  %v1000_v29 = vpop.permute.xlu0 %999 }
 0x1d9   : > { %v1008_v54 = vpop.permute.xlu1 %1007  ;;  %995 = vst [vmem:[#allocation2 + $0x28] sm:$0xff] %v991_v56 }
 0x1da   : > { %v1015_v39 = vsel %vm617_vm13, %v1000_v29, %v1008_v54  ;;  %v1019_v47 = vsel %vm617_vm13, %v1008_v54, %v1000_v29  ;;  %v479_v29 = vsel %vm3481_vm4, %v3447_v30, %v4019_v28 }
 0x1db   : > { %v1023_v58 = vsel %vm3776_vm15, %v3583_v13, %v1019_v47  ;;  %v1024_v60 = vsel %vm3780_vm1, %v3588_v14, %v1015_v39 }
 0x1de   : > { %883 = vrot.lane.b32.xlu2 %v3904_v53, %s3263_s16  ;;  %1067 = vrot.lane.b32.xlu0 %v4003_v6, %s3263_s16 }
 0x1df   : > { %1035 = vrot.lane.b32.xlu1 %v4003_v6, %s3262_s15 }
 0x1e0   : > { %v688_v3 = vpop.permute.xlu2 %687  ;;  %v1040_v46 = vpop.permute.xlu0 %1039 }
 0x1e1   : > { %v1064_v51 = vpop.permute.xlu1 %1063  ;;  %v1047_v43 = vsel %vm655_vm14, %v3916_v57, %v1040_v46  ;;  %v1051_v59 = vsel %vm655_vm14, %v1040_v46, %v3916_v57 }
 0x1e2   : > { %v4039_v12 = vsel %vm6692_vm12, %v1064_v51, %v1072_v52  ;;  %v4043_v26 = vsel %vm6692_vm12, %v1072_v52, %v1064_v51  ;;  %v1055_v24 = vsel %vm3788_vm2, %v1051_v59, %v1023_v58  ;;  %v1056_v48 = vsel %vm3792_vm11, %v1047_v43, %v1024_v60 }
 0x1e3   : > { %v1087_v15 = vsel %vm3776_vm15, %v4039_v12, %v3583_v13  ;;  %v1088_v57 = vsel %vm3780_vm1, %v4043_v26, %v3588_v14  ;;  %v1143_v62 = vmul.f32 %v1055_v24, %v3377_v16  ;;  %v1144_v52 = vmul.f32 %v1056_v48, %v3379_v17 }
 0x1e4   : > { %v1095_v56 = vsel %vm3788_vm2, %v1019_v47, %v1087_v15  ;;  %v1096_v2 = vsel %vm3792_vm11, %v1015_v39, %v1088_v57  ;;  %v4071_v58 = vsel %vm3494_vm7, %v505_v38, %v479_v29  ;;  %v463_v38 = vsel %vm459_vm3, %v3675_v61, %v3695_v4 }
 0x1e5   : > { %v1159_v54 = vmul.f32 %v1095_v56, %v3377_v16  ;;  %v1160_v25 = vmul.f32 %v1096_v2, %v3379_v17  ;;  %v1151_v60 = vpack.c.bf16 %v1144_v52, %v1143_v62  ;;  %v501_v43 = vsel %vm497_vm6, %v3663_v55, %v3719_v10 }
 0x1e6   : > { %1003 = vrot.lane.b32.xlu2 %v4003_v6, %s3261_s14  ;;  %1075 = vrot.lane.b32.xlu0 %v3983_v23, %s3263_s16  ;;  %v480_v59 = vsel %vm3485_vm5, %v3455_v31, %v463_v38  ;;  %v4100_v48 = vsel %vm6691_vm9, %v3723_v11, %v3691_v1 }
 0x1e7   : > { %v1167_v47 = vpack.c.bf16 %v1160_v25, %v1159_v54  ;;  %645 = vrot.lane.b32.xlu1 %v4071_v58, %s3262_s15  ;;  %1155 = vst [vmem:[#allocation2 + $0x30] sm:$0xff] %v1151_v60  ;;  %v4094_v24 = vsel %vm3498_vm8, %v501_v43, %v480_v59  ;;  %v550_v10 = vsel %vm3481_vm4, %v4100_v48, %v3447_v30 }
 0x1e8   : > { %v4079_v39 = vpop.permute.xlu2 %809  ;;  %v604_v46 = vpop.permute.xlu0 %603 }
 0x1e9   : > { %1171 = vst [vmem:[#allocation2 + $0x38] sm:$0xff] %v1167_v47  ;;  %v612_v51 = vpop.permute.xlu1 %611 }
 0x1ea   : > { %v619_v61 = vsel %vm617_vm13, %v604_v46, %v612_v51  ;;  %v623_v55 = vsel %vm617_vm13, %v612_v51, %v604_v46 }
 0x1eb   : > { %v633_v15 = vsel %vm3776_vm15, %v3624_v41, %v623_v55  ;;  %v634_v57 = vsel %vm3780_vm1, %v3628_v42, %v619_v61 }
 0x1ee   : > { %1043 = vrot.lane.b32.xlu2 %v3983_v23, %s3262_s15  ;;  %615 = vrot.lane.b32.xlu0 %v4094_v24, %s3261_s14 }
 0x1ef   : > { %691 = vrot.lane.b32.xlu1 %v4094_v24, %s3263_s16 }
 0x1f0   : > { %v850_v4 = vpop.permute.xlu2 %849  ;;  %v650_v62 = vpop.permute.xlu0 %649 }
 0x1f1   : > { %v680_v52 = vpop.permute.xlu1 %679  ;;  %v657_v56 = vsel %vm655_vm14, %v3995_v33, %v650_v62  ;;  %v661_v2 = vsel %vm655_vm14, %v650_v62, %v3995_v33 }
 0x1f2   : > { %v695_v29 = vsel %vm6692_vm12, %v680_v52, %v688_v3  ;;  %v699_v54 = vsel %vm6692_vm12, %v688_v3, %v680_v52  ;;  %v671_v25 = vsel %vm3788_vm2, %v661_v2, %v633_v15  ;;  %v672_v60 = vsel %vm3792_vm11, %v657_v56, %v634_v57 }
 0x1f3   : > { %v704_v47 = vsel %vm3776_vm15, %v695_v29, %v3624_v41  ;;  %v705_v33 = vsel %vm3780_vm1, %v699_v54, %v3628_v42  ;;  %v761_v46 = vmul.f32 %v671_v25, %v3381_v18  ;;  %v762_v51 = vmul.f32 %v672_v60, %v3383_v19 }
 0x1f4   : > { %v712_v3 = vsel %vm3788_vm2, %v623_v55, %v704_v47  ;;  %v713_v43 = vsel %vm3792_vm11, %v619_v61, %v705_v33  ;;  %v4153_v57 = vsel %vm3494_vm7, %v4019_v28, %v550_v10  ;;  %v543_v61 = vsel %vm6691_vm9, %v3691_v1, %v3723_v11 }
 0x1f5   : > { %v777_v59 = vmul.f32 %v712_v3, %v3381_v18  ;;  %v778_v15 = vmul.f32 %v713_v43, %v3383_v19  ;;  %v768_v62 = vpack.c.bf16 %v762_v51, %v761_v46  ;;  %v551_v25 = vsel %vm3485_vm5, %v543_v61, %v3455_v31 }
 0x1f6   : > { %607 = vrot.lane.b32.xlu2 %v4071_v58, %s3261_s14  ;;  %683 = vrot.lane.b32.xlu0 %v4071_v58, %s3263_s16  ;;  %v4188_v51 = vsel %vm3498_vm8, %v463_v38, %v551_v25 }
 0x1f7   : > { %v784_v52 = vpack.c.bf16 %v778_v15, %v777_v59  ;;  %813 = vrot.lane.b32.xlu1 %v4153_v57, %s3261_s14  ;;  %772 = vst [vmem:[#allocation2 + $0x48] sm:$0xff] %v768_v62 }
 0x1f8   : > { %v4165_v55 = vpop.permute.xlu2 %913  ;;  %v721_v28 = vpop.permute.xlu0 %720 }
 0x1f9   : > { %788 = vst [vmem:[#allocation2 + $0x50] sm:$0xff] %v784_v52  ;;  %v729_v10 = vpop.permute.xlu1 %728 }
 0x1fa   : > { %v736_v56 = vsel %vm734_vm0, %v721_v28, %v729_v10  ;;  %v740_v2 = vsel %vm734_vm0, %v729_v10, %v721_v28 }
 0x1fb   : > { %v745_v60 = vsel %vm3776_vm15, %v736_v56, %v695_v29  ;;  %v746_v1 = vsel %vm3780_vm1, %v740_v2, %v699_v54  ;;  %v584_v56 = vsel %vm6690_vm10, %v3759_v40, %v3754_v36 }
 0x1fc   : > { %v753_v11 = vsel %vm3788_vm2, %v3624_v41, %v745_v60  ;;  %v754_v47 = vsel %vm3792_vm11, %v3628_v42, %v746_v1 }
 0x1fd   : > { %v793_v33 = vmul.f32 %v753_v11, %v3381_v18  ;;  %v794_v46 = vmul.f32 %v754_v47, %v3383_v19  ;;  %v592_v47 = vsel %vm3485_vm5, %v584_v56, %v543_v61  ;;  %v580_v61 = vsel %vm6690_vm10, %v3754_v36, %v3759_v40 }
 0x1fe   : > { %653 = vrot.lane.b32.xlu2 %v4094_v24, %s3262_s15  ;;  %732 = vrot.lane.b32.xlu0 %v4094_v24, %s3264_s17  ;;  %v591_v36 = vsel %vm3481_vm4, %v580_v61, %v4100_v48  ;;  %vm6797_vm10 = vcmask 261120  }
 0x1ff   : > { %v800_v29 = vpack.c.bf16 %v794_v46, %v793_v33  ;;  %853 = vrot.lane.b32.xlu1 %v4188_v51, %s3262_s15  ;;  %vm6798_vm9 = vmmov %vm6797_vm10 }
 0x200   : > { %v1010_v41 = vpop.permute.xlu2 %1009  ;;  %v818_v42 = vpop.permute.xlu0 %817 }
 0x201   : > { %804 = vst [vmem:[#allocation2 + $0x58] sm:$0xff] %v800_v29  ;;  %v842_v54 = vpop.permute.xlu1 %841  ;;  %v824_v3 = vsel %vm617_vm13, %v4079_v39, %v818_v42  ;;  %v828_v38 = vsel %vm617_vm13, %v818_v42, %v4079_v39 }
 0x202   : > { %v856_v43 = vsel %vm655_vm14, %v842_v54, %v850_v4  ;;  %v860_v59 = vsel %vm655_vm14, %v850_v4, %v842_v54  ;;  %v833_v15 = vsel %vm3776_vm15, %v3679_v63, %v828_v38  ;;  %v834_v62 = vsel %vm3780_vm1, %v3683_v0, %v824_v3 }
 0x203   : > { %v865_v52 = vsel %vm3788_vm2, %v860_v59, %v833_v15  ;;  %v866_v39 = vsel %vm3792_vm11, %v856_v43, %v834_v62  ;;  %v4253_v59 = vsel %vm3498_vm8, %v3455_v31, %v592_v47 }
 0x204   : > { %v953_v28 = vmul.f32 %v865_v52, %v3381_v18  ;;  %v954_v10 = vmul.f32 %v866_v39, %v3383_v19 }
 0x206   : > { %724 = vrot.lane.b32.xlu2 %v4071_v58, %s3264_s17  ;;  %v960_v4 = vpack.c.bf16 %v954_v10, %v953_v28  ;;  %845 = vrot.lane.b32.xlu0 %v4153_v57, %s3262_s15 }
 0x207   : > { %917 = vrot.lane.b32.xlu1 %v4153_v57, %s3264_s17 }
 0x208   : > { %v1066_v2 = vpop.permute.xlu2 %1065  ;;  %964 = vst [vmem:[#allocation2 + $0x60] sm:$0xff] %v960_v4  ;;  %v874_v25 = vpop.permute.xlu0 %873 }
 0x209   : > { %v882_v60 = vpop.permute.xlu1 %881 }
 0x20a   : > { %v888_v1 = vsel %vm6692_vm12, %v874_v25, %v882_v60  ;;  %v892_v11 = vsel %vm6692_vm12, %v882_v60, %v874_v25 }
 0x20b   : > { %v897_v33 = vsel %vm3776_vm15, %v888_v1, %v3679_v63  ;;  %v898_v46 = vsel %vm3780_vm1, %v892_v11, %v3683_v0 }
 0x20c   : > { %v905_v29 = vsel %vm3788_vm2, %v828_v38, %v897_v33  ;;  %v906_v42 = vsel %vm3792_vm11, %v824_v3, %v898_v46 }
 0x20d   : > { %v969_v54 = vmul.f32 %v905_v29, %v3381_v18  ;;  %v970_v43 = vmul.f32 %v906_v42, %v3383_v19 }
 0x20e   : > { %821 = vrot.lane.b32.xlu2 %v4188_v51, %s3261_s14  ;;  %885 = vrot.lane.b32.xlu0 %v4188_v51, %s3263_s16 }
 0x20f   : > { %v976_v38 = vpack.c.bf16 %v970_v43, %v969_v54  ;;  %1013 = vrot.lane.b32.xlu1 %v4253_v59, %s3261_s14 }
 0x210   : > { %v1074_v3 = vpop.permute.xlu2 %1073  ;;  %v922_v15 = vpop.permute.xlu0 %921 }
 0x211   : > { %980 = vst [vmem:[#allocation2 + $0x68] sm:$0xff] %v976_v38  ;;  %v4266_v31 = vsel %vm6692_vm12, %v1066_v2, %v1074_v3  ;;  %v4270_v40 = vsel %vm6692_vm12, %v1074_v3, %v1066_v2  ;;  %v1002_v62 = vpop.permute.xlu1 %1001  ;;  %v928_v39 = vsel %vm734_vm0, %v4165_v55, %v922_v15  ;;  %v932_v28 = vsel %vm734_vm0, %v922_v15, %v4165_v55 }
 0x212   : > { %v1089_v52 = vsel %vm3776_vm15, %v4266_v31, %v3717_v9  ;;  %v1090_v48 = vsel %vm3780_vm1, %v4270_v40, %v3741_v34  ;;  %v937_v10 = vsel %vm3776_vm15, %v928_v39, %v888_v1  ;;  %v938_v4 = vsel %vm3780_vm1, %v932_v28, %v892_v11 }
 0x213   : > { %v1016_v56 = vsel %vm617_vm13, %v1002_v62, %v1010_v41  ;;  %v1020_v2 = vsel %vm617_vm13, %v1010_v41, %v1002_v62  ;;  %v945_v25 = vsel %vm3788_vm2, %v3679_v63, %v937_v10  ;;  %v946_v55 = vsel %vm3792_vm11, %v3683_v0, %v938_v4 }
 0x214   : > { %v985_v60 = vmul.f32 %v945_v25, %v3381_v18  ;;  %v986_v1 = vmul.f32 %v946_v55, %v3383_v19  ;;  %v1097_v11 = vsel %vm3788_vm2, %v1020_v2, %v1089_v52  ;;  %v1098_v47 = vsel %vm3792_vm11, %v1016_v56, %v1090_v48 }
 0x215   : > { %v4309_v41 = vsel %vm3494_vm7, %v3447_v30, %v591_v36  ;;  %v1161_v63 = vmul.f32 %v1097_v11, %v3381_v18  ;;  %v1162_v33 = vmul.f32 %v1098_v47, %v3383_v19  ;;  %v1025_v54 = vsel %vm3776_vm15, %v3717_v9, %v1020_v2 }
 0x216   : > { %877 = vrot.lane.b32.xlu2 %v4153_v57, %s3263_s16  ;;  %v992_v0 = vpack.c.bf16 %v986_v1, %v985_v60  ;;  %1005 = vrot.lane.b32.xlu0 %v4309_v41, %s3261_s14  ;;  %v1026_v43 = vsel %vm3780_vm1, %v3741_v34, %v1016_v56  ;;  %v4345_v56 = vpop.f32.mrf.mxu0 }
 0x217   : > { %1069 = vrot.lane.b32.xlu1 %v4309_v41, %s3263_s16  ;;  %v1168_v46 = vpack.c.bf16 %v1162_v33, %v1161_v63  ;;  %6789 = vst [vmem:[#allocation12_spill] sm:$0xff] %v4345_v56 }
 0x218   : > { %v614_v29 = vpop.permute.xlu2 %613  ;;  %996 = vst [vmem:[#allocation2 + $0x70] sm:$0xff] %v992_v0  ;;  %v1034_v42 = vpop.permute.xlu0 %1033 }
 0x219   : > { %v1042_v30 = vpop.permute.xlu1 %1041  ;;  %1172 = vst [vmem:[#allocation2 + $0x80] sm:$0xff] %v1168_v46 }
 0x21a   : > { %v1048_v61 = vsel %vm655_vm14, %v1034_v42, %v1042_v30  ;;  %v1052_v38 = vsel %vm655_vm14, %v1042_v30, %v1034_v42 }
 0x21b   : > { %v1057_v3 = vsel %vm3788_vm2, %v1052_v38, %v1025_v54  ;;  %v1058_v36 = vsel %vm3792_vm11, %v1048_v61, %v1026_v43 }
 0x21c   : > { %v1145_v15 = vmul.f32 %v1057_v3, %v3381_v18  ;;  %v1146_v62 = vmul.f32 %v1058_v36, %v3383_v19 }
 0x21e   : > { %v1152_v52 = vpack.c.bf16 %v1146_v62, %v1145_v15  ;;  %925 = vrot.lane.b32.xlu2 %v4188_v51, %s3264_s17  ;;  %1045 = vrot.lane.b32.xlu0 %v4253_v59, %s3262_s15  ;;  %v4387_v15 = vpop.f32.mrf.mxu1 }
 0x21f   : > { %1077 = vrot.lane.b32.xlu1 %v4253_v59, %s3263_s16  ;;  %6790 = vst [vmem:[#allocation13_spill] sm:$0xff] %v4387_v15 }
 0x220   : > { %1156 = vst [vmem:[#allocation2 + $0x78] sm:$0xff] %v1152_v52  ;;  %v682_v48 = vpop.permute.xlu2 %681  ;;  %v644_v39 = vpop.permute.xlu0 %643 }
 0x221   : > { %v606_v28 = vpop.permute.xlu1 %605  ;;  %v4393_v52 = vpop.f32.mrf.mxu0 }
 0x222   : > { %v620_v10 = vsel %vm617_vm13, %v606_v28, %v614_v29  ;;  %v624_v4 = vsel %vm617_vm13, %v614_v29, %v606_v28  ;;  %6791 = vst [vmem:[#allocation14_spill] sm:$0xff] %v4393_v52 }
 0x223   : > { %v635_v25 = vsel %vm3776_vm15, %v3771_v35, %v624_v4  ;;  %v636_v55 = vsel %vm3780_vm1, %v3829_v32, %v620_v10 }
 0x226   : > { %1037 = vrot.lane.b32.xlu2 %v4309_v41, %s3262_s15  ;;  %1107 = vrot.lane.b32.xlu0 %v4003_v6, %s3264_s17 }
 0x227   : > { %1109 = vrot.lane.b32.xlu1 %v4309_v41, %s3264_s17 }
 0x228   : > { %v731_v2 = vpop.permute.xlu2 %730  ;;  %v690_v60 = vpop.permute.xlu0 %689 }
 0x229   : > { %v652_v1 = vpop.permute.xlu1 %651  ;;  %v696_v11 = vsel %vm6692_vm12, %v682_v48, %v690_v60  ;;  %v700_v47 = vsel %vm6692_vm12, %v690_v60, %v682_v48 }
 0x22a   : > { %v658_v63 = vsel %vm655_vm14, %v644_v39, %v652_v1  ;;  %v662_v33 = vsel %vm655_vm14, %v652_v1, %v644_v39  ;;  %v706_v0 = vsel %vm3776_vm15, %v696_v11, %v3771_v35  ;;  %v707_v46 = vsel %vm3780_vm1, %v700_v47, %v3829_v32 }
 0x22b   : > { %v673_v29 = vsel %vm3788_vm2, %v662_v33, %v635_v25  ;;  %v674_v42 = vsel %vm3792_vm11, %v658_v63, %v636_v55  ;;  %v714_v30 = vsel %vm3788_vm2, %v624_v4, %v706_v0  ;;  %v715_v54 = vsel %vm3792_vm11, %v620_v10, %v707_v46 }
 0x22c   : > { %v763_v43 = vmul.f32 %v673_v29, %v3385_v20  ;;  %v764_v61 = vmul.f32 %v674_v42, %v3387_v21  ;;  %v779_v38 = vmul.f32 %v714_v30, %v3385_v20  ;;  %v780_v3 = vmul.f32 %v715_v54, %v3387_v21  ;;  %v4427_v30 = vpop.f32.mrf.mxu0 }
 0x22e   : > { %v769_v36 = vpack.c.bf16 %v764_v61, %v763_v43  ;;  %1115 = vrot.lane.b32.xlu2 %v3983_v23, %s3264_s17  ;;  %v785_v62 = vpack.c.bf16 %v780_v3, %v779_v38  ;;  %1117 = vrot.lane.b32.xlu0 %v4253_v59, %s3264_s17 }
 0x22f   : > { %1103 = vrot.lane.b32.xlu1 %v3583_v13, %s3264_s17 }
 0x230   : > { %773 = vst [vmem:[#allocation2 + $0x90] sm:$0xff] %v769_v36  ;;  %v844_v48 = vpop.permute.xlu2 %843  ;;  %v812_v39 = vpop.permute.xlu0 %811 }
 0x231   : > { %789 = vst [vmem:[#allocation2 + $0x98] sm:$0xff] %v785_v62  ;;  %v723_v28 = vpop.permute.xlu1 %722 }
 0x232   : > { %v737_v10 = vsel %vm734_vm0, %v723_v28, %v731_v2  ;;  %v741_v4 = vsel %vm734_vm0, %v731_v2, %v723_v28 }
 0x233   : > { %v747_v25 = vsel %vm3776_vm15, %v737_v10, %v696_v11  ;;  %v748_v55 = vsel %vm3780_vm1, %v741_v4, %v700_v47 }
 0x234   : > { %v755_v60 = vsel %vm3788_vm2, %v3771_v35, %v747_v25  ;;  %v756_v1 = vsel %vm3792_vm11, %v3829_v32, %v748_v55  ;;  %v4417_v35 = vpop.f32.mrf.mxu1 }
 0x235   : > { %v795_v63 = vmul.f32 %v755_v60, %v3385_v20  ;;  %v796_v33 = vmul.f32 %v756_v1, %v3387_v21  ;;  %6792 = vst [vmem:[#allocation15_spill] sm:$0xff] %v4417_v35 }
 0x236   : > { %1105 = vrot.lane.b32.xlu2 %v3717_v9, %s3264_s17  ;;  %1111 = vrot.lane.b32.xlu0 %v3588_v14, %s3264_s17 }
 0x237   : > { %v801_v2 = vpack.c.bf16 %v796_v33, %v795_v63  ;;  %1113 = vrot.lane.b32.xlu1 %v3741_v34, %s3264_s17  ;;  %v4463_v33 = vpop.f32.mrf.mxu0 }
 0x238   : > { %v884_v11 = vpop.permute.xlu2 %883  ;;  %v852_v47 = vpop.permute.xlu0 %851  ;;  %6794 = vst [vmem:[#allocation17_spill] sm:$0xff] %v4463_v33 }
 0x239   : > { %805 = vst [vmem:[#allocation2 + $0xa0] sm:$0xff] %v801_v2  ;;  %v820_v32 = vpop.permute.xlu1 %819  ;;  %v857_v0 = vsel %vm655_vm14, %v844_v48, %v852_v47  ;;  %v861_v46 = vsel %vm655_vm14, %v852_v47, %v844_v48 }
 0x23a   : > { %v825_v29 = vsel %vm617_vm13, %v812_v39, %v820_v32  ;;  %v829_v42 = vsel %vm617_vm13, %v820_v32, %v812_v39 }
 0x23b   : > { %v835_v54 = vsel %vm3776_vm15, %v3869_v22, %v829_v42  ;;  %v836_v43 = vsel %vm3780_vm1, %v3904_v53, %v825_v29 }
 0x23c   : > { %v867_v61 = vsel %vm3788_vm2, %v861_v46, %v835_v54  ;;  %v868_v38 = vsel %vm3792_vm11, %v857_v0, %v836_v43  ;;  %v4451_v25 = vpop.f32.mrf.mxu1 }
 0x23d   : > { %v955_v3 = vmul.f32 %v867_v61, %v3385_v20  ;;  %v956_v36 = vmul.f32 %v868_v38, %v3387_v21  ;;  %6793 = vst [vmem:[#allocation16_spill] sm:$0xff] %v4451_v25 }
 0x23e   : > { %1699 = vrot.lane.b32.xlu2 %v4345_v56, %s3257_s29  ;;  %1701 = vrot.lane.b32.xlu0 %v4393_v52, %s3257_s29 }
 0x23f   : > { %v961_v62 = vpack.c.bf16 %v956_v36, %v955_v3  ;;  %1703 = vrot.lane.b32.xlu1 %v4427_v30, %s3257_s29 }
 0x240   : > { %v1004_v48 = vpop.permute.xlu2 %1003  ;;  %v916_v39 = vpop.permute.xlu0 %915 }
 0x241   : > { %965 = vst [vmem:[#allocation2 + $0xa8] sm:$0xff] %v961_v62  ;;  %v876_v28 = vpop.permute.xlu1 %875 }
 0x242   : > { %v889_v10 = vsel %vm6692_vm12, %v876_v28, %v884_v11  ;;  %v893_v4 = vsel %vm6692_vm12, %v884_v11, %v876_v28 }
 0x243   : > { %v899_v55 = vsel %vm3776_vm15, %v889_v10, %v3869_v22  ;;  %v900_v60 = vsel %vm3780_vm1, %v893_v4, %v3904_v53 }
 0x244   : > { %v907_v1 = vsel %vm3788_vm2, %v829_v42, %v899_v55  ;;  %v908_v63 = vsel %vm3792_vm11, %v825_v29, %v900_v60  ;;  %v4487_v3 = vpop.f32.mrf.mxu1 }
 0x245   : > { %v971_v2 = vmul.f32 %v907_v1, %v3385_v20  ;;  %v972_v11 = vmul.f32 %v908_v63, %v3387_v21 }
 0x246   : > { %1705 = vrot.lane.b32.xlu2 %v4463_v33, %s3257_s29  ;;  %1707 = vrot.lane.b32.xlu0 %v4387_v15, %s3257_s29 }
 0x247   : > { %v977_v47 = vpack.c.bf16 %v972_v11, %v971_v2  ;;  %1709 = vrot.lane.b32.xlu1 %v4417_v35, %s3257_s29 }
 0x248   : > { %v1044_v32 = vpop.permute.xlu2 %1043  ;;  %v1012_v0 = vpop.permute.xlu0 %1011 }
 0x249   : > { %981 = vst [vmem:[#allocation2 + $0xb0] sm:$0xff] %v977_v47  ;;  %v924_v46 = vpop.permute.xlu1 %923  ;;  %v1021_v28 = vsel %vm617_vm13, %v1012_v0, %v1004_v48 }
 0x24a   : > { %v929_v29 = vsel %vm734_vm0, %v916_v39, %v924_v46  ;;  %v933_v42 = vsel %vm734_vm0, %v924_v46, %v916_v39  ;;  %v1017_v39 = vsel %vm617_vm13, %v1004_v48, %v1012_v0  ;;  %v1027_v55 = vsel %vm3776_vm15, %v4003_v6, %v1021_v28 }
 0x24b   : > { %v939_v54 = vsel %vm3776_vm15, %v929_v29, %v889_v10  ;;  %v940_v43 = vsel %vm3780_vm1, %v933_v42, %v893_v4  ;;  %v1028_v60 = vsel %vm3780_vm1, %v3983_v23, %v1017_v39 }
 0x24c   : > { %v947_v61 = vsel %vm3788_vm2, %v3869_v22, %v939_v54  ;;  %v948_v38 = vsel %vm3792_vm11, %v3904_v53, %v940_v43 }
 0x24d   : > { %v987_v36 = vmul.f32 %v947_v61, %v3385_v20  ;;  %v988_v62 = vmul.f32 %v948_v38, %v3387_v21 }
 0x24e   : > { %1711 = vrot.lane.b32.xlu2 %v4451_v25, %s3257_s29  ;;  %1713 = vrot.lane.b32.xlu0 %v4487_v3, %s3257_s29 }
 0x24f   : > { %v993_v22 = vpack.c.bf16 %v988_v62, %v987_v36  ;;  %1731 = vrot.lane.b32.xlu1 %v4345_v56, %s3259_s11 }
 0x250   : > { %v608_v53 = vpop.permute.xlu2 %607  ;;  %v1068_v10 = vpop.permute.xlu0 %1067 }
 0x251   : > { %997 = vst [vmem:[#allocation2 + $0xb8] sm:$0xff] %v993_v22  ;;  %v1036_v4 = vpop.permute.xlu1 %1035 }
 0x252   : > { %v1049_v48 = vsel %vm655_vm14, %v1036_v4, %v1044_v32  ;;  %v1053_v1 = vsel %vm655_vm14, %v1044_v32, %v1036_v4 }
 0x253   : > { %v1059_v63 = vsel %vm3788_vm2, %v1053_v1, %v1027_v55  ;;  %v1060_v2 = vsel %vm3792_vm11, %v1049_v48, %v1028_v60 }
 0x254   : > { %v1147_v11 = vmul.f32 %v1059_v63, %v3385_v20  ;;  %v1148_v47 = vmul.f32 %v1060_v2, %v3387_v21 }
 0x256   : > { %v1153_v0 = vpack.c.bf16 %v1148_v47, %v1147_v11  ;;  %1733 = vrot.lane.b32.xlu2 %v4393_v52, %s3259_s11  ;;  %1735 = vrot.lane.b32.xlu0 %v4427_v30, %s3259_s11  ;;  %v6795_v47 = vld [vmem:[#allocation7_spill] sm:$0xff] }
 0x257   : > { %1737 = vrot.lane.b32.xlu1 %v4463_v33, %s3259_s11 }
 0x258   : > { %1157 = vst [vmem:[#allocation2 + $0xc0] sm:$0xff] %v1153_v0  ;;  %v654_v32 = vpop.permute.xlu2 %653  ;;  %v1076_v46 = vpop.permute.xlu0 %1075 }
 0x259   : > { %v646_v29 = vpop.permute.xlu1 %645  ;;  %v4525_v42 = vsel %vm6692_vm12, %v1068_v10, %v1076_v46  ;;  %v4529_v54 = vsel %vm6692_vm12, %v1076_v46, %v1068_v10  ;;  %v6796_v46 = vld [vmem:[#allocation8_spill] sm:$0xff] }
 0x25a   : > { %v1091_v43 = vsel %vm3776_vm15, %v4525_v42, %v4003_v6  ;;  %v1092_v61 = vsel %vm3780_vm1, %v4529_v54, %v3983_v23  ;;  %v659_v48 = vsel %vm655_vm14, %v646_v29, %v654_v32  ;;  %v663_v1 = vsel %vm655_vm14, %v654_v32, %v646_v29 }
 0x25b   : > { %v1099_v38 = vsel %vm3788_vm2, %v1021_v28, %v1091_v43  ;;  %v1100_v36 = vsel %vm3792_vm11, %v1017_v39, %v1092_v61 }
 0x25c   : > { %v1163_v62 = vmul.f32 %v1099_v38, %v3385_v20  ;;  %v1164_v22 = vmul.f32 %v1100_v36, %v3387_v21 }
 0x25e   : > { %1739 = vrot.lane.b32.xlu2 %v4387_v15, %s3259_s11  ;;  %v1169_v10 = vpack.c.bf16 %v1164_v22, %v1163_v62  ;;  %1741 = vrot.lane.b32.xlu0 %v4417_v35, %s3259_s11 }
 0x25f   : > { %1743 = vrot.lane.b32.xlu1 %v4451_v25, %s3259_s11 }
 0x260   : > { %v725_v4 = vpop.permute.xlu2 %724  ;;  %1173 = vst [vmem:[#allocation2 + $0xc8] sm:$0xff] %v1169_v10  ;;  %v616_v28 = vpop.permute.xlu0 %615 }
 0x261   : > { %v692_v55 = vpop.permute.xlu1 %691  ;;  %v621_v39 = vsel %vm617_vm13, %v608_v53, %v616_v28  ;;  %v625_v60 = vsel %vm617_vm13, %v616_v28, %v608_v53 }
 0x262   : > { %v637_v63 = vsel %vm3776_vm15, %v4071_v58, %v625_v60  ;;  %v638_v2 = vsel %vm3780_vm1, %v4094_v24, %v621_v39 }
 0x263   : > { %v675_v11 = vsel %vm3788_vm2, %v663_v1, %v637_v63  ;;  %v676_v53 = vsel %vm3792_vm11, %v659_v48, %v638_v2  ;;  %v2947_v2 = vld [vmem:[#allocation2 + $0x90] sm:$0xf] }
 0x264   : > { %v765_v0 = vmul.f32 %v675_v11, %v6795_v47  ;;  %v766_v43 = vmul.f32 %v676_v53, %v6796_v46  ;;  %v3082_v53 = vld [vmem:[#allocation2 + $0x94] sm:$0xf] }
 0x266   : > { %1745 = vrot.lane.b32.xlu2 %v4487_v3, %s3259_s11  ;;  %v770_v32 = vpack.c.bf16 %v766_v43, %v765_v0  ;;  %1763 = vrot.lane.b32.xlu0 %v4345_v56, %s3256_s28 }
 0x267   : > { %1765 = vrot.lane.b32.xlu1 %v4393_v52, %s3256_s28 }
 0x268   : > { %v822_v29 = vpop.permute.xlu2 %821  ;;  %774 = vst [vmem:[#allocation2 + $0xd8] sm:$0xff] %v770_v32  ;;  %v684_v61 = vpop.permute.xlu0 %683 }
 0x269   : > { %v814_v38 = vpop.permute.xlu1 %813  ;;  %v697_v36 = vsel %vm6692_vm12, %v684_v61, %v692_v55  ;;  %v701_v62 = vsel %vm6692_vm12, %v692_v55, %v684_v61 }
 0x26a   : > { %v708_v22 = vsel %vm3776_vm15, %v697_v36, %v4071_v58  ;;  %v709_v10 = vsel %vm3780_vm1, %v701_v62, %v4094_v24 }
 0x26b   : > { %v716_v28 = vsel %vm3788_vm2, %v625_v60, %v708_v22  ;;  %v717_v48 = vsel %vm3792_vm11, %v621_v39, %v709_v10 }
 0x26c   : > { %v781_v1 = vmul.f32 %v716_v28, %v6795_v47  ;;  %v782_v63 = vmul.f32 %v717_v48, %v6796_v46  ;;  %v3073_v28 = vld [vmem:[#allocation2 + $0x44] sm:$0xf0]  ;;  %v2877_v48 = vld [vmem:[#allocation2 + $0x48] sm:$0xf0] }
 0x26e   : > { %1767 = vrot.lane.b32.xlu2 %v4427_v30, %s3256_s28  ;;  %v786_v55 = vpack.c.bf16 %v782_v63, %v781_v1  ;;  %1769 = vrot.lane.b32.xlu0 %v4463_v33, %s3256_s28 }
 0x26f   : > { %1771 = vrot.lane.b32.xlu1 %v4387_v15, %s3256_s28  ;;  %v3091_v60 = vld [vmem:[#allocation2 + $0xd4] sm:$0xf0]  ;;  %v2949_v39 = vld [vmem:[#allocation2 + $0xd8] sm:$0xf0] }
 0x270   : > { %v4599_v11 = vpop.permute.xlu2 %877  ;;  %790 = vst [vmem:[#allocation2 + $0xe0] sm:$0xff] %v786_v55  ;;  %v733_v0 = vpop.permute.xlu0 %732  ;;  %v2948_v32 = vor.u32 %v3091_v60, %v2947_v2  ;;  %v2952_v61 = vor.u32 %v3082_v53, %v2949_v39  ;;  %v2875_v60 = vld [vmem:[#allocation2] sm:$0xf] }
 0x271   : > { %v854_v43 = vpop.permute.xlu1 %853  ;;  %v738_v22 = vsel %vm734_vm0, %v725_v4, %v733_v0  ;;  %v742_v10 = vsel %vm734_vm0, %v733_v0, %v725_v4  ;;  %v3064_v4 = vld [vmem:[#allocation2 + $0x4] sm:$0xf] }
 0x272   : > { %v749_v1 = vsel %vm3776_vm15, %v738_v22, %v697_v36  ;;  %v750_v63 = vsel %vm3780_vm1, %v742_v10, %v701_v62  ;;  %1417 = vmatpush.bf16.msra.mxu2 %v2948_v32  ;;  %1430 = vmatpush.bf16.msra.mxu3 %v2952_v61  ;;  %v2876_v36 = vor.u32 %v3073_v28, %v2875_v60  ;;  %v4630_v32 = vld [vmem:[%s6684_s4] sm:$0xf]  ;;  %v2955_v61 = vld [vmem:[#allocation2 + $0x98] sm:$0xf]  ;;  %v3083_v28 = vld [vmem:[#allocation2 + $0x9c] sm:$0xf] }
 0x273   : > { %v757_v55 = vsel %vm3788_vm2, %v4071_v58, %v749_v1  ;;  %v758_v2 = vsel %vm3792_vm11, %v4094_v24, %v750_v63  ;;  %v2880_v0 = vor.u32 %v3064_v4, %v2877_v48  ;;  %v4621_v62 = vsel %vm617_vm13, %v814_v38, %v822_v29 }
 0x274   : > { %v797_v53 = vmul.f32 %v757_v55, %v6795_v47  ;;  %v798_v39 = vmul.f32 %v758_v2, %v6796_v46  ;;  %v4625_v58 = vsel %vm617_vm13, %v822_v29, %v814_v38  ;;  %v838_v2 = vsel %vm3780_vm1, %v4188_v51, %v4621_v62 }
 0x275   : > { %v837_v55 = vsel %vm3776_vm15, %v4153_v57, %v4625_v58 }
 0x276   : > { %1773 = vrot.lane.b32.xlu2 %v4417_v35, %s3256_s28  ;;  %v802_v24 = vpack.c.bf16 %v798_v39, %v797_v53  ;;  %1418 = vmatpush.bf16.msra.mxu2 %v2876_v36  ;;  %v3074_v53 = vld [vmem:[#allocation2 + $0x4c] sm:$0xf0] }
 0x277   : > { %1431 = vmatpush.bf16.msra.mxu3 %v2880_v0  ;;  %1777 = vrot.lane.b32.xlu1 %v4487_v3, %s3256_s28  ;;  %v3092_v10 = vld [vmem:[#allocation2 + $0xdc] sm:$0xf0]  ;;  %v2957_v29 = vld [vmem:[#allocation2 + $0xe0] sm:$0xf0]  ;;  %v2885_v0 = vld [vmem:[#allocation2 + $0x50] sm:$0xf0] }
 0x278   : > { %1775 = vrot.lane.b32.xlu0 %v4451_v25, %s3256_s28  ;;  %v926_v22 = vpop.permute.xlu2 %925  ;;  %806 = vst [vmem:[#allocation2 + $0xe8] sm:$0xff] %v802_v24  ;;  %v846_v38 = vpop.permute.xlu0 %845  ;;  %v2956_v1 = vor.u32 %v3092_v10, %v2955_v61  ;;  %v2960_v63 = vor.u32 %v3083_v28, %v2957_v29  ;;  %v3065_v28 = vld [vmem:[#allocation2 + $0xc] sm:$0xf]  ;;  %s3053_s28 = sshll.u32 %s3351_s9, 4  ;;  %s2734_s9 = sshll.u32 %s259_s12, 4  ;;  %s2735_s9 = int_to_ptr.vmem [resolvable:$true] %s2734_s9 }
 0x279   : > { %v918_v48 = vpop.permute.xlu1 %917  ;;  %v858_v60 = vsel %vm655_vm14, %v846_v38, %v854_v43  ;;  %v862_v4 = vsel %vm655_vm14, %v854_v43, %v846_v38  ;;  %3017 = vmatmul.msk.bf16.vlgmr.msra.gmra.mxu2 %vm6797_vm10, %v4630_v32  ;;  %v2883_v43 = vld [vmem:[#allocation2 + $0x8] sm:$0xf]  ;;  %v2888_v38 = vor.u32 %v3065_v28, %v2885_v0  ;;  %vm6799_vm10 = vmmov %vm6798_vm9  ;;  %s5417_s19 = scalar_lea.vmem %s6681_s1, %s3053_s28  ;;  %s2733_s28 = scalar_lea.hbm %s6686_s6, %s3102_s13 }
 0x27a   : > { %v869_v39 = vsel %vm3788_vm2, %v862_v4, %v837_v55  ;;  %v870_v36 = vsel %vm3792_vm11, %v858_v60, %v838_v2  ;;  %3018 = vmatmul.msk.bf16.vlgmr.msra.gmra.mxu3 %vm6798_vm9, %v4630_v32  ;;  %1443 = vmatpush.bf16.msrb.mxu2 %v2956_v1  ;;  %v2884_v10 = vor.u32 %v3074_v53, %v2883_v43  ;;  %v3075_v55 = vld [vmem:[#allocation2 + $0x54] sm:$0xf0]  ;;  %v2963_v2 = vld [vmem:[#allocation2 + $0xa0] sm:$0xf]  ;;  %v3084_v60 = vld [vmem:[#allocation2 + $0xa4] sm:$0xf] }
 0x27b   : > { %v957_v24 = vmul.f32 %v869_v39, %v6795_v47  ;;  %v958_v61 = vmul.f32 %v870_v36, %v6796_v46  ;;  %1456 = vmatpush.bf16.msrb.mxu3 %v2960_v63  ;;  %v2891_v4 = vld [vmem:[#allocation2 + $0x10] sm:$0xf]  ;;  %v930_v43 = vsel %vm734_vm0, %v918_v48, %v926_v22 }
 0x27d   : > { %v962_v29 = vpack.c.bf16 %v958_v61, %v957_v24  ;;  %v2892_v61 = vor.u32 %v3075_v55, %v2891_v4 }
 0x27e   : > { %1803 = vrot.lane.b32.xlu2 %v4345_v56, %s3258_s10  ;;  %1444 = vmatpush.bf16.msrb.mxu2 %v2884_v10  ;;  %v934_v10 = vsel %vm734_vm0, %v926_v22, %v918_v48  ;;  %v2893_v48 = vld [vmem:[#allocation2 + $0x58] sm:$0xf0] }
 0x27f   : > { %966 = vst [vmem:[#allocation2 + $0xf0] sm:$0xff] %v962_v29  ;;  %1457 = vmatpush.bf16.msrb.mxu3 %v2888_v38  ;;  %1807 = vrot.lane.b32.xlu1 %v4427_v30, %s3258_s10  ;;  %v3093_v63 = vld [vmem:[#allocation2 + $0xe4] sm:$0xf0]  ;;  %v2965_v53 = vld [vmem:[#allocation2 + $0xe8] sm:$0xf0] }
 0x280   : > { %v4662_v1 = vpop.permute.xlu2 %1037  ;;  %1805 = vrot.lane.b32.xlu0 %v4393_v52, %s3258_s10  ;;  %v886_v39 = vpop.permute.xlu0 %885  ;;  %v2964_v0 = vor.u32 %v3093_v63, %v2963_v2  ;;  %v2968_v24 = vor.u32 %v3084_v60, %v2965_v53 }
 0x281   : > { %v1014_v36 = vpop.permute.xlu1 %1013  ;;  %v890_v28 = vsel %vm6692_vm12, %v4599_v11, %v886_v39  ;;  %v894_v29 = vsel %vm6692_vm12, %v886_v39, %v4599_v11 }
 0x282   : > { %v901_v38 = vsel %vm3776_vm15, %v890_v28, %v4153_v57  ;;  %v902_v55 = vsel %vm3780_vm1, %v894_v29, %v4188_v51  ;;  %v941_v2 = vsel %vm3776_vm15, %v930_v43, %v890_v28  ;;  %v942_v22 = vsel %vm3780_vm1, %v934_v10, %v894_v29  ;;  %1469 = vmatpush.bf16.msra.mxu2 %v2964_v0  ;;  %v3066_v43 = vld [vmem:[#allocation2 + $0x14] sm:$0xf] }
 0x283   : > { %v909_v11 = vsel %vm3788_vm2, %v4625_v58, %v901_v38  ;;  %v910_v60 = vsel %vm3792_vm11, %v4621_v62, %v902_v55  ;;  %v949_v4 = vsel %vm3788_vm2, %v4153_v57, %v941_v2  ;;  %v950_v63 = vsel %vm3792_vm11, %v4188_v51, %v942_v22  ;;  %1482 = vmatpush.bf16.msra.mxu3 %v2968_v24  ;;  %v2971_v62 = vld [vmem:[#allocation2 + $0xa8] sm:$0xf]  ;;  %v3085_v51 = vld [vmem:[#allocation2 + $0xac] sm:$0xf] }
 0x284   : > { %v973_v53 = vmul.f32 %v909_v11, %v6795_v47  ;;  %v974_v39 = vmul.f32 %v910_v60, %v6796_v46  ;;  %v989_v0 = vmul.f32 %v949_v4, %v6795_v47  ;;  %v990_v58 = vmul.f32 %v950_v63, %v6796_v46  ;;  %v2901_v11 = vld [vmem:[#allocation2 + $0x60] sm:$0xf0]  ;;  %v2899_v60 = vld [vmem:[#allocation2 + $0x18] sm:$0xf]  ;;  %v3067_v63 = vld [vmem:[#allocation2 + $0x1c] sm:$0xf] }
 0x285   : > { %v2896_v10 = vor.u32 %v3066_v43, %v2893_v48 }
 0x286   : > { %1809 = vrot.lane.b32.xlu2 %v4463_v33, %s3258_s10  ;;  %v978_v57 = vpack.c.bf16 %v974_v39, %v973_v53  ;;  %v994_v28 = vpack.c.bf16 %v990_v58, %v989_v0  ;;  %1470 = vmatpush.bf16.msra.mxu2 %v2892_v61  ;;  %v3094_v29 = vld [vmem:[#allocation2 + $0xec] sm:$0xf0]  ;;  %v2973_v24 = vld [vmem:[#allocation2 + $0xf0] sm:$0xf0]  ;;  %v3076_v61 = vld [vmem:[#allocation2 + $0x5c] sm:$0xf0]  ;;  %v2904_v0 = vor.u32 %v3067_v63, %v2901_v11 }
 0x287   : > { %1483 = vmatpush.bf16.msra.mxu3 %v2896_v10  ;;  %1813 = vrot.lane.b32.xlu1 %v4417_v35, %s3258_s10  ;;  %v2972_v55 = vor.u32 %v3094_v29, %v2971_v62  ;;  %v2976_v2 = vor.u32 %v3085_v51, %v2973_v24  ;;  %v2900_v4 = vor.u32 %v3076_v61, %v2899_v60 }
 0x288   : > { %v1116_v38 = vpop.permute.xlu2 %1115  ;;  %982 = vst [vmem:[#allocation2 + $0xf8] sm:$0xff] %v978_v57  ;;  %1811 = vrot.lane.b32.xlu0 %v4387_v15, %s3258_s10  ;;  %v1006_v22 = vpop.permute.xlu0 %1005 }
 0x289   : > { %v1070_v48 = vpop.permute.xlu1 %1069  ;;  %998 = vst [vmem:[#allocation2 + $0x100] sm:$0xff] %v994_v28  ;;  %3019 = vmatmul.msk.bf16.vlgmr.msrb.gmra.mxu2 %vm6798_vm9, %v4630_v32  ;;  %v1018_v53 = vsel %vm617_vm13, %v1006_v22, %v1014_v36  ;;  %v1022_v39 = vsel %vm617_vm13, %v1014_v36, %v1006_v22 }
 0x28a   : > { %3020 = vmatmul.msk.bf16.vlgmr.msrb.gmra.mxu3 %vm6799_vm10, %v4630_v32  ;;  %1495 = vmatpush.bf16.msrb.mxu2 %v2972_v55  ;;  %v1029_v43 = vsel %vm3776_vm15, %v4309_v41, %v1022_v39  ;;  %v1030_v10 = vsel %vm3780_vm1, %v4253_v59, %v1018_v53  ;;  %vm6800_vm10 = vmmov %vm6798_vm9 }
 0x28b   : > { %1508 = vmatpush.bf16.msrb.mxu3 %v2976_v2 }
 0x28e   : > { %1815 = vrot.lane.b32.xlu2 %v4451_v25, %s3258_s10  ;;  %1496 = vmatpush.bf16.msrb.mxu2 %v2900_v4 }
 0x28f   : > { %1509 = vmatpush.bf16.msrb.mxu3 %v2904_v0  ;;  %v3095_v0 = vld [vmem:[#allocation2 + $0xf4] sm:$0xf0] }
 0x290   : > { %v4718_v58 = vpop.permute.xlu2 %1105  ;;  %1817 = vrot.lane.b32.xlu0 %v4487_v3, %s3258_s10  ;;  %v1046_v36 = vpop.permute.xlu0 %1045  ;;  %s2736_s10 = sshll.u32 %s2733_s28, 4  ;;  %s2737_s10 = int_to_ptr.hbm [resolvable:$true] %s2736_s10 }
 0x291   : > { %v1078_v62 = vpop.permute.xlu1 %1077  ;;  %v1050_v57 = vsel %vm655_vm14, %v4662_v1, %v1046_v36  ;;  %v1054_v28 = vsel %vm655_vm14, %v1046_v36, %v4662_v1 }
 0x292   : > { %v4736_v29 = vsel %vm6692_vm12, %v1070_v48, %v1078_v62  ;;  %v4740_v51 = vsel %vm6692_vm12, %v1078_v62, %v1070_v48  ;;  %v1061_v24 = vsel %vm3788_vm2, %v1054_v28, %v1029_v43  ;;  %v1062_v55 = vsel %vm3792_vm11, %v1050_v57, %v1030_v10  ;;  %v2981_v10 = vld [vmem:[#allocation2 + $0xf8] sm:$0xf0]  ;;  %v2979_v62 = vld [vmem:[#allocation2 + $0xb0] sm:$0xf]  ;;  %vm6802_vm12 = vmmov %vm6798_vm9 }
 0x293   : > { %v1093_v2 = vsel %vm3776_vm15, %v4736_v29, %v4309_v41  ;;  %v1094_v1 = vsel %vm3780_vm1, %v4740_v51, %v4253_v59  ;;  %v1149_v22 = vmul.f32 %v1061_v24, %v6795_v47  ;;  %v1150_v48 = vmul.f32 %v1062_v55, %v6796_v46 }
 0x294   : > { %v1101_v61 = vsel %vm3788_vm2, %v1022_v39, %v1093_v2  ;;  %v1102_v11 = vsel %vm3792_vm11, %v1018_v53, %v1094_v1  ;;  %v2980_v24 = vor.u32 %v3095_v0, %v2979_v62  ;;  %v3086_v39 = vld [vmem:[#allocation2 + $0xb4] sm:$0xf]  ;;  %v3077_v1 = vld [vmem:[#allocation2 + $0x64] sm:$0xf0] }
 0x295   : > { %v1165_v60 = vmul.f32 %v1101_v61, %v6795_v47  ;;  %v1166_v4 = vmul.f32 %v1102_v11, %v6796_v46  ;;  %v1154_v63 = vpack.c.bf16 %v1150_v48, %v1149_v22  ;;  %v2984_v2 = vor.u32 %v3086_v39, %v2981_v10  ;;  %v2909_v61 = vld [vmem:[#allocation2 + $0x68] sm:$0xf0] }
 0x297   : > { %v1170_v43 = vpack.c.bf16 %v1166_v4, %v1165_v60  ;;  %1158 = vst [vmem:[#allocation2 + $0x108] sm:$0xff] %v1154_v63  ;;  %v2907_v60 = vld [vmem:[#allocation2 + $0x20] sm:$0xf]  ;;  %v3068_v63 = vld [vmem:[#allocation2 + $0x24] sm:$0xf] }
 0x298   : > { %v4762_v36 = vpop.permute.xlu2 %1699  ;;  %v1108_v57 = vpop.permute.xlu0 %1107  ;;  %v2912_v0 = vor.u32 %v3068_v63, %v2909_v61  ;;  %v2923_v61 = vld [vmem:[#allocation2 + $0x30] sm:$0xf] }
 0x299   : > { %1174 = vst [vmem:[#allocation2 + $0x110] sm:$0xff] %v1170_v43  ;;  %v1110_v28 = vpop.permute.xlu1 %1109  ;;  %v1121_v53 = vsel %vm734_vm0, %v1108_v57, %v1116_v38  ;;  %v1125_v55 = vsel %vm734_vm0, %v1116_v38, %v1108_v57  ;;  %3021 = vmatmul.msk.bf16.vlgmr.msra.gmra.mxu2 %vm6798_vm9, %v4630_v32  ;;  %v2995_v43 = vld [vmem:[#allocation2 + $0xc0] sm:$0xf]  ;;  %v3088_v57 = vld [vmem:[#allocation2 + $0xc4] sm:$0xf] }
 0x29a   : > { %v1131_v22 = vsel %vm3776_vm15, %v1121_v53, %v4525_v42  ;;  %v1132_v48 = vsel %vm3780_vm1, %v1125_v55, %v4529_v54  ;;  %3022 = vmatmul.msk.bf16.vlgmr.msra.gmra.mxu3 %vm6800_vm10, %v4630_v32  ;;  %1521 = vmatpush.bf16.msra.mxu2 %v2980_v24  ;;  %v2908_v54 = vor.u32 %v3077_v1, %v2907_v60  ;;  %vm6801_vm10 = vmmov %vm6798_vm9 }
 0x29b   : > { %v1139_v38 = vsel %vm3788_vm2, %v4003_v6, %v1131_v22  ;;  %v1140_v11 = vsel %vm3792_vm11, %v3983_v23, %v1132_v48  ;;  %1534 = vmatpush.bf16.msra.mxu3 %v2984_v2  ;;  %v2925_v2 = vld [vmem:[#allocation2 + $0x78] sm:$0xf0] }
 0x29c   : > { %v1179_v42 = vmul.f32 %v1139_v38, %v3385_v20  ;;  %v1180_v4 = vmul.f32 %v1140_v11, %v3387_v21  ;;  %v3079_v20 = vld [vmem:[#allocation2 + $0x74] sm:$0xf0]  ;;  %v3070_v38 = vld [vmem:[#allocation2 + $0x34] sm:$0xf] }
 0x29d   : > { %v2924_v60 = vor.u32 %v3079_v20, %v2923_v61  ;;  %v3069_v61 = vld [vmem:[#allocation2 + $0x2c] sm:$0xf] }
 0x29e   : > { %v1185_v10 = vpack.c.bf16 %v1180_v4, %v1179_v42  ;;  %1522 = vmatpush.bf16.msra.mxu2 %v2908_v54  ;;  %v3097_v62 = vld [vmem:[#allocation2 + $0x104] sm:$0xf0]  ;;  %v2997_v24 = vld [vmem:[#allocation2 + $0x108] sm:$0xf0]  ;;  %v2928_v42 = vor.u32 %v3070_v38, %v2925_v2  ;;  %v3096_v54 = vld [vmem:[#allocation2 + $0xfc] sm:$0xf0] }
 0x29f   : > { %1535 = vmatpush.bf16.msra.mxu3 %v2912_v0  ;;  %v2996_v39 = vor.u32 %v3097_v62, %v2995_v43  ;;  %v3000_v23 = vor.u32 %v3088_v57, %v2997_v24  ;;  %v2987_v43 = vld [vmem:[#allocation2 + $0xb8] sm:$0xf]  ;;  %v2917_v2 = vld [vmem:[#allocation2 + $0x70] sm:$0xf0] }
 0x2a0   : > { %v4786_v6 = vpop.permute.xlu2 %1705  ;;  %1189 = vst [vmem:[#allocation2 + $0xd0] sm:$0xff] %v1185_v10  ;;  %v1118_v53 = vpop.permute.xlu0 %1117  ;;  %v3087_v10 = vld [vmem:[#allocation2 + $0xbc] sm:$0xf]  ;;  %v2988_v57 = vor.u32 %v3096_v54, %v2987_v43  ;;  %v3005_v54 = vld [vmem:[#allocation2 + $0x110] sm:$0xf0] }
 0x2a1   : > { %v1104_v55 = vpop.permute.xlu1 %1103  ;;  %v1122_v21 = vsel %vm734_vm0, %v1110_v28, %v1118_v53  ;;  %v1126_v1 = vsel %vm734_vm0, %v1118_v53, %v1110_v28  ;;  %1573 = vmatpush.bf16.msrb.mxu0 %v2996_v39  ;;  %1586 = vmatpush.bf16.msrb.mxu1 %v3000_v23 }
 0x2a2   : > { %v1133_v22 = vsel %vm3776_vm15, %v1122_v21, %v4736_v29  ;;  %v1134_v48 = vsel %vm3780_vm1, %v1126_v1, %v4740_v51  ;;  %v2989_v51 = vld [vmem:[#allocation2 + $0x100] sm:$0xf0] }
 0x2a3   : > { %v1141_v11 = vsel %vm3788_vm2, %v4309_v41, %v1133_v22  ;;  %v1142_v28 = vsel %vm3792_vm11, %v4253_v59, %v1134_v48  ;;  %v2992_v59 = vor.u32 %v3087_v10, %v2989_v51  ;;  %v3003_v51 = vld [vmem:[#allocation2 + $0xc8] sm:$0xf] }
 0x2a4   : > { %v1181_v4 = vmul.f32 %v1141_v11, %v6795_v47  ;;  %v1182_v29 = vmul.f32 %v1142_v28, %v6796_v46  ;;  %v2920_v11 = vor.u32 %v3069_v61, %v2917_v2 }
 0x2a5   : > { %1574 = vmatpush.bf16.msrb.mxu0 %v2924_v60  ;;  %1587 = vmatpush.bf16.msrb.mxu1 %v2928_v42 }
 0x2a6   : > { %v1186_v63 = vpack.c.bf16 %v1182_v29, %v1181_v4  ;;  %v3098_v29 = vld [vmem:[#allocation2 + $0x10c] sm:$0xf0] }
 0x2a7   : > { %v3011_v28 = vld [vmem:[#allocation2 + $0xd0] sm:$0xf]  ;;  %v3090_v42 = vld [vmem:[#allocation2 + $0xd4] sm:$0xf] }
 0x2a8   : > { %v4806_v0 = vpop.permute.xlu2 %1711  ;;  %1190 = vst [vmem:[#allocation2 + $0x118] sm:$0xff] %v1186_v63  ;;  %v1112_v41 = vpop.permute.xlu0 %1111  ;;  %3029 = vmatmul.msk.bf16.vlgmr.msrb.gmra.mxu0 %vm6798_vm9, %v4630_v32  ;;  %3030 = vmatmul.msk.bf16.vlgmr.msrb.gmra.mxu1 %vm6801_vm10, %v4630_v32  ;;  %v3089_v63 = vld [vmem:[#allocation2 + $0xcc] sm:$0xf]  ;;  %vm6804_vm10 = vmmov %vm6798_vm9 }
 0x2a9   : > { %v1114_v62 = vpop.permute.xlu1 %1113  ;;  %v1119_v47 = vsel %vm734_vm0, %v1104_v55, %v1112_v41  ;;  %v1123_v46 = vsel %vm734_vm0, %v1112_v41, %v1104_v55  ;;  %3023 = vmatmul.msk.bf16.vlgmr.msrb.gmra.mxu2 %vm6802_vm12, %v4630_v32  ;;  %vm6803_vm12 = vmmov %vm6798_vm9 }
 0x2aa   : > { %v1120_v24 = vsel %vm734_vm0, %v4718_v58, %v1114_v62  ;;  %v1124_v39 = vsel %vm734_vm0, %v1114_v62, %v4718_v58  ;;  %v1127_v23 = vsel %vm3776_vm15, %v1119_v47, %v4039_v12  ;;  %v1128_v53 = vsel %vm3780_vm1, %v1123_v46, %v4043_v26  ;;  %3024 = vmatmul.msk.bf16.vlgmr.msrb.gmra.mxu3 %vm6798_vm9, %v4630_v32  ;;  %v3078_v58 = vld [vmem:[#allocation2 + $0x6c] sm:$0xf0] }
 0x2ab   : > { %v1129_v55 = vsel %vm3776_vm15, %v1120_v24, %v4266_v31  ;;  %v1130_v20 = vsel %vm3780_vm1, %v1124_v39, %v4270_v40  ;;  %v1135_v12 = vsel %vm3788_vm2, %v3583_v13, %v1127_v23  ;;  %v1136_v26 = vsel %vm3792_vm11, %v3588_v14, %v1128_v53  ;;  %1547 = vmatpush.bf16.msrb.mxu2 %v2988_v57  ;;  %v2915_v14 = vld [vmem:[#allocation2 + $0x28] sm:$0xf]  ;;  %v3080_v39 = vld [vmem:[#allocation2 + $0x7c] sm:$0xf0]  ;;  %v2933_v23 = vld [vmem:[#allocation2 + $0x80] sm:$0xf0] }
 0x2ac   : > { %v1137_v31 = vsel %vm3788_vm2, %v3717_v9, %v1129_v55  ;;  %v1138_v40 = vsel %vm3792_vm11, %v3741_v34, %v1130_v20  ;;  %v1175_v21 = vmul.f32 %v1135_v12, %v3377_v16  ;;  %v1176_v1 = vmul.f32 %v1136_v26, %v3379_v17  ;;  %1560 = vmatpush.bf16.msrb.mxu3 %v2992_v59  ;;  %v2931_v20 = vld [vmem:[#allocation2 + $0x38] sm:$0xf] }
 0x2ad   : > { %v1177_v13 = vmul.f32 %v1137_v31, %v3381_v18  ;;  %v1178_v22 = vmul.f32 %v1138_v40, %v3383_v19  ;;  %v2916_v48 = vor.u32 %v3078_v58, %v2915_v14  ;;  %v3004_v46 = vor.u32 %v3098_v29, %v3003_v51  ;;  %v3071_v58 = vld [vmem:[#allocation2 + $0x3c] sm:$0xf] }
 0x2ae   : > { %v1183_v38 = vpack.c.bf16 %v1176_v1, %v1175_v21  ;;  %v3008_v24 = vor.u32 %v3089_v63, %v3005_v54  ;;  %v2932_v12 = vor.u32 %v3080_v39, %v2931_v20  ;;  %v2936_v26 = vor.u32 %v3071_v58, %v2933_v23 }
 0x2af   : > { %v1184_v9 = vpack.c.bf16 %v1178_v22, %v1177_v13  ;;  %1548 = vmatpush.bf16.msrb.mxu2 %v2916_v48  ;;  %v3099_v60 = vld [vmem:[#allocation2 + $0x114] sm:$0xf0]  ;;  %v3013_v16 = vld [vmem:[#allocation2 + $0x118] sm:$0xf0] }
 0x2b0   : > { %v4854_v34 = vpop.permute.xlu2 %1733  ;;  %1187 = vst [vmem:[#allocation2 + $0x40] sm:$0xff] %v1183_v38  ;;  %1561 = vmatpush.bf16.msrb.mxu3 %v2920_v11  ;;  %v4856_v17 = vpop.permute.xlu0 %1701  ;;  %v3012_v19 = vor.u32 %v3099_v60, %v3011_v28  ;;  %v3016_v4 = vor.u32 %v3090_v42, %v3013_v16 }
 0x2b1   : > { %v1704_v18 = vpop.permute.xlu1 %1703  ;;  %1188 = vst [vmem:[#allocation2 + $0x88] sm:$0xff] %v1184_v9 }
 0x2b2   : > { %1625 = vmatpush.bf16.msra.mxu0 %v3012_v19  ;;  %1638 = vmatpush.bf16.msra.mxu1 %v3016_v4  ;;  %v4910_v28 = vsel %vm459_vm3, %v1704_v18, %v4806_v0  ;;  %v4915_v60 = vsel %vm459_vm3, %v4806_v0, %v1704_v18 }
 0x2b3   : > { %v1727_v19 = vsel %vm3481_vm4, %v4427_v30, %v4915_v60  ;;  %v1728_v4 = vsel %vm3485_vm5, %v4451_v25, %v4910_v28 }
 0x2b7   : > { %v2939_v43 = vld [vmem:[#allocation2 + $0x40] sm:$0xf]  ;;  %v3072_v57 = vld [vmem:[#allocation2 + $0x44] sm:$0xf] }
 0x2b8   : > { %v4858_v10 = vpop.permute.xlu0 %1707  ;;  %v3081_v62 = vld [vmem:[#allocation2 + $0x84] sm:$0xf0]  ;;  %v2941_v59 = vld [vmem:[#allocation2 + $0x88] sm:$0xf0]  ;;  %v1740_v47 = vpop.permute.xlu2 %1739 }
 0x2b9   : > { %v1710_v41 = vpop.permute.xlu1 %1709  ;;  %3025 = vmatmul.msk.bf16.vlgmr.msra.gmra.mxu2 %vm6803_vm12, %v4630_v32  ;;  %v2940_v53 = vor.u32 %v3081_v62, %v2939_v43  ;;  %v2944_v55 = vor.u32 %v3072_v57, %v2941_v59  ;;  %v4868_v31 = vsel %vm459_vm3, %v4858_v10, %v4762_v36  ;;  %vm6805_vm12 = vmmov %vm6798_vm9 }
 0x2ba   : > { %3026 = vmatmul.msk.bf16.vlgmr.msra.gmra.mxu3 %vm6804_vm10, %v4630_v32  ;;  %1599 = vmatpush.bf16.msra.mxu2 %v3004_v46  ;;  %v1723_v21 = vsel %vm3481_vm4, %v4345_v56, %v4868_v31  ;;  %vm6807_vm10 = vmmov %vm6798_vm9  ;;  %v4922_v16 = vsel %vm459_vm3, %v1710_v41, %v4856_v17  ;;  %v1716_v59 = vsel %vm459_vm3, %v4856_v17, %v1710_v41 }
 0x2bb   : > { %1612 = vmatpush.bf16.msra.mxu3 %v3008_v24  ;;  %1626 = vmatpush.bf16.msra.mxu0 %v2940_v53  ;;  %v1725_v18 = vsel %vm3481_vm4, %v4393_v52, %v4922_v16  ;;  %v1715_v46 = vsel %vm459_vm3, %v4762_v36, %v4858_v10  ;;  %v1726_v20 = vsel %vm3485_vm5, %v4417_v35, %v1716_v59 }
 0x2bc   : > { %1639 = vmatpush.bf16.msra.mxu1 %v2944_v55  ;;  %v1724_v36 = vsel %vm3485_vm5, %v4387_v15, %v1715_v46 }
 0x2be   : > { %1600 = vmatpush.bf16.msra.mxu2 %v2932_v12  ;;  %3033 = vmatmul.msk.bf16.vlgmr.msra.gmra.mxu0 %vm6798_vm9, %v4630_v32 }
 0x2bf   : > { %1613 = vmatpush.bf16.msra.mxu3 %v2936_v26  ;;  %3034 = vmatmul.msk.bf16.vlgmr.msra.gmra.mxu1 %vm6805_vm12, %v4630_v32  ;;  %vm6808_vm12 = vcmp.lt.s32.totalorder %v3477_v37, 112 }
 0x2c0   : > { %v1714_v2 = vpop.permute.xlu0 %1713  ;;  %v1746_v22 = vpop.permute.xlu2 %1745 }
 0x2c1   : > { %v1732_v40 = vpop.permute.xlu1 %1731  ;;  %v4889_v14 = vsel %vm459_vm3, %v1714_v2, %v4786_v6 }
 0x2c2   : > { %v1751_v1 = vsel %vm497_vm6, %v1740_v47, %v1732_v40  ;;  %v1729_v38 = vsel %vm3481_vm4, %v4463_v33, %v4889_v14  ;;  %v1747_v23 = vsel %vm497_vm6, %v1732_v40, %v1740_v47 }
 0x2c3   : > { %v4882_v13 = vsel %vm3494_vm7, %v1751_v1, %v1723_v21  ;;  %v4997_v41 = vsel %vm3498_vm8, %v1747_v23, %v1724_v36 }
 0x2c4   : > { %6806 = vst [vmem:[#allocation7_spill] sm:$0xff] %v4882_v13  ;;  %1843 = vrot.lane.b32.xlu1 %v4882_v13, %s3261_s14 }
 0x2c5   : > { %6811 = vst [vmem:[#allocation18_spill] sm:$0xff] %v4997_v41 }
 0x2c8   : > { %v1736_v61 = vpop.permute.xlu0 %1735  ;;  %v4917_v42 = vpop.permute.xlu2 %1767 }
 0x2c9   : > { %v1738_v48 = vpop.permute.xlu1 %1737  ;;  %3027 = vmatmul.msk.bf16.vlgmr.msrb.gmra.mxu2 %vm6807_vm10, %v4630_v32  ;;  %vm6810_vm10 = vmmov %vm6798_vm9 }
 0x2ca   : > { %v1754_v9 = vsel %vm497_vm6, %v1746_v22, %v1738_v48  ;;  %3028 = vmatmul.msk.bf16.vlgmr.msrb.gmra.mxu3 %vm6798_vm9, %v4630_v32  ;;  %v1750_v58 = vsel %vm497_vm6, %v1738_v48, %v1746_v22 }
 0x2cb   : > { %v4901_v11 = vsel %vm3494_vm7, %v1754_v9, %v1729_v38 }
 0x2cc   : > { %1849 = vrot.lane.b32.xlu1 %v4901_v11, %s3261_s14 }
 0x2d0   : > { %v1742_v0 = vpop.permute.xlu0 %1741  ;;  %v1774_v24 = vpop.permute.xlu2 %1773 }
 0x2d1   : > { %v1744_v29 = vpop.permute.xlu1 %1743  ;;  %v1752_v63 = vsel %vm497_vm6, %v1742_v0, %v4854_v34  ;;  %v1748_v39 = vsel %vm497_vm6, %v4854_v34, %v1742_v0 }
 0x2d2   : > { %v1749_v54 = vsel %vm497_vm6, %v1736_v61, %v1744_v29  ;;  %v1753_v51 = vsel %vm497_vm6, %v1744_v29, %v1736_v61  ;;  %v4953_v57 = vsel %vm3494_vm7, %v1752_v63, %v1725_v18  ;;  %v4987_v34 = vsel %vm3498_vm8, %v1748_v39, %v1726_v20 }
 0x2d3   : > { %v4945_v43 = vsel %vm3494_vm7, %v1753_v51, %v1727_v19  ;;  %v4949_v62 = vsel %vm3498_vm8, %v1749_v54, %v1728_v4  ;;  %1845 = vrot.lane.b32.xlu2 %v4953_v57, %s3261_s14  ;;  %vm6820_vm6 = vcmp.lt.s32.totalorder %v3477_v37, 96 }
 0x2d4   : > { %1847 = vrot.lane.b32.xlu0 %v4945_v43, %s3261_s14  ;;  %1855 = vrot.lane.b32.xlu1 %v4949_v62, %s3261_s14 }
 0x2d8   : > { %v1764_v55 = vpop.permute.xlu0 %1763  ;;  %v1804_v0 = vpop.permute.xlu2 %1803 }
 0x2d9   : > { %v1766_v53 = vpop.permute.xlu1 %1765  ;;  %3031 = vmatmul.msk.bf16.vlgmr.msra.gmra.mxu2 %vm6810_vm10, %v4630_v32  ;;  %vm6814_vm10 = vmmov %vm6808_vm12 }
 0x2da   : > { %v4978_v17 = vsel %vm6808_vm12, %v1774_v24, %v1766_v53  ;;  %3032 = vmatmul.msk.bf16.vlgmr.msra.gmra.mxu3 %vm6798_vm9, %v4630_v32  ;;  %v5012_v32 = vsel %vm459_vm3, %v4786_v6, %v1714_v2  ;;  %vm6818_vm3 = vmmov %vm6814_vm10 }
 0x2db   : > { %6809 = vst [vmem:[#allocation8_spill] sm:$0xff] %v4978_v17  ;;  %v1790_v10 = vsel %vm3485_vm5, %v4978_v17, %v4417_v35  ;;  %1851 = vrot.lane.b32.xlu2 %v4997_v41, %s3261_s14  ;;  %v1730_v6 = vsel %vm3485_vm5, %v4487_v3, %v5012_v32  ;;  %v5073_v29 = vsel %vm6818_vm3, %v1766_v53, %v1774_v24  ;;  %vm6822_vm9 = vmmov %vm6820_vm6 }
 0x2dc   : > { %v5001_v47 = vsel %vm3498_vm8, %v1716_v59, %v1790_v10  ;;  %1877 = vrot.lane.b32.xlu1 %v4953_v57, %s3262_s15  ;;  %1853 = vrot.lane.b32.xlu0 %v4987_v34, %s3261_s14  ;;  %v5040_v22 = vsel %vm3498_vm8, %v1750_v58, %v1730_v6  ;;  %6819 = vst [vmem:[#allocation24_spill] sm:$0xff] %v5073_v29 }
 0x2dd   : > { %6812 = vst [vmem:[#allocation19_spill] sm:$0xff] %v5001_v47  ;;  %v1789_v63 = vsel %vm3481_vm4, %v5073_v29, %v4393_v52 }
 0x2e0   : > { %v5016_v26 = vpop.permute.xlu0 %1769 }
 0x2e1   : > { %v1772_v12 = vpop.permute.xlu1 %1771 }
 0x2e2   : > { %v5020_v40 = vsel %vm6808_vm12, %v1764_v55, %v1772_v12  ;;  %v5024_v21 = vsel %vm6814_vm10, %v1772_v12, %v1764_v55  ;;  %vm6824_vm12 = vmmov %vm6820_vm6 }
 0x2e3   : > { %6813 = vst [vmem:[#allocation20_spill] sm:$0xff] %v5020_v40  ;;  %v1787_v2 = vsel %vm3481_vm4, %v5020_v40, %v4345_v56  ;;  %v1788_v1 = vsel %vm3485_vm5, %v5024_v21, %v4387_v15  ;;  %1857 = vrot.lane.b32.xlu2 %v5040_v22, %s3261_s14  ;;  %vm6826_vm10 = vmmov %vm6820_vm6 }
 0x2e4   : > { %6815 = vst [vmem:[#allocation21_spill] sm:$0xff] %v5024_v21  ;;  %v5045_v48 = vsel %vm3494_vm7, %v4868_v31, %v1787_v2  ;;  %v5049_v61 = vsel %vm3498_vm8, %v1715_v46, %v1788_v1  ;;  %1883 = vrot.lane.b32.xlu1 %v4997_v41, %s3262_s15  ;;  %1875 = vrot.lane.b32.xlu0 %v4882_v13, %s3262_s15 }
 0x2e5   : > { %6816 = vst [vmem:[#allocation22_spill] sm:$0xff] %v5045_v48 }
 0x2e6   : > { %6817 = vst [vmem:[#allocation23_spill] sm:$0xff] %v5049_v61 }
 0x2e9   : > { %v1778_v38 = vpop.permute.xlu1 %1777 }
 0x2ea   : > { %v1776_v9 = vpop.permute.xlu0 %1775 }
 0x2eb   : > { %1879 = vrot.lane.b32.xlu2 %v4945_v43, %s3262_s15  ;;  %v5128_v10 = vsel %vm6818_vm3, %v1776_v9, %v4917_v42 }
 0x2ec   : > { %1889 = vrot.lane.b32.xlu1 %v5040_v22, %s3262_s15  ;;  %1881 = vrot.lane.b32.xlu0 %v4901_v11, %s3262_s15  ;;  %6828 = vst [vmem:[#allocation29_spill] sm:$0xff] %v5128_v10  ;;  %v1792_v6 = vsel %vm3485_vm5, %v5128_v10, %v4451_v25 }
 0x2ed   : > { %v5145_v2 = vsel %vm3498_vm8, %v4910_v28, %v1792_v6 }
 0x2ee   : > { %6829 = vst [vmem:[#allocation30_spill] sm:$0xff] %v5145_v2 }
 0x2f1   : > { %v5063_v31 = vpop.permute.xlu1 %1807 }
 0x2f2   : > { %v1806_v19 = vpop.permute.xlu0 %1805 }
 0x2f3   : > { %1885 = vrot.lane.b32.xlu2 %v4987_v34, %s3262_s15 }
 0x2f4   : > { %1911 = vrot.lane.b32.xlu1 %v4945_v43, %s3263_s16  ;;  %1887 = vrot.lane.b32.xlu0 %v4949_v62, %s3262_s15 }
 0x2f9   : > { %v1814_v4 = vpop.permute.xlu1 %1813 }
 0x2fa   : > { %v5077_v18 = vsel %vm6820_vm6, %v1806_v19, %v1814_v4  ;;  %v5081_v54 = vsel %vm6822_vm9, %v1814_v4, %v1806_v19  ;;  %v1812_v51 = vpop.permute.xlu0 %1811  ;;  %vm6830_vm6 = vmmov %vm6818_vm3 }
 0x2fb   : > { %6821 = vst [vmem:[#allocation25_spill] sm:$0xff] %v5077_v18  ;;  %v5093_v46 = vsel %vm6824_vm12, %v1804_v0, %v1812_v51  ;;  %v5097_v24 = vsel %vm6826_vm10, %v1812_v51, %v1804_v0  ;;  %1907 = vrot.lane.b32.xlu2 %v4882_v13, %s3263_s16  ;;  %v5152_v1 = vsel %vm6830_vm6, %v5016_v26, %v1778_v38  ;;  %vm6832_vm9 = vmmov %vm6818_vm3 }
 0x2fc   : > { %6823 = vst [vmem:[#allocation26_spill] sm:$0xff] %v5081_v54  ;;  %1921 = vrot.lane.b32.xlu1 %v5040_v22, %s3263_s16  ;;  %v5111_v53 = vpop.f32.mrf.mxu2  ;;  %1909 = vrot.lane.b32.xlu0 %v4953_v57, %s3263_s16  ;;  %v5159_v4 = vsel %vm6832_vm9, %v4917_v42, %v1776_v9  ;;  %v1793_v0 = vsel %vm3481_vm4, %v5152_v1, %v4463_v33  ;;  %v5183_v9 = vpop.permute.xlu2 %1809  ;;  %vm6835_vm12 = vmmov %vm6818_vm3 }
 0x2fd   : > { %6825 = vst [vmem:[#allocation27_spill] sm:$0xff] %v5093_v46  ;;  %v5115_v55 = vpop.f32.mrf.mxu3  ;;  %v1791_v51 = vsel %vm3481_vm4, %v5159_v4, %v4427_v30  ;;  %vm6853_vm3 = vmmov %vm6826_vm10 }
 0x2fe   : > { %6827 = vst [vmem:[#allocation28_spill] sm:$0xff] %v5097_v24  ;;  %v5179_v42 = vsel %vm3494_vm7, %v4915_v60, %v1791_v51  ;;  %vm6856_vm6 = vmmov %vm6853_vm3 }
 0x2ff   : > { %6831 = vst [vmem:[#allocation31_spill] sm:$0xff] %v5152_v1  ;;  %vm6857_vm9 = vmmov %vm6853_vm3 }
 0x300   : > { %6834 = vst [vmem:[#allocation33_spill] sm:$0xff] %v5179_v42 }
 0x303   : > { %1913 = vrot.lane.b32.xlu2 %v4901_v11, %s3263_s16 }
 0x304   : > { %1959 = vrot.lane.b32.xlu1 %v4949_v62, %s3264_s17  ;;  %v1422_v20 = vpop.f32.mrf.mxu2  ;;  %1919 = vrot.lane.b32.xlu0 %v4949_v62, %s3263_s16 }
 0x305   : > { %v1435_v36 = vpop.f32.mrf.mxu3  ;;  %v5174_v20 = vsel %vm3494_vm7, %v4889_v14, %v1793_v0  ;;  %v5192_v14 = vsel %vm6835_vm12, %v1778_v38, %v5016_v26  ;;  %vm6862_vm12 = vcmp.lt.s32.totalorder %v3477_v37, 127 }
 0x306   : > { %6833 = vst [vmem:[#allocation32_spill] sm:$0xff] %v5174_v20  ;;  %v1794_v6 = vsel %vm3485_vm5, %v5192_v14, %v4487_v3 }
 0x307   : > { %v6913_v49 = vld [vmem:[#allocation33_spill] sm:$0xff] }
 0x30b   : > { %1951 = vrot.lane.b32.xlu2 %v4945_v43, %s3264_s17 }
 0x30c   : > { %1917 = vrot.lane.b32.xlu1 %v4987_v34, %s3263_s16  ;;  %v5132_v58 = vpop.f32.mrf.mxu2  ;;  %1953 = vrot.lane.b32.xlu0 %v4901_v11, %s3264_s17 }
 0x30d   : > { %v5136_v12 = vpop.f32.mrf.mxu3  ;;  %v1667_v17 = vmax.f32 %v5111_v53, %v5132_v58 }
 0x313   : > { %1961 = vrot.lane.b32.xlu2 %v5040_v22, %s3264_s17 }
 0x314   : > { %2109 = vrot.lane.b32.xlu1 %v5145_v2, %s3261_s14  ;;  %v1448_v19 = vpop.f32.mrf.mxu2  ;;  %1915 = vrot.lane.b32.xlu0 %v4997_v41, %s3263_s16 }
 0x315   : > { %v1461_v28 = vpop.f32.mrf.mxu3  ;;  %v5205_v19 = vsel %vm3498_vm8, %v5012_v32, %v1794_v6 }
 0x316   : > { %6836 = vst [vmem:[#allocation34_spill] sm:$0xff] %v5205_v19  ;;  %v5213_v28 = vpop.permute.xlu2 %1815 }
 0x31b   : > { %2101 = vrot.lane.b32.xlu2 %v5179_v42, %s3261_s14 }
 0x31c   : > { %2135 = vrot.lane.b32.xlu1 %v5174_v20, %s3262_s15  ;;  %v5187_v36 = vpop.f32.mrf.mxu2  ;;  %2103 = vrot.lane.b32.xlu0 %v5174_v20, %s3261_s14 }
 0x31d   : > { %v5196_v60 = vpop.f32.mrf.mxu3  ;;  %v1671_v18 = vmax.f32 %v1667_v17, %v5187_v36 }
 0x323   : > { %2111 = vrot.lane.b32.xlu2 %v5205_v19, %s3261_s14 }
 0x324   : > { %1947 = vrot.lane.b32.xlu1 %v4882_v13, %s3264_s17  ;;  %v1474_v26 = vpop.f32.mrf.mxu2  ;;  %2133 = vrot.lane.b32.xlu0 %v5179_v42, %s3262_s15 }
 0x325   : > { %v1487_v38 = vpop.f32.mrf.mxu3  ;;  %v5225_v6 = vpop.f32.mrf.mxu0 }
 0x326   : > { %6839 = vst [vmem:[#allocation37_spill] sm:$0xff] %v5225_v6  ;;  %v5227_v26 = vpop.f32.mrf.mxu1 }
 0x327   : > { %6840 = vst [vmem:[#allocation38_spill] sm:$0xff] %v5227_v26 }
 0x32b   : > { %2141 = vrot.lane.b32.xlu2 %v5145_v2, %s3262_s15 }
 0x32c   : > { %1957 = vrot.lane.b32.xlu1 %v4987_v34, %s3264_s17  ;;  %v5219_v32 = vpop.f32.mrf.mxu2  ;;  %2143 = vrot.lane.b32.xlu0 %v5205_v19, %s3262_s15 }
 0x32d   : > { %6837 = vst [vmem:[#allocation35_spill] sm:$0xff] %v5219_v32  ;;  %v5223_v0 = vpop.f32.mrf.mxu3  ;;  %v1846_v51 = vpop.permute.xlu2 %1845  ;;  %v1675_v10 = vmax.f32 %v1671_v18, %v5219_v32 }
 0x32e   : > { %6838 = vst [vmem:[#allocation36_spill] sm:$0xff] %v5223_v0  ;;  %v1591_v46 = vpop.f32.mrf.mxu1 }
 0x32f   : > { %v5262_v46 = vpop.permute.xlu0 %1817 }
 0x333   : > { %1949 = vrot.lane.b32.xlu2 %v4953_v57, %s3264_s17 }
 0x334   : > { %2173 = vrot.lane.b32.xlu1 %v5145_v2, %s3263_s16  ;;  %v1500_v38 = vpop.f32.mrf.mxu2  ;;  %1955 = vrot.lane.b32.xlu0 %v4997_v41, %s3264_s17 }
 0x335   : > { %v1513_v39 = vpop.f32.mrf.mxu3  ;;  %v1852_v59 = vpop.permute.xlu2 %1851 }
 0x336   : > { %v1844_v23 = vpop.permute.xlu1 %1843  ;;  %v1578_v38 = vpop.f32.mrf.mxu0  ;;  %v5250_v39 = vsel %vm3494_vm7, %v4922_v16, %v1789_v63 }
 0x337   : > { %v5241_v56 = vsel %vm617_vm13, %v1844_v23, %v1852_v59  ;;  %v5245_v40 = vsel %vm617_vm13, %v1852_v59, %v1844_v23  ;;  %6843 = vst [vmem:[#allocation41_spill] sm:$0xff] %v5250_v39 }
 0x338   : > { %6841 = vst [vmem:[#allocation39_spill] sm:$0xff] %v5241_v56 }
 0x339   : > { %6842 = vst [vmem:[#allocation40_spill] sm:$0xff] %v5245_v40 }
 0x33b   : > { %2165 = vrot.lane.b32.xlu2 %v5179_v42, %s3263_s16 }
 0x33c   : > { %2099 = vrot.lane.b32.xlu1 %v5250_v39, %s3261_s14  ;;  %v5256_v15 = vpop.f32.mrf.mxu2  ;;  %2167 = vrot.lane.b32.xlu0 %v5174_v20, %s3263_s16  ;;  %v5274_v24 = vpop.f32.mrf.mxu1 }
 0x33d   : > { %6844 = vst [vmem:[#allocation42_spill] sm:$0xff] %v5256_v15  ;;  %v5260_v59 = vpop.f32.mrf.mxu3  ;;  %v1858_v38 = vpop.permute.xlu2 %1857 }
 0x33e   : > { %6845 = vst [vmem:[#allocation43_spill] sm:$0xff] %v5260_v59  ;;  %v1850_v23 = vpop.permute.xlu1 %1849  ;;  %v5272_v21 = vpop.f32.mrf.mxu0 }
 0x33f   : > { %v5266_v16 = vsel %vm617_vm13, %v1850_v23, %v1858_v38  ;;  %v5270_v63 = vsel %vm617_vm13, %v1858_v38, %v1850_v23  ;;  %6846 = vst [vmem:[#allocation44_spill] sm:$0xff] %v5272_v21  ;;  %v1668_v38 = vmax.f32 %v5115_v55, %v5136_v12 }
 0x340   : > { %6847 = vst [vmem:[#allocation45_spill] sm:$0xff] %v5274_v24 }
 0x343   : > { %2175 = vrot.lane.b32.xlu2 %v5205_v19, %s3263_s16 }
 0x344   : > { %2205 = vrot.lane.b32.xlu1 %v5179_v42, %s3264_s17  ;;  %v1526_v35 = vpop.f32.mrf.mxu2  ;;  %2097 = vrot.lane.b32.xlu0 %v5045_v48, %s3261_s14  ;;  %v1643_v25 = vpop.f32.mrf.mxu1 }
 0x345   : > { %v1539_v54 = vpop.f32.mrf.mxu3  ;;  %v5286_v52 = vpop.permute.xlu2 %1879 }
 0x346   : > { %v1856_v23 = vpop.permute.xlu1 %1855  ;;  %v1848_v29 = vpop.permute.xlu0 %1847  ;;  %v1672_v54 = vmax.f32 %v1668_v38, %v5196_v60 }
 0x347   : > { %v5290_v42 = vsel %vm617_vm13, %v1848_v29, %v1856_v23  ;;  %v5294_v35 = vsel %vm617_vm13, %v1856_v23, %v1848_v29  ;;  %v1630_v33 = vpop.f32.mrf.mxu0 }
 0x348   : > { %v1676_v33 = vmax.f32 %v1672_v54, %v5223_v0 }
 0x34b   : > { %2105 = vrot.lane.b32.xlu2 %v5049_v61, %s3261_s14 }
 0x34c   : > { %2215 = vrot.lane.b32.xlu1 %v5205_v19, %s3264_s17  ;;  %v5302_v1 = vpop.f32.mrf.mxu2  ;;  %2107 = vrot.lane.b32.xlu0 %v5001_v47, %s3261_s14 }
 0x34d   : > { %6848 = vst [vmem:[#allocation46_spill] sm:$0xff] %v5302_v1  ;;  %v5307_v29 = vpop.f32.mrf.mxu3  ;;  %v1886_v23 = vpop.permute.xlu2 %1885 }
 0x34e   : > { %6849 = vst [vmem:[#allocation47_spill] sm:$0xff] %v5307_v29  ;;  %v1878_v17 = vpop.permute.xlu1 %1877  ;;  %v1854_v25 = vpop.permute.xlu0 %1853 }
 0x34f   : > { %v1892_v38 = vsel %vm655_vm14, %v1878_v17, %v1886_v23  ;;  %v1896_v19 = vsel %vm655_vm14, %v1886_v23, %v1878_v17  ;;  %v5316_v50 = vsel %vm617_vm13, %v1846_v51, %v1854_v25  ;;  %v5320_v18 = vsel %vm617_vm13, %v1854_v25, %v1846_v51 }
 0x350   : > { %6850 = vst [vmem:[#allocation48_spill] sm:$0xff] %v5316_v50  ;;  %v1869_v54 = vsel %vm3776_vm15, %v4953_v57, %v5320_v18  ;;  %v1870_v0 = vsel %vm3780_vm1, %v4987_v34, %v5316_v50  ;;  %v1679_v17 = vmax.f32 %v1675_v10, %v5256_v15  ;;  %v1680_v25 = vmax.f32 %v1676_v33, %v5260_v59 }
 0x351   : > { %v5333_v23 = vsel %vm3788_vm2, %v1896_v19, %v1869_v54  ;;  %v5337_v51 = vsel %vm3792_vm11, %v1892_v38, %v1870_v0  ;;  %v1867_v33 = vsel %vm3776_vm15, %v4882_v13, %v5245_v40  ;;  %v1822_v15 = vsel %vm6857_vm9, %v5183_v9, %v5262_v46  ;;  %v6864_v40 = vld [vmem:[#allocation16_spill] sm:$0xff] }
 0x352   : > { %v1683_v50 = vmax.f32 %v1679_v17, %v5302_v1  ;;  %v1684_v54 = vmax.f32 %v1680_v25, %v5307_v29  ;;  %v1821_v29 = vsel %vm6826_vm10, %v5063_v31, %v5213_v28  ;;  %vm6863_vm10 = vmmov %vm6862_vm12 }
 0x353   : > { %2207 = vrot.lane.b32.xlu2 %v5174_v20, %s3264_s17 }
 0x354   : > { %2137 = vrot.lane.b32.xlu1 %v5049_v61, %s3262_s15  ;;  %v1552_v32 = vpop.f32.mrf.mxu2  ;;  %2213 = vrot.lane.b32.xlu0 %v5145_v2, %s3264_s17  ;;  %v1687_v1 = vmax.f32 %v1683_v50, %v5225_v6  ;;  %v1688_v2 = vmax.f32 %v1684_v54, %v5227_v26 }
 0x355   : > { %v1565_v10 = vpop.f32.mrf.mxu3  ;;  %v5348_v0 = vpop.permute.xlu2 %1907  ;;  %v1868_v32 = vsel %vm3780_vm1, %v4997_v41, %v5241_v56  ;;  %v6866_v41 = vld [vmem:[#allocation17_spill] sm:$0xff] }
 0x356   : > { %v1884_v19 = vpop.permute.xlu1 %1883  ;;  %v1876_v38 = vpop.permute.xlu0 %1875 }
 0x357   : > { %v1891_v17 = vsel %vm655_vm14, %v1876_v38, %v1884_v19  ;;  %v1895_v25 = vsel %vm655_vm14, %v1884_v19, %v1876_v38  ;;  %v1831_v19 = vsel %vm3481_vm4, %v1821_v29, %v5159_v4  ;;  %v1873_v29 = vsel %vm3776_vm15, %v4901_v11, %v5270_v63 }
 0x358   : > { %v5364_v10 = vsel %vm3788_vm2, %v1895_v25, %v1867_v33  ;;  %v5368_v20 = vsel %vm3792_vm11, %v1891_v17, %v1868_v32  ;;  %v5397_v4 = vsel %vm3494_vm7, %v4427_v30, %v1831_v19 }
 0x35b   : > { %2129 = vrot.lane.b32.xlu2 %v5045_v48, %s3262_s15 }
 0x35c   : > { %2163 = vrot.lane.b32.xlu1 %v5250_v39, %s3263_s16  ;;  %v5383_v38 = vpop.f32.mrf.mxu2  ;;  %2131 = vrot.lane.b32.xlu0 %v5250_v39, %s3262_s15 }
 0x35d   : > { %6851 = vst [vmem:[#allocation49_spill] sm:$0xff] %v5383_v38  ;;  %v1691_v33 = vmax.f32 %v1687_v1, %v5383_v38  ;;  %v5388_v50 = vpop.f32.mrf.mxu3  ;;  %v5392_v17 = vpop.permute.xlu2 %1913 }
 0x35e   : > { %6852 = vst [vmem:[#allocation50_spill] sm:$0xff] %v5388_v50  ;;  %v1890_v54 = vpop.permute.xlu1 %1889  ;;  %v1692_v32 = vmax.f32 %v1688_v2, %v5388_v50  ;;  %v1882_v25 = vpop.permute.xlu0 %1881  ;;  %v1874_v2 = vsel %vm3780_vm1, %v5040_v22, %v5266_v16 }
 0x35f   : > { %v5404_v1 = vmax.f32 %v1691_v33, %v5272_v21  ;;  %v1894_v50 = vsel %vm655_vm14, %v1882_v25, %v1890_v54  ;;  %v1898_v30 = vsel %vm655_vm14, %v1890_v54, %v1882_v25 }
 0x360   : > { %v5420_v19 = vmax.f32 %v1692_v32, %v5274_v24  ;;  %v5424_v33 = vsel %vm3788_vm2, %v1898_v30, %v1873_v29  ;;  %v5428_v38 = vsel %vm3792_vm11, %v1894_v50, %v1874_v2  ;;  %v1826_v50 = vsel %vm6853_vm3, %v5262_v46, %v5183_v9  ;;  %v1697_v2 = vld [vmem:[%s5417_s19] sm:$0xff]  ;;  %vm6868_vm3 = vmmov %vm6863_vm10 }
 0x361   : > { %v1987_v25 = vsub.f32 %v5111_v53, %v5404_v1  ;;  %v2025_v29 = vsub.f32 %v5132_v58, %v5404_v1  ;;  %v2061_v26 = vsub.f32 %v5187_v36, %v5404_v1  ;;  %v5462_v36 = vunpack.c.l.bf16 %v1697_v2  ;;  %v6861_v46 = vld [vmem:[#allocation31_spill] sm:$0xff]  ;;  %vm6870_vm9 = vmmov %vm6868_vm3 }
 0x362   : > { %v1988_v32 = vsub.f32 %v5115_v55, %v5420_v19  ;;  %v2026_v30 = vsub.f32 %v5136_v12, %v5420_v19  ;;  %v2062_v58 = vsub.f32 %v5196_v60, %v5420_v19  ;;  %v5464_v21 = vunpack.c.h.bf16 %v1697_v2 }
 0x363   : > { %v1989_v53 = vmul.f32 1.442695, %v1987_v25  ;;  %2139 = vrot.lane.b32.xlu2 %v5001_v47, %s3262_s15  ;;  %v2027_v24 = vmul.f32 1.442695, %v2025_v29  ;;  %v1834_v25 = vsel %vm3485_vm5, %v1826_v50, %v5192_v14  ;;  %6854 = vst [vmem:[#allocation51_spill] sm:$0xff] %v5462_v36  ;;  %v1871_v60 = vsel %vm3776_vm15, %v4945_v43, %v5294_v35 }
 0x364   : > { %2353 = vrot.lane.b32.xlu1 %v5397_v4, %s3261_s14  ;;  %v1991_v55 = vmul.f32 1.442695, %v1988_v32  ;;  %v1604_v12 = vpop.f32.mrf.mxu2  ;;  %2161 = vrot.lane.b32.xlu0 %v5045_v48, %s3263_s16  ;;  %6855 = vst [vmem:[#allocation52_spill] sm:$0xff] %v5464_v21  ;;  %v2029_v59 = vmul.f32 1.442695, %v2026_v30 }
 0x365   : > { %v1617_v6 = vpop.f32.mrf.mxu3  ;;  %v5466_v32 = vpop.permute.xlu2 %1951  ;;  %3152 = vpow2.f32 %v1989_v53  ;;  %v2063_v14 = vmul.f32 1.442695, %v2061_v26  ;;  %v2065_v2 = vmul.f32 1.442695, %v2062_v58  ;;  %v1825_v12 = vsel %vm6856_vm6, %v5213_v28, %v5063_v31  ;;  %v6860_v28 = vld [vmem:[#allocation29_spill] sm:$0xff]  ;;  %vm6869_vm6 = vmmov %vm6868_vm3 }
 0x366   : > { %v5457_v54 = vpop.permute.xlu1 %1911  ;;  %v1872_v6 = vsel %vm3780_vm1, %v4949_v62, %v5290_v42  ;;  %v1888_v29 = vpop.permute.xlu0 %1887  ;;  %3154 = vpow2.f32 %v1991_v55  ;;  %v5497_v55 = vsel %vm3498_vm8, %v4487_v3, %v1834_v25  ;;  %v1995_v58 = vperm.slane %v5462_v36, 0 }
 0x367   : > { %v1893_v50 = vsel %vm655_vm14, %v5286_v52, %v1888_v29  ;;  %v1897_v30 = vsel %vm655_vm14, %v1888_v29, %v5286_v52  ;;  %3156 = vpow2.f32 %v2027_v24  ;;  %6859 = vst [vmem:[#allocation11_spill] sm:$0xff] %v5497_v55  ;;  %v1996_v31 = vperm.slane %v5464_v21, 0 }
 0x368   : > { %v1903_v53 = vsel %vm3788_vm2, %v1897_v30, %v1871_v60  ;;  %v1904_v26 = vsel %vm3792_vm11, %v1893_v50, %v1872_v6  ;;  %3158 = vpow2.f32 %v2029_v59  ;;  %v2031_v24 = vperm.slane %v5462_v36, 1 }
 0x369   : > { %3160 = vpow2.f32 %v2063_v14  ;;  %v1832_v3 = vsel %vm3485_vm5, %v1825_v12, %v6860_v28  ;;  %v1833_v59 = vsel %vm3481_vm4, %v1822_v15, %v6861_v46  ;;  %v2032_v25 = vperm.slane %v5464_v21, 1 }
 0x36a   : > { %3162 = vpow2.f32 %v2065_v2  ;;  %v2067_v30 = vperm.slane %v5462_v36, 2  ;;  %v5567_v13 = vsel %vm3494_vm7, %v6866_v41, %v1833_v59 }
 0x36b   : > { %2169 = vrot.lane.b32.xlu2 %v5049_v61, %s3263_s16  ;;  %v3153_v9 = vpop.eup %3152  ;;  %6867 = vst [vmem:[#allocation31_spill] sm:$0xff] %v5567_v13 }
 0x36c   : > { %2363 = vrot.lane.b32.xlu1 %v5497_v55, %s3261_s14  ;;  %2171 = vrot.lane.b32.xlu0 %v5001_v47, %s3263_s16  ;;  %v3155_v6 = vpop.eup %3154  ;;  %v5515_v29 = vmul.f32 %v3153_v9, %v1995_v58 }
 0x36d   : > { %v5527_v15 = vpop.permute.xlu2 %1961  ;;  %v3157_v2 = vpop.eup %3156  ;;  %v5530_v12 = vmul.f32 %v3155_v6, %v1996_v31 }
 0x36e   : > { %v1922_v60 = vpop.permute.xlu1 %1921  ;;  %v5540_v28 = vpop.permute.xlu0 %1909  ;;  %v2007_v31 = vperm.slane %v5515_v29, 3  ;;  %v5545_v6 = vmul.f32 %v3157_v2, %v2031_v24  ;;  %v5560_v24 = vsel %vm3498_vm8, %v6864_v40, %v1832_v3 }
 0x36f   : > { %v5520_v14 = vsel %vm6862_vm12, %v5392_v17, %v1922_v60  ;;  %v5525_v50 = vsel %vm6863_vm10, %v1922_v60, %v5392_v17  ;;  %v2068_v17 = vperm.slane %v5464_v21, 2  ;;  %v3159_v46 = vpop.eup %3158  ;;  %v2005_v60 = vperm.slane %v5515_v29, 2  ;;  %6865 = vst [vmem:[#allocation29_spill] sm:$0xff] %v5560_v24  ;;  %vm6871_vm12 = vmmov %vm6868_vm3 }
 0x370   : > { %v1937_v58 = vsel %vm3776_vm15, %v5520_v14, %v4901_v11  ;;  %v1938_v9 = vsel %vm3780_vm1, %v5525_v50, %v5040_v22  ;;  %v3161_v44 = vpop.eup %3160  ;;  %v2006_v36 = vperm.slane %v5530_v12, 2  ;;  %v2008_v21 = vperm.slane %v5530_v12, 3  ;;  %vm6875_vm10 = vmmov %vm6868_vm3 }
 0x371   : > { %v1945_v45 = vsel %vm3788_vm2, %v5270_v63, %v1937_v58  ;;  %v1946_v47 = vsel %vm3792_vm11, %v5266_v16, %v1938_v9  ;;  %v5555_v61 = vmul.f32 %v3159_v46, %v2032_v25  ;;  %v3163_v56 = vpop.eup %3162  ;;  %v2013_v2 = vmul.f32 %v2005_v60, %v1903_v53 }
 0x372   : > { %v2043_v63 = vperm.slane %v5545_v6, 3  ;;  %v2015_v58 = vmul.f32 %v2007_v31, %v5424_v33  ;;  %v2014_v16 = vmul.f32 %v2006_v36, %v1904_v26  ;;  %v2016_v25 = vmul.f32 %v2008_v21, %v5428_v38 }
 0x373   : > { %v2044_v9 = vperm.slane %v5555_v61, 3  ;;  %2355 = vrot.lane.b32.xlu2 %v5567_v13, %s3261_s14  ;;  %v5575_v53 = vmul.f32 %v3161_v44, %v2067_v30  ;;  %v2041_v36 = vperm.slane %v5545_v6, 2  ;;  %v5580_v26 = vmul.f32 %v3163_v56, %v2068_v17 }
 0x374   : > { %2393 = vrot.lane.b32.xlu1 %v5560_v24, %s3262_s15  ;;  %v2051_v40 = vmul.f32 %v2043_v63, %v1945_v45  ;;  %2361 = vrot.lane.b32.xlu0 %v5560_v24, %s3261_s14  ;;  %v2003_v21 = vperm.slane %v5515_v29, 1  ;;  %v2042_v3 = vperm.slane %v5555_v61, 2  ;;  %v2004_v31 = vperm.slane %v5530_v12, 1 }
 0x375   : > { %v2052_v33 = vmul.f32 %v2044_v9, %v1946_v47  ;;  %v5591_v47 = vpop.permute.xlu2 %2101  ;;  %v2077_v56 = vperm.slane %v5575_v53, 2  ;;  %v2078_v17 = vperm.slane %v5580_v26, 2 }
 0x376   : > { %v1960_v41 = vpop.permute.xlu1 %1959  ;;  %v5583_v38 = vadd.f32 %v2051_v40, %v2015_v58  ;;  %v1920_v30 = vpop.permute.xlu0 %1919  ;;  %v2011_v46 = vmul.f32 %v2003_v21, %v5333_v23 }
 0x377   : > { %v1965_v45 = vsel %vm734_vm0, %v5466_v32, %v1960_v41  ;;  %v1969_v44 = vsel %vm734_vm0, %v1960_v41, %v5466_v32  ;;  %v5594_v59 = vadd.f32 %v2052_v33, %v2016_v25  ;;  %v1925_v60 = vsel %vm6868_vm3, %v5457_v54, %v1920_v30 }
 0x378   : > { %v1929_v32 = vsel %vm6869_vm6, %v1920_v30, %v5457_v54  ;;  %v1935_v63 = vsel %vm3776_vm15, %v1925_v60, %v4945_v43  ;;  %v1975_v23 = vsel %vm3776_vm15, %v1965_v45, %v1925_v60  ;;  %v2001_v30 = vperm.slane %v5515_v29, 0  ;;  %vm6950_vm6 = vmmov %vm6868_vm3 }
 0x379   : > { %v1936_v58 = vsel %vm3780_vm1, %v1929_v32, %v4949_v62  ;;  %v1976_v25 = vsel %vm3780_vm1, %v1969_v44, %v1929_v32  ;;  %v1943_v54 = vsel %vm3788_vm2, %v5294_v35, %v1935_v63  ;;  %v1983_v40 = vsel %vm3788_vm2, %v4945_v43, %v1975_v23 }
 0x37a   : > { %v1944_v9 = vsel %vm3792_vm11, %v5290_v42, %v1936_v58  ;;  %v1984_v33 = vsel %vm3792_vm11, %v4949_v62, %v1976_v25  ;;  %v2049_v41 = vmul.f32 %v2041_v36, %v1943_v54  ;;  %v2085_v45 = vmul.f32 %v2077_v56, %v1983_v40 }
 0x37b   : > { %v2050_v21 = vmul.f32 %v2042_v3, %v1944_v9  ;;  %v2086_v44 = vmul.f32 %v2078_v17, %v1984_v33  ;;  %2385 = vrot.lane.b32.xlu2 %v5397_v4, %s3262_s15  ;;  %v2039_v42 = vperm.slane %v5545_v6, 1  ;;  %v2012_v35 = vmul.f32 %v2004_v31, %v5337_v51 }
 0x37c   : > { %2203 = vrot.lane.b32.xlu1 %v5250_v39, %s3264_s17  ;;  %v2040_v43 = vperm.slane %v5555_v61, 1  ;;  %v2057_v60 = vadd.f32 %v2049_v41, %v2013_v2  ;;  %2387 = vrot.lane.b32.xlu0 %v5567_v13, %s3262_s15  ;;  %v2079_v3 = vperm.slane %v5575_v53, 3  ;;  %v2002_v56 = vperm.slane %v5530_v12, 0  ;;  %v6898_v39 = vld [vmem:[#allocation26_spill] sm:$0xff] }
 0x37d   : > { %v2058_v62 = vadd.f32 %v2050_v21, %v2014_v16  ;;  %v5650_v2 = vpop.permute.xlu2 %2111  ;;  %v2080_v16 = vperm.slane %v5580_v26, 3  ;;  %v2009_v32 = vmul.f32 %v2001_v30, %v5364_v10  ;;  %v6872_v10 = vld [vmem:[#allocation48_spill] sm:$0xff] }
 0x37e   : > { %v1918_v36 = vpop.permute.xlu1 %1917  ;;  %v1954_v58 = vpop.permute.xlu0 %1953  ;;  %v5663_v23 = vadd.f32 %v2085_v45, %v2057_v60 }
 0x37f   : > { %v5643_v17 = vsel %vm6870_vm9, %v5540_v28, %v1918_v36  ;;  %v5648_v51 = vsel %vm6871_vm12, %v1918_v36, %v5540_v28  ;;  %v2010_v28 = vmul.f32 %v2002_v56, %v5368_v20  ;;  %v1966_v9 = vsel %vm734_vm0, %v1954_v58, %v5527_v15  ;;  %vm6951_vm9 = vmmov %vm6868_vm3 }
 0x380   : > { %v1933_v31 = vsel %vm3776_vm15, %v5643_v17, %v4953_v57  ;;  %v1934_v63 = vsel %vm3780_vm1, %v5648_v51, %v4987_v34  ;;  %v1970_v40 = vsel %vm734_vm0, %v5527_v15, %v1954_v58  ;;  %v1977_v41 = vsel %vm3776_vm15, %v1966_v9, %v5520_v14  ;;  %v6873_v15 = vld [vmem:[#allocation35_spill] sm:$0xff]  ;;  %v6879_v9 = vld [vmem:[#allocation40_spill] sm:$0xff]  ;;  %vm6952_vm12 = vmmov %vm6868_vm3 }
 0x381   : > { %v1941_v25 = vsel %vm3788_vm2, %v5320_v18, %v1933_v31  ;;  %v1942_v54 = vsel %vm3792_vm11, %v6872_v10, %v1934_v63  ;;  %v1978_v18 = vsel %vm3780_vm1, %v1970_v40, %v5525_v50  ;;  %v1985_v21 = vsel %vm3788_vm2, %v4901_v11, %v1977_v41  ;;  %v6878_v10 = vld [vmem:[#allocation18_spill] sm:$0xff] }
 0x382   : > { %v2047_v33 = vmul.f32 %v2039_v42, %v1941_v25  ;;  %v2048_v20 = vmul.f32 %v2040_v43, %v1942_v54  ;;  %v1986_v45 = vsel %vm3792_vm11, %v5040_v22, %v1978_v18  ;;  %v2241_v42 = vsub.f32 %v6873_v15, %v5404_v1  ;;  %v6881_v18 = vld [vmem:[#allocation42_spill] sm:$0xff]  ;;  %v6883_v15 = vld [vmem:[#allocation23_spill] sm:$0xff] }
 0x383   : > { %v2087_v14 = vmul.f32 %v2079_v3, %v1985_v21  ;;  %v2088_v60 = vmul.f32 %v2080_v16, %v1986_v45  ;;  %2395 = vrot.lane.b32.xlu2 %v5497_v55, %s3262_s15  ;;  %v5699_v50 = vadd.f32 %v2086_v44, %v2058_v62  ;;  %v2037_v16 = vperm.slane %v5545_v6, 0  ;;  %v5754_v45 = vld [vmem:[%s5417_s19 + $0x8] sm:$0x11]  ;;  %s2722_s19 = scalar_lea.sflag [#allocation5], %s257_s20 }
 0x384   : > { %v5691_v43 = vadd.f32 %v2047_v33, %v2011_v46  ;;  %v5693_v30 = vadd.f32 %v2048_v20, %v2012_v35  ;;  %2417 = vrot.lane.b32.xlu1 %v5397_v4, %s3263_s16  ;;  %v2243_v11 = vmul.f32 1.442695, %v2241_v42  ;;  %2201 = vrot.lane.b32.xlu0 %v5045_v48, %s3264_s17  ;;  %v6874_v46 = vld [vmem:[#allocation36_spill] sm:$0xff]  ;;  %v2038_v31 = vperm.slane %v5555_v61, 0  ;;  %v6880_v33 = vld [vmem:[#allocation39_spill] sm:$0xff]  ;;  %6882 = vst [vmem:[#allocation17_spill] sm:$0xff] %v5754_v45 }
 0x385   : > { %v2242_v36 = vsub.f32 %v6874_v46, %v5420_v19  ;;  %v5706_v35 = vadd.f32 %v2087_v14, %v5583_v38  ;;  %v5718_v62 = vpop.permute.xlu2 %2141  ;;  %v5721_v56 = vadd.f32 %v2088_v60, %v5594_v59  ;;  %v6877_v59 = vld [vmem:[#allocation7_spill] sm:$0xff]  ;;  %v2277_v21 = vsub.f32 %v6881_v18, %v5404_v1 }
 0x386   : > { %v2110_v22 = vpop.permute.xlu1 %2109  ;;  %v1916_v38 = vpop.permute.xlu0 %1915  ;;  %3164 = vpow2.f32 %v2243_v11  ;;  %v6884_v42 = vld [vmem:[#allocation43_spill] sm:$0xff] }
 0x387   : > { %v5711_v3 = vsel %vm617_vm13, %v5591_v47, %v2110_v22  ;;  %v5716_v44 = vsel %vm617_vm13, %v2110_v22, %v5591_v47  ;;  %v2245_v63 = vmul.f32 1.442695, %v2242_v36  ;;  %v5728_v58 = vsel %vm6875_vm10, %v5348_v0, %v1916_v38  ;;  %v6887_v22 = vld [vmem:[#allocation19_spill] sm:$0xff]  ;;  %vm6953_vm10 = vmmov %vm6868_vm3 }
 0x388   : > { %v5733_v47 = vsel %vm6868_vm3, %v1916_v38, %v5348_v0  ;;  %v1931_v25 = vsel %vm3776_vm15, %v5728_v58, %v6877_v59  ;;  %v2278_v14 = vsub.f32 %v6884_v42, %v5420_v19 }
 0x389   : > { %6876 = vst [vmem:[#allocation16_spill] sm:$0xff] %v5733_v47  ;;  %v1932_v54 = vsel %vm3780_vm1, %v5733_v47, %v6878_v10  ;;  %3166 = vpow2.f32 %v2245_v63  ;;  %v1939_v40 = vsel %vm3788_vm2, %v6879_v9, %v1931_v25  ;;  %v6890_v25 = vld [vmem:[#allocation51_spill] sm:$0xff]  ;;  %v6891_v9 = vld [vmem:[#allocation52_spill] sm:$0xff] }
 0x38a   : > { %v1940_v0 = vsel %vm3792_vm11, %v6880_v33, %v1932_v54  ;;  %v2045_v20 = vmul.f32 %v2037_v16, %v1939_v40  ;;  %v6888_v16 = vld [vmem:[#allocation44_spill] sm:$0xff]  ;;  %v2247_v54 = vperm.slane %v6890_v25, 3  ;;  %v2248_v40 = vperm.slane %v6891_v9, 3 }
 0x38b   : > { %v2046_v41 = vmul.f32 %v2038_v31, %v1940_v0  ;;  %2209 = vrot.lane.b32.xlu2 %v6883_v15, %s3264_s17  ;;  %v6889_v38 = vsub.f32 %v6888_v16, %v5404_v1  ;;  %v2035_v33 = vadd.f32 %v5545_v6, %v5515_v29  ;;  %v2281_v16 = vmul.f32 1.442695, %v2278_v14  ;;  %v6894_v29 = vld [vmem:[#allocation24_spill] sm:$0xff] }
 0x38c   : > { %2427 = vrot.lane.b32.xlu1 %v5497_v55, %s3263_s16  ;;  %v5760_v60 = vadd.f32 %v2045_v20, %v2009_v32  ;;  %2211 = vrot.lane.b32.xlu0 %v6887_v22, %s3264_s17  ;;  %v3165_v36 = vpop.eup %3164  ;;  %v2279_v20 = vmul.f32 1.442695, %v2277_v21  ;;  %v6893_v22 = vld [vmem:[#allocation25_spill] sm:$0xff]  ;;  %v6896_v21 = vld [vmem:[#allocation14_spill] sm:$0xff]  ;;  %v6899_v15 = vld [vmem:[#allocation8_spill] sm:$0xff] }
 0x38d   : > { %v5762_v11 = vadd.f32 %v2046_v41, %v2010_v28  ;;  %v2567_v31 = vmul.f32 1.442695, %v6889_v38  ;;  %v5771_v63 = vpop.permute.xlu2 %1949  ;;  %v2571_v28 = vunpack.c.l.bf16 %v5754_v45  ;;  %v2036_v41 = vadd.f32 %v5555_v61, %v5530_v12  ;;  %v6901_v45 = vld [vmem:[#allocation15_spill] sm:$0xff]  ;;  %v6902_v14 = vld [vmem:[#allocation28_spill] sm:$0xff] }
 0x38e   : > { %6885 = vst [vmem:[#allocation48_spill] sm:$0xff] %v5760_v60  ;;  %v5766_v46 = vpop.permute.xlu1 %2135  ;;  %v2104_v0 = vpop.permute.xlu0 %2103  ;;  %v6895_v6 = vsel %vm3481_vm4, %v6893_v22, %v6894_v29  ;;  %v6900_v48 = vsel %vm3485_vm5, %v6898_v39, %v6899_v15  ;;  %v6905_v29 = vld [vmem:[#allocation13_spill] sm:$0xff]  ;;  %v6908_v39 = vld [vmem:[#allocation27_spill] sm:$0xff]  ;;  %v6911_v15 = vld [vmem:[#allocation12_spill] sm:$0xff]  ;;  %v2071_v52 = vadd.f32 %v5575_v53, %v2035_v33 }
 0x38f   : > { %6886 = vst [vmem:[#allocation35_spill] sm:$0xff] %v5762_v11  ;;  %v3167_v32 = vpop.eup %3166  ;;  %v5783_v18 = vsel %vm617_vm13, %v2104_v0, %v5650_v2  ;;  %v5788_v42 = vsel %vm617_vm13, %v5650_v2, %v2104_v0  ;;  %v5798_v61 = vsel %vm3494_vm7, %v6896_v21, %v6895_v6  ;;  %v5808_v2 = vsel %vm3498_vm8, %v6901_v45, %v6900_v48  ;;  %v6903_v0 = vld [vmem:[#allocation21_spill] sm:$0xff]  ;;  %v6909_v48 = vld [vmem:[#allocation20_spill] sm:$0xff] }
 0x390   : > { %v6904_v22 = vsel %vm3485_vm5, %v6902_v14, %v6903_v0  ;;  %3168 = vpow2.f32 %v2567_v31  ;;  %v5820_v21 = vmul.f32 %v3165_v36, %v2247_v54  ;;  %v5822_v11 = vmul.f32 %v3167_v32, %v2248_v40  ;;  %v6914_v32 = vld [vmem:[#allocation30_spill] sm:$0xff]  ;;  %vm6927_vm5 = vmmov %vm6868_vm3 }
 0x391   : > { %v5818_v6 = vsel %vm3498_vm8, %v6905_v29, %v6904_v22  ;;  %v6910_v45 = vsel %vm3481_vm4, %v6908_v39, %v6909_v48  ;;  %v5834_v14 = vperm.slane %v2571_v28, 0  ;;  %3170 = vpow2.f32 %v2279_v20  ;;  %v6915_v20 = vld [vmem:[#allocation46_spill] sm:$0xff]  ;;  %vm6926_vm4 = vmmov %vm6868_vm3 }
 0x392   : > { %6906 = vst [vmem:[#allocation36_spill] sm:$0xff] %v5818_v6  ;;  %v5832_v12 = vsel %vm3494_vm7, %v6911_v15, %v6910_v45  ;;  %v2072_v36 = vadd.f32 %v5580_v26, %v2036_v41  ;;  %3172 = vpow2.f32 %v2281_v16  ;;  %v2125_v40 = vsel %vm3776_vm15, %v6913_v49, %v5716_v44  ;;  %v6916_v16 = vld [vmem:[#allocation47_spill] sm:$0xff]  ;;  %vm6939_vm7 = vmmov %vm6868_vm3 }
 0x393   : > { %6907 = vst [vmem:[#allocation40_spill] sm:$0xff] %v5822_v11  ;;  %2419 = vrot.lane.b32.xlu2 %v5567_v13, %s3263_s16  ;;  %v2126_v28 = vsel %vm3780_vm1, %v6914_v32, %v5711_v3  ;;  %v2313_v41 = vsub.f32 %v6915_v20, %v5404_v1  ;;  %v2314_v38 = vsub.f32 %v6916_v16, %v5420_v19  ;;  %v2257_v22 = vperm.slane %v5820_v21, 2  ;;  %vm6940_vm8 = vmmov %vm6868_vm3 }
 0x394   : > { %6912 = vst [vmem:[#allocation39_spill] sm:$0xff] %v5834_v14  ;;  %2357 = vrot.lane.b32.xlu1 %v5818_v6, %s3261_s14  ;;  %2425 = vrot.lane.b32.xlu0 %v5560_v24, %s3263_s16  ;;  %v2258_v29 = vperm.slane %v5822_v11, 2  ;;  %v2283_v39 = vperm.slane %v6890_v25, 4  ;;  %v2284_v48 = vperm.slane %v6891_v9, 4  ;;  %v2251_v45 = vadd.f32 %v5820_v21, %v2071_v52  ;;  %v6918_v24 = vld [vmem:[#allocation37_spill] sm:$0xff] }
 0x395   : > { %v5860_v0 = vpop.permute.xlu2 %2165  ;;  %v2315_v31 = vmul.f32 1.442695, %v2313_v41  ;;  %v2317_v55 = vmul.f32 1.442695, %v2314_v38  ;;  %v2493_v52 = vsub.f32 %v6918_v24, %v5404_v1  ;;  %v2259_v20 = vperm.slane %v5820_v21, 3 }
 0x396   : > { %v5854_v33 = vpop.permute.xlu1 %1947  ;;  %v2134_v15 = vpop.permute.xlu0 %2133 }
 0x397   : > { %v5869_v6 = vpop.eup %3168  ;;  %v2147_v16 = vsel %vm655_vm14, %v2134_v15, %v5718_v62  ;;  %v2151_v60 = vsel %vm655_vm14, %v5718_v62, %v2134_v15  ;;  %3174 = vpow2.f32 %v2315_v31  ;;  %v2495_v47 = vmul.f32 1.442695, %v2493_v52  ;;  %v6919_v62 = vld [vmem:[#allocation38_spill] sm:$0xff]  ;;  %v6920_v15 = vld [vmem:[#allocation32_spill] sm:$0xff]  ;;  %v6922_v31 = vld [vmem:[#allocation49_spill] sm:$0xff] }
 0x398   : > { %6917 = vst [vmem:[#allocation42_spill] sm:$0xff] %v5869_v6  ;;  %v3171_v14 = vpop.eup %3170  ;;  %v2157_v54 = vsel %vm3788_vm2, %v2151_v60, %v2125_v40  ;;  %v2158_v41 = vsel %vm3792_vm11, %v2147_v16, %v2126_v28  ;;  %v2494_v38 = vsub.f32 %v6919_v62, %v5420_v19  ;;  %v2127_v24 = vsel %vm3776_vm15, %v6920_v15, %v5788_v42  ;;  %v6921_v60 = vld [vmem:[#allocation34_spill] sm:$0xff] }
 0x399   : > { %v3173_v6 = vpop.eup %3172  ;;  %v2265_v10 = vmul.f32 %v2257_v22, %v2157_v54  ;;  %v2266_v59 = vmul.f32 %v2258_v29, %v2158_v41  ;;  %v2128_v40 = vsel %vm3780_vm1, %v6921_v60, %v5783_v18  ;;  %v2529_v54 = vsub.f32 %v6922_v31, %v5404_v1  ;;  %v6923_v28 = vld [vmem:[#allocation50_spill] sm:$0xff] }
 0x39a   : > { %v2530_v22 = vsub.f32 %v6923_v28, %v5420_v19  ;;  %v2252_v29 = vadd.f32 %v5822_v11, %v2072_v36  ;;  %3176 = vpow2.f32 %v2317_v55  ;;  %v2260_v1 = vperm.slane %v5822_v11, 3 }
 0x39b   : > { %v5902_v16 = vadd.f32 %v2265_v10, %v5663_v23  ;;  %v5905_v52 = vadd.f32 %v2266_v59, %v5699_v50  ;;  %2349 = vrot.lane.b32.xlu2 %v5832_v12, %s3261_s14  ;;  %v5912_v62 = vmul.f32 %v3171_v14, %v2283_v39  ;;  %v5914_v31 = vmul.f32 %v3173_v6, %v2284_v48 }
 0x39c   : > { %2459 = vrot.lane.b32.xlu1 %v5567_v13, %s3264_s17  ;;  %2351 = vrot.lane.b32.xlu0 %v5798_v61, %s3261_s14  ;;  %3178 = vpow2.f32 %v2495_v47  ;;  %v2319_v59 = vperm.slane %v6890_v25, 5  ;;  %v2497_v10 = vmul.f32 1.442695, %v2494_v38  ;;  %v2320_v39 = vperm.slane %v6891_v9, 5 }
 0x39d   : > { %v5922_v55 = vpop.permute.xlu2 %2175  ;;  %v3175_v36 = vpop.eup %3174  ;;  %v2531_v48 = vmul.f32 1.442695, %v2529_v54  ;;  %v6924_v28 = vperm.slane %v5575_v53, 1  ;;  %v6925_v54 = vperm.slane %v5580_v26, 1  ;;  %v2287_v13 = vadd.f32 %v5912_v62, %v2251_v45 }
 0x39e   : > { %v1958_v41 = vpop.permute.xlu1 %1957  ;;  %v2144_v14 = vpop.permute.xlu0 %2143  ;;  %v5953_v11 = vmul.f32 %v3175_v36, %v2319_v59 }
 0x39f   : > { %v1964_v23 = vsel %vm734_vm0, %v5771_v63, %v1958_v41  ;;  %v1968_v50 = vsel %vm734_vm0, %v1958_v41, %v5771_v63  ;;  %3180 = vpow2.f32 %v2531_v48 }
 0x3a0   : > { %v1973_v6 = vsel %vm3776_vm15, %v1964_v23, %v5643_v17  ;;  %v1974_v47 = vsel %vm3780_vm1, %v1968_v50, %v5648_v51  ;;  %v2148_v17 = vsel %vm655_vm14, %v5766_v46, %v2144_v14  ;;  %v2152_v51 = vsel %vm655_vm14, %v2144_v14, %v5766_v46  ;;  %v3177_v50 = vpop.eup %3176 }
 0x3a1   : > { %v1981_v63 = vsel %vm3788_vm2, %v4953_v57, %v1973_v6  ;;  %v1982_v38 = vsel %vm3792_vm11, %v4987_v34, %v1974_v47  ;;  %v2159_v57 = vsel %vm3788_vm2, %v2152_v51, %v2127_v24  ;;  %v2160_v34 = vsel %vm3792_vm11, %v2148_v17, %v2128_v40 }
 0x3a2   : > { %v2083_v41 = vmul.f32 %v6924_v28, %v1981_v63  ;;  %v2084_v23 = vmul.f32 %v6925_v54, %v1982_v38  ;;  %v2267_v6 = vmul.f32 %v2259_v20, %v2159_v57  ;;  %v2268_v47 = vmul.f32 %v2260_v1, %v2160_v34  ;;  %v3179_v46 = vpop.eup %3178 }
 0x3a3   : > { %v2499_v24 = vperm.slane %v6890_v25, 6  ;;  %2359 = vrot.lane.b32.xlu2 %v5808_v2, %s3261_s14  ;;  %v2293_v40 = vperm.slane %v5912_v62, 2  ;;  %3182 = vpow2.f32 %v2497_v10  ;;  %v2294_v1 = vperm.slane %v5914_v31, 2  ;;  %s3206_s14 = sshra.s32 %s2737_s10, 4  ;;  %s3207_s14 = int_to_ptr.hbm [resolvable:$true] %s3206_s14 }
 0x3a4   : > { %2381 = vrot.lane.b32.xlu1 %v5832_v12, %s3262_s15  ;;  %v5958_v14 = vadd.f32 %v2083_v41, %v5691_v43  ;;  %v5961_v63 = vadd.f32 %v2084_v23, %v5693_v30  ;;  %v5965_v20 = vadd.f32 %v2267_v6, %v5706_v35  ;;  %v5968_v45 = vadd.f32 %v2268_v47, %v5721_v56  ;;  %v6930_v47 = vld [vmem:[#allocation18_spill] sm:$0xff]  ;;  %s3208_s25 = scalar_lea.hbm %s3207_s14, 64  ;;  %p3213_p0 = scmp.lt.s32.totalorder %s3207_s14, %s6686_s6 }
 0x3a5   : > { %2457 = vrot.lane.b32.xlu0 %v5397_v4, %s3264_s17  ;;  %v2288_v30 = vadd.f32 %v5914_v31, %v2252_v29  ;;  %v5977_v59 = vmul.f32 %v3177_v50, %v2320_v39  ;;  %v2533_v35 = vmul.f32 1.442695, %v2530_v22  ;;  %v5989_v36 = vpop.permute.xlu2 %2105  ;;  %v2323_v48 = vadd.f32 %v5953_v11, %v2287_v13  ;;  %v3181_v54 = vpop.eup %3180  ;;  %v6929_v50 = vld [vmem:[#allocation7_spill] sm:$0xff]  ;;  %p3209_p11 = scmp.ne.s32.totalorder %s3207_s14, %s3208_s25 }
 0x3a6   : > { %v2174_v43 = vpop.permute.xlu1 %2173  ;;  %v5992_v29 = vmul.f32 %v3179_v46, %v2499_v24  ;;  %v1956_v38 = vpop.permute.xlu0 %1955  ;;  %v2535_v17 = vperm.slane %v6890_v25, 7 }
 0x3a7   : > { %v5982_v56 = vsel %vm6926_vm4, %v5860_v0, %v2174_v43  ;;  %v5987_v10 = vsel %vm6927_vm5, %v2174_v43, %v5860_v0  ;;  %v2500_v0 = vperm.slane %v6891_v9, 6  ;;  %v1963_v28 = vsel %vm734_vm0, %v5854_v33, %v1956_v38  ;;  %vm6955_vm4 = vmmov %vm6868_vm3  ;;  %p3210_p12 = pnand %p3209_p11, %p3339_p5 }
 0x3a8   : > { %v2189_v22 = vsel %vm3776_vm15, %v5982_v56, %v6913_v49  ;;  %v2190_v39 = vsel %vm3780_vm1, %v5987_v10, %v6914_v32  ;;  %v1967_v41 = vsel %vm734_vm0, %v1956_v38, %v5854_v33  ;;  %v1971_v25 = vsel %vm3776_vm15, %v1963_v28, %v5728_v58  ;;  %v6934_v38 = vld [vmem:[#allocation42_spill] sm:$0xff]  ;;  %vm6956_vm5 = vmmov %vm6868_vm3 }
 0x3a9   : > { %v2197_v13 = vsel %vm3788_vm2, %v5716_v44, %v2189_v22  ;;  %v2198_v51 = vsel %vm3792_vm11, %v5711_v3, %v2190_v39  ;;  %v6928_v44 = vld [vmem:[#allocation16_spill] sm:$0xff]  ;;  %v3183_v3 = vpop.eup %3182  ;;  %v1979_v6 = vsel %vm3788_vm2, %v6929_v50, %v1971_v25  ;;  %v2503_v46 = vadd.f32 %v5992_v29, %v2323_v48  ;;  %v6933_v39 = vld [vmem:[#allocation39_spill] sm:$0xff]  ;;  %v6935_v48 = vld [vmem:[#allocation29_spill] sm:$0xff]  ;;  %p3211_p13 = pneg %p3210_p12 }
 0x3aa   : > { %v2301_v23 = vmul.f32 %v2293_v40, %v2197_v13  ;;  %v2302_v57 = vmul.f32 %v2294_v1, %v2198_v51  ;;  %v1972_v34 = vsel %vm3780_vm1, %v1967_v41, %v6928_v44  ;;  %v6931_v40 = vperm.slane %v5575_v53, 0  ;;  %v6937_v51 = vld [vmem:[#allocation48_spill] sm:$0xff]  ;;  %v6938_v41 = vld [vmem:[#allocation35_spill] sm:$0xff] }
 0x3ab   : > { %v1980_v33 = vsel %vm3792_vm11, %v6930_v47, %v1972_v34  ;;  %v6932_v1 = vperm.slane %v5580_v26, 0  ;;  %v6043_v13 = vmul.f32 %v6934_v38, %v6933_v39  ;;  %2465 = vrot.lane.b32.xlu2 %v6935_v48, %s3264_s17  ;;  %3184 = vpow2.f32 %v2533_v35 }
 0x3ac   : > { %v6030_v24 = vadd.f32 %v2301_v23, %v5902_v16  ;;  %v6033_v58 = vadd.f32 %v2302_v57, %v5905_v52  ;;  %v2081_v43 = vmul.f32 %v6931_v40, %v1979_v6  ;;  %2391 = vrot.lane.b32.xlu1 %v5808_v2, %s3262_s15  ;;  %v6047_v16 = vmul.f32 %v3181_v54, %v2535_v17  ;;  %v6936_v52 = vld [vmem:[#allocation11_spill] sm:$0xff] }
 0x3ad   : > { %v2082_v22 = vmul.f32 %v6932_v1, %v1980_v33  ;;  %2467 = vrot.lane.b32.xlu0 %v6936_v52, %s3264_s17  ;;  %v2324_v26 = vadd.f32 %v5977_v59, %v2288_v30  ;;  %v6058_v57 = vmul.f32 %v3183_v3, %v2500_v0  ;;  %v2208_v25 = vpop.permute.xlu2 %2207  ;;  %v2295_v17 = vperm.slane %v5912_v62, 3  ;;  %v6941_v3 = vld [vmem:[#allocation45_spill] sm:$0xff] }
 0x3ae   : > { %v2100_v53 = vpop.permute.xlu1 %2099  ;;  %v6053_v28 = vadd.f32 %v2081_v43, %v6937_v51  ;;  %v2539_v44 = vadd.f32 %v6047_v16, %v2503_v46  ;;  %v2168_v35 = vpop.permute.xlu0 %2167  ;;  %v2296_v54 = vperm.slane %v5914_v31, 3  ;;  %v2536_v34 = vperm.slane %v6891_v9, 7  ;;  %v6944_v51 = vld [vmem:[#allocation17_spill] sm:$0xff] }
 0x3af   : > { %v6056_v23 = vadd.f32 %v2082_v22, %v6938_v41  ;;  %v2180_v30 = vsel %vm6939_vm7, %v2168_v35, %v5922_v55  ;;  %v2184_v50 = vsel %vm6940_vm8, %v5922_v55, %v2168_v35  ;;  %v6942_v6 = vsub.f32 %v6941_v3, %v5420_v19  ;;  %v6943_v22 = vld [vmem:[#allocation36_spill] sm:$0xff]  ;;  %vm6957_vm7 = vmmov %vm6868_vm3 }
 0x3b0   : > { %v6071_v0 = vadd.f32 %v6043_v13, %v2539_v44  ;;  %v2191_v33 = vsel %vm3776_vm15, %v2180_v30, %v6920_v15  ;;  %v2192_v9 = vsel %vm3780_vm1, %v2184_v50, %v6921_v60  ;;  %v2504_v46 = vadd.f32 %v6058_v57, %v2324_v26 }
 0x3b1   : > { %v2569_v47 = vmul.f32 1.442695, %v6942_v6  ;;  %v3185_v40 = vpop.eup %3184  ;;  %v2199_v55 = vsel %vm3788_vm2, %v5788_v42, %v2191_v33  ;;  %v2200_v19 = vsel %vm3792_vm11, %v5783_v18, %v2192_v9  ;;  %v2572_v41 = vunpack.c.h.bf16 %v6944_v51 }
 0x3b2   : > { %v2303_v43 = vmul.f32 %v2295_v17, %v2199_v55  ;;  %v2304_v1 = vmul.f32 %v2296_v54, %v2200_v19  ;;  %v6091_v39 = vmul.f32 %v3185_v40, %v2536_v34  ;;  %v2331_v34 = vperm.slane %v5953_v11, 3 }
 0x3b3   : > { %2383 = vrot.lane.b32.xlu2 %v5798_v61, %s3262_s15  ;;  %3186 = vpow2.f32 %v2569_v47  ;;  %v2332_v6 = vperm.slane %v5977_v59, 3 }
 0x3b4   : > { %2421 = vrot.lane.b32.xlu1 %v6943_v22, %s3263_s16  ;;  %v2311_v38 = vadd.f32 %v2303_v43, %v5965_v20  ;;  %v2312_v26 = vadd.f32 %v2304_v1, %v5968_v45  ;;  %v2540_v18 = vadd.f32 %v6091_v39, %v2504_v46  ;;  %v2574_v45 = vperm.slane %v2572_v41, 0 }
 0x3b5   : > { %2389 = vrot.lane.b32.xlu0 %v6943_v22, %s3262_s15  ;;  %v2130_v44 = vpop.permute.xlu2 %2129 }
 0x3b6   : > { %v2206_v42 = vpop.permute.xlu1 %2205  ;;  %v2098_v17 = vpop.permute.xlu0 %2097 }
 0x3b7   : > { %v6104_v35 = vsel %vm617_vm13, %v2098_v17, %v5989_v36  ;;  %v6109_v20 = vsel %vm617_vm13, %v5989_v36, %v2098_v17  ;;  %v6945_v17 = vld [vmem:[#allocation40_spill] sm:$0xff] }
 0x3b9   : > { %v3187_v54 = vpop.eup %3186 }
 0x3ba   : > { %v6119_v47 = vmul.f32 %v3187_v54, %v2574_v45  ;;  %v2254_v45 = vperm.slane %v6945_v17, 0  ;;  %v6946_v54 = vld [vmem:[#allocation22_spill] sm:$0xff] }
 0x3bb   : > { %2413 = vrot.lane.b32.xlu2 %v5832_v12, %s3263_s16 }
 0x3bc   : > { %2455 = vrot.lane.b32.xlu1 %v5798_v61, %s3264_s17 }
 0x3bd   : > { %2415 = vrot.lane.b32.xlu0 %v5798_v61, %s3263_s16  ;;  %v2140_v9 = vpop.permute.xlu2 %2139 }
 0x3be   : > { %v2216_v3 = vpop.permute.xlu1 %2215  ;;  %v2108_v55 = vpop.permute.xlu0 %2107 }
 0x3bf   : > { %v2220_v36 = vsel %vm734_vm0, %v2208_v25, %v2216_v3  ;;  %v2224_v33 = vsel %vm734_vm0, %v2216_v3, %v2208_v25  ;;  %v6137_v1 = vsel %vm617_vm13, %v2100_v53, %v2108_v55  ;;  %v6141_v25 = vsel %vm617_vm13, %v2108_v55, %v2100_v53 }
 0x3c0   : > { %v2231_v46 = vsel %vm3776_vm15, %v2220_v36, %v2180_v30  ;;  %v2232_v40 = vsel %vm3780_vm1, %v2224_v33, %v2184_v50  ;;  %v6144_v50 = vadd.f32 %v6119_v47, %v2540_v18  ;;  %v2121_v18 = vsel %vm3776_vm15, %v6946_v54, %v6109_v20 }
 0x3c1   : > { %v2239_v19 = vsel %vm3788_vm2, %v6920_v15, %v2231_v46  ;;  %v2240_v43 = vsel %vm3792_vm11, %v6921_v60, %v2232_v40  ;;  %v2253_v60 = vperm.slane %v5820_v21, 0  ;;  %v2329_v46 = vperm.slane %v5953_v11, 2 }
 0x3c2   : > { %v2339_v30 = vmul.f32 %v2331_v34, %v2239_v19  ;;  %v2340_v51 = vmul.f32 %v2332_v6, %v2240_v43  ;;  %v2330_v55 = vperm.slane %v5977_v59, 2 }
 0x3c3   : > { %2423 = vrot.lane.b32.xlu2 %v5808_v2, %s3263_s16 }
 0x3c4   : > { %v6146_v41 = vadd.f32 %v2339_v30, %v2311_v38  ;;  %v6148_v15 = vadd.f32 %v2340_v51, %v2312_v26  ;;  %v6947_v38 = vld [vmem:[#allocation23_spill] sm:$0xff] }
 0x3c5   : > { %2453 = vrot.lane.b32.xlu0 %v5832_v12, %s3264_s17  ;;  %v2122_v26 = vsel %vm3780_vm1, %v6947_v38, %v6104_v35  ;;  %v2170_v6 = vpop.permute.xlu2 %2169 }
 0x3c6   : > { %v2138_v53 = vpop.permute.xlu1 %2137  ;;  %v2214_v40 = vpop.permute.xlu0 %2213 }
 0x3c7   : > { %v2145_v34 = vsel %vm655_vm14, %v2130_v44, %v2138_v53  ;;  %v2149_v3 = vsel %vm655_vm14, %v2138_v53, %v2130_v44  ;;  %v2219_v30 = vsel %vm734_vm0, %v2206_v42, %v2214_v40  ;;  %v2223_v44 = vsel %vm734_vm0, %v2214_v40, %v2206_v42 }
 0x3c8   : > { %v2153_v36 = vsel %vm3788_vm2, %v2149_v3, %v2121_v18  ;;  %v2154_v33 = vsel %vm3792_vm11, %v2145_v34, %v2122_v26  ;;  %v2229_v51 = vsel %vm3776_vm15, %v2219_v30, %v5982_v56  ;;  %v2230_v53 = vsel %vm3780_vm1, %v2223_v44, %v5987_v10 }
 0x3c9   : > { %v2261_v19 = vmul.f32 %v2253_v60, %v2153_v36  ;;  %v2262_v43 = vmul.f32 %v2254_v45, %v2154_v33  ;;  %v2237_v60 = vsel %vm3788_vm2, %v6913_v49, %v2229_v51  ;;  %v2238_v42 = vsel %vm3792_vm11, %v6914_v32, %v2230_v53  ;;  %v6948_v36 = vld [vmem:[#allocation41_spill] sm:$0xff] }
 0x3ca   : > { %v2337_v45 = vmul.f32 %v2329_v46, %v2237_v60  ;;  %v2338_v34 = vmul.f32 %v2330_v55, %v2238_v42  ;;  %v2256_v32 = vperm.slane %v6945_v17, 1  ;;  %v2123_v33 = vsel %vm3776_vm15, %v6948_v36, %v6141_v25 }
 0x3cb   : > { %v2269_v18 = vadd.f32 %v2261_v19, %v6053_v28  ;;  %v2270_v26 = vadd.f32 %v2262_v43, %v6056_v23  ;;  %2461 = vrot.lane.b32.xlu2 %v6943_v22, %s3264_s17  ;;  %v2255_v23 = vperm.slane %v5820_v21, 1  ;;  %v2289_v42 = vperm.slane %v5912_v62, 0 }
 0x3cc   : > { %v6195_v56 = vadd.f32 %v2337_v45, %v6030_v24  ;;  %v6198_v10 = vadd.f32 %v2338_v34, %v6033_v58  ;;  %v6949_v24 = vld [vmem:[#allocation19_spill] sm:$0xff]  ;;  %v2290_v45 = vperm.slane %v5914_v31, 0 }
 0x3cd   : > { %2463 = vrot.lane.b32.xlu0 %v5808_v2, %s3264_s17  ;;  %v2356_v49 = vpop.permute.xlu2 %2355  ;;  %v2124_v58 = vsel %vm3780_vm1, %v6949_v24, %v6137_v1  ;;  %s3212_s17 = scalar_lea.hbm %s6686_s6, 128 }
 0x3ce   : > { %v2164_v28 = vpop.permute.xlu1 %2163  ;;  %v2132_v3 = vpop.permute.xlu0 %2131  ;;  %p3214_p1 = scmp.lt.s32.totalorder %s3212_s17, %s3208_s25 }
 0x3cf   : > { %v2146_v46 = vsel %vm655_vm14, %v2132_v3, %v2140_v9  ;;  %v2150_v40 = vsel %vm655_vm14, %v2140_v9, %v2132_v3 }
 0x3d0   : > { %v2155_v21 = vsel %vm3788_vm2, %v2150_v40, %v2123_v33  ;;  %v2156_v17 = vsel %vm3792_vm11, %v2146_v46, %v2124_v58  ;;  %p3215_p2 = por %p3214_p1, %p3213_p0 }
 0x3d1   : > { %v2263_v55 = vmul.f32 %v2255_v23, %v2155_v21  ;;  %v2264_v19 = vmul.f32 %v2256_v32, %v2156_v17  ;;  %v2291_v17 = vperm.slane %v5912_v62, 1 }
 0x3d2   : > { %p3216_p3 = pnand %p3215_p2, %p3211_p13 }
 0x3d3   : > { %v2271_v43 = vadd.f32 %v2263_v55, %v5958_v14  ;;  %v2272_v30 = vadd.f32 %v2264_v19, %v5961_v63 }
 0x3d5   : > { %v2386_v51 = vpop.permute.xlu2 %2385 }
 0x3d6   : > { %v2354_v44 = vpop.permute.xlu1 %2353  ;;  %v2162_v53 = vpop.permute.xlu0 %2161 }
 0x3d7   : > { %v6224_v60 = vsel %vm6950_vm6, %v2162_v53, %v2170_v6  ;;  %v6228_v9 = vsel %vm6951_vm9, %v2170_v6, %v2162_v53 }
 0x3d8   : > { %v2185_v14 = vsel %vm3776_vm15, %v6224_v60, %v6946_v54  ;;  %v2186_v63 = vsel %vm3780_vm1, %v6228_v9, %v6947_v38 }
 0x3d9   : > { %v2193_v34 = vsel %vm3788_vm2, %v6109_v20, %v2185_v14  ;;  %v2194_v6 = vsel %vm3792_vm11, %v6104_v35, %v2186_v63 }
 0x3da   : > { %v2297_v23 = vmul.f32 %v2289_v42, %v2193_v34  ;;  %v2298_v3 = vmul.f32 %v2290_v45, %v2194_v6  ;;  %v2510_v6 = vperm.slane %v6058_v57, 2 }
 0x3dc   : > { %v6246_v32 = vadd.f32 %v2297_v23, %v2269_v18  ;;  %v6248_v33 = vadd.f32 %v2298_v3, %v2270_v26  ;;  %v2292_v26 = vperm.slane %v5914_v31, 1 }
 0x3dd   : > { %v2396_v46 = vpop.permute.xlu2 %2395 }
 0x3de   : > { %v2364_v58 = vpop.permute.xlu1 %2363  ;;  %v2172_v40 = vpop.permute.xlu0 %2171 }
 0x3df   : > { %v6252_v21 = vsel %vm6952_vm12, %v2164_v28, %v2172_v40  ;;  %v6256_v20 = vsel %vm6953_vm10, %v2172_v40, %v2164_v28 }
 0x3e0   : > { %v2187_v35 = vsel %vm3776_vm15, %v6252_v21, %v6948_v36  ;;  %v2188_v18 = vsel %vm3780_vm1, %v6256_v20, %v6949_v24 }
 0x3e1   : > { %v2195_v55 = vsel %vm3788_vm2, %v6141_v25, %v2187_v35  ;;  %v2196_v62 = vsel %vm3792_vm11, %v6137_v1, %v2188_v18  ;;  %v2372_v35 = vsel %vm617_vm13, %v2364_v58, %v2356_v49 }
 0x3e2   : > { %v2299_v28 = vmul.f32 %v2291_v17, %v2195_v55  ;;  %v2300_v19 = vmul.f32 %v2292_v26, %v2196_v62  ;;  %v2368_v17 = vsel %vm617_vm13, %v2356_v49, %v2364_v58  ;;  %v2511_v62 = vperm.slane %v5992_v29, 3 }
 0x3e3   : > { %v2380_v49 = vsel %vm3780_vm1, %v6936_v52, %v2368_v17 }
 0x3e4   : > { %v6274_v53 = vadd.f32 %v2299_v28, %v2271_v43  ;;  %v6276_v42 = vadd.f32 %v2300_v19, %v2272_v30  ;;  %v2509_v43 = vperm.slane %v5992_v29, 2  ;;  %v2512_v19 = vperm.slane %v6058_v57, 3 }
 0x3e5   : > { %v2210_v45 = vpop.permute.xlu2 %2209 }
 0x3e6   : > { %v2394_v14 = vpop.permute.xlu1 %2393  ;;  %v2362_v34 = vpop.permute.xlu0 %2361 }
 0x3e7   : > { %v2399_v63 = vsel %vm655_vm14, %v2386_v51, %v2394_v14  ;;  %v2403_v31 = vsel %vm655_vm14, %v2394_v14, %v2386_v51  ;;  %v6284_v25 = vsel %vm617_vm13, %v2354_v44, %v2362_v34  ;;  %v6288_v1 = vsel %vm617_vm13, %v2362_v34, %v2354_v44  ;;  %v6954_v14 = vld [vmem:[#allocation31_spill] sm:$0xff] }
 0x3e8   : > { %v2377_v30 = vsel %vm3776_vm15, %v5397_v4, %v6288_v1  ;;  %v2378_v51 = vsel %vm3780_vm1, %v6935_v48, %v6284_v25 }
 0x3e9   : > { %v2409_v23 = vsel %vm3788_vm2, %v2403_v31, %v2377_v30  ;;  %v2410_v44 = vsel %vm3792_vm11, %v2399_v63, %v2378_v51  ;;  %v2379_v63 = vsel %vm3776_vm15, %v6954_v14, %v2372_v35 }
 0x3ea   : > { %v2517_v3 = vmul.f32 %v2509_v43, %v2409_v23  ;;  %v2518_v40 = vmul.f32 %v2510_v6, %v2410_v44 }
 0x3ec   : > { %v6309_v18 = vadd.f32 %v2517_v3, %v6195_v56  ;;  %v6312_v26 = vadd.f32 %v2518_v40, %v6198_v10  ;;  %v6337_v40 = vadd.f32 1e-06, %v6071_v0 }
 0x3ed   : > { %v2420_v58 = vpop.permute.xlu2 %2419 }
 0x3ee   : > { %v2204_v55 = vpop.permute.xlu1 %2203  ;;  %v2388_v28 = vpop.permute.xlu0 %2387  ;;  %3188 = vrcp.f32 %v6337_v40  ;;  %vm2610_vm8 = vweird.f32 %v6337_v40 }
 0x3ef   : > { %v2400_v56 = vsel %vm655_vm14, %v2388_v28, %v2396_v46  ;;  %v2404_v10 = vsel %vm655_vm14, %v2396_v46, %v2388_v28  ;;  %v2325_v28 = vperm.slane %v5953_v11, 0 }
 0x3f0   : > { %v2411_v31 = vsel %vm3788_vm2, %v2404_v10, %v2379_v63  ;;  %v2412_v34 = vsel %vm3792_vm11, %v2400_v56, %v2380_v49  ;;  %v2547_v56 = vperm.slane %v6047_v16, 3 }
 0x3f1   : > { %v2519_v43 = vmul.f32 %v2511_v62, %v2411_v31  ;;  %v2520_v30 = vmul.f32 %v2512_v19, %v2412_v34  ;;  %v2327_v34 = vperm.slane %v5953_v11, 1 }
 0x3f3   : > { %v2527_v51 = vadd.f32 %v2519_v43, %v6146_v41  ;;  %v2528_v6 = vadd.f32 %v2520_v30, %v6148_v15  ;;  %v2326_v15 = vperm.slane %v5977_v59, 0 }
 0x3f5   : > { %v6356_v63 = vpop.permute.xlu2 %2349 }
 0x3f6   : > { %v2418_v23 = vpop.permute.xlu1 %2417  ;;  %v2202_v44 = vpop.permute.xlu0 %2201 }
 0x3f7   : > { %v2217_v3 = vsel %vm734_vm0, %v2202_v44, %v2210_v45  ;;  %v2221_v46 = vsel %vm734_vm0, %v2210_v45, %v2202_v44  ;;  %v6354_v45 = vadd.f32 1e-06, %v6144_v50 }
 0x3f8   : > { %v2225_v62 = vsel %vm3776_vm15, %v2217_v3, %v6224_v60  ;;  %v2226_v41 = vsel %vm3780_vm1, %v2221_v46, %v6228_v9 }
 0x3f9   : > { %v2233_v19 = vsel %vm3788_vm2, %v6946_v54, %v2225_v62  ;;  %v2234_v0 = vsel %vm3792_vm11, %v6947_v38, %v2226_v41  ;;  %v2548_v38 = vperm.slane %v6091_v39, 3  ;;  %3190 = vrcp.f32 %v6354_v45  ;;  %v6406_v41 = vpop.eup %3188 }
 0x3fa   : > { %v2333_v60 = vmul.f32 %v2325_v28, %v2233_v19  ;;  %v2334_v49 = vmul.f32 %v2326_v15, %v2234_v0  ;;  %vm2611_vm6 = vweird.f32 %v6406_v41  ;;  %vm2625_vm9 = vweird.f32 %v6354_v45 }
 0x3fb   : > { %vm6450_vm10 = vmor %vm2610_vm8, %vm2611_vm6 }
 0x3fc   : > { %v6360_v10 = vadd.f32 %v2333_v60, %v6246_v32  ;;  %v6363_v31 = vadd.f32 %v2334_v49, %v6248_v33  ;;  %vm6964_vm8 = vmmov %vm6957_vm7 }
 0x3fd   : > { %v2360_v60 = vpop.permute.xlu2 %2359 }
 0x3fe   : > { %v2428_v9 = vpop.permute.xlu1 %2427  ;;  %v2212_v43 = vpop.permute.xlu0 %2211 }
 0x3ff   : > { %v6368_v54 = vsel %vm6868_vm3, %v2420_v58, %v2428_v9  ;;  %v6372_v50 = vsel %vm6955_vm4, %v2428_v9, %v2420_v58  ;;  %v2328_v58 = vperm.slane %v5977_v59, 1  ;;  %v2218_v3 = vsel %vm734_vm0, %v2204_v55, %v2212_v43  ;;  %v3191_v0 = vpop.eup %3190 }
 0x400   : > { %v2443_v32 = vsel %vm3776_vm15, %v6368_v54, %v6954_v14  ;;  %v2444_v33 = vsel %vm3780_vm1, %v6372_v50, %v6936_v52  ;;  %v2222_v46 = vsel %vm734_vm0, %v2212_v43, %v2204_v55  ;;  %v2227_v11 = vsel %vm3776_vm15, %v2218_v3, %v6252_v21 }
 0x401   : > { %v2451_v30 = vsel %vm3788_vm2, %v2372_v35, %v2443_v32  ;;  %v2452_v44 = vsel %vm3792_vm11, %v2368_v17, %v2444_v33  ;;  %v2228_v59 = vsel %vm3780_vm1, %v2222_v46, %v6256_v20  ;;  %v2235_v17 = vsel %vm3788_vm2, %v6948_v36, %v2227_v11 }
 0x402   : > { %v2555_v28 = vmul.f32 %v2547_v56, %v2451_v30  ;;  %v2556_v62 = vmul.f32 %v2548_v38, %v2452_v44  ;;  %v2236_v35 = vsel %vm3792_vm11, %v6949_v24, %v2228_v59  ;;  %v2335_v19 = vmul.f32 %v2327_v34, %v2235_v17 }
 0x403   : > { %v2336_v21 = vmul.f32 %v2328_v58, %v2236_v35  ;;  %v2606_v24 = vmul.f32 %v6406_v41, %v6337_v40  ;;  %v2545_v38 = vperm.slane %v6047_v16, 2  ;;  %v2546_v32 = vperm.slane %v6091_v39, 2 }
 0x404   : > { %v6408_v55 = vadd.f32 %v2555_v28, %v2527_v51  ;;  %v6410_v15 = vadd.f32 %v2556_v62, %v2528_v6  ;;  %v6415_v20 = vadd.f32 %v2335_v19, %v6274_v53  ;;  %v2621_v51 = vmul.f32 %v3191_v0, %v6354_v45 }
 0x405   : > { %v6418_v36 = vadd.f32 %v2336_v21, %v6276_v42  ;;  %v2607_v58 = vsub.f32 1.0, %v2606_v24  ;;  %v2466_v28 = vpop.permute.xlu2 %2465  ;;  %vm2626_vm12 = vweird.f32 %v3191_v0  ;;  %v2614_v17 = vand.u32 2147483647, %v6337_v40 }
 0x406   : > { %v6412_v49 = vpop.permute.xlu1 %2357  ;;  %v2426_v56 = vpop.permute.xlu0 %2425  ;;  %v2622_v30 = vsub.f32 1.0, %v2621_v51  ;;  %v2629_v19 = vand.u32 2147483647, %v6354_v45  ;;  %vm6456_vm3 = vmor %vm2625_vm9, %vm2626_vm12 }
 0x407   : > { %v2431_v6 = vsel %vm6956_vm5, %v2418_v23, %v2426_v56  ;;  %v2435_v9 = vsel %vm6957_vm7, %v2426_v56, %v2418_v23  ;;  %v2608_v11 = vmul.f32 %v6406_v41, %v2607_v58  ;;  %vm2615_vm4 = vcmp.eq.f32.partialorder %v2614_v17, 8.507059e+37 }
 0x408   : > { %v2441_v53 = vsel %vm3776_vm15, %v2431_v6, %v5397_v4  ;;  %v2442_v42 = vsel %vm3780_vm1, %v2435_v9, %v6935_v48  ;;  %v2623_v59 = vmul.f32 %v3191_v0, %v2622_v30  ;;  %vm2630_vm5 = vcmp.eq.f32.partialorder %v2629_v19, 8.507059e+37 }
 0x409   : > { %v2449_v33 = vsel %vm3788_vm2, %v6288_v1, %v2441_v53  ;;  %v2450_v23 = vsel %vm3792_vm11, %v6284_v25, %v2442_v42  ;;  %v2616_v25 = vand.u32 2147483648, %v6337_v40  ;;  %v2631_v1 = vand.u32 2147483648, %v6354_v45 }
 0x40a   : > { %v2553_v34 = vmul.f32 %v2545_v38, %v2449_v33  ;;  %v2554_v43 = vmul.f32 %v2546_v32, %v2450_v23  ;;  %v2624_v35 = vadd.f32 %v3191_v0, %v2623_v59  ;;  %v2583_v33 = vperm.slane %v6043_v13, 2 }
 0x40b   : > { %v2617_v24 = vor.u32 1.1754944e-38, %v2616_v25  ;;  %v2632_v51 = vor.u32 1.1754944e-38, %v2631_v1  ;;  %v2508_v59 = vperm.slane %v6058_v57, 1 }
 0x40c   : > { %v2561_v44 = vadd.f32 %v2553_v34, %v6309_v18  ;;  %v2562_v3 = vadd.f32 %v2554_v43, %v6312_v26  ;;  %v2609_v18 = vadd.f32 %v6406_v41, %v2608_v11  ;;  %v2628_v40 = vsel %vm6456_vm3, %v3191_v0, %v2624_v35 }
 0x40d   : > { %v2384_v32 = vpop.permute.xlu2 %2383  ;;  %v2584_v34 = vperm.slane %v6119_v47, 2  ;;  %v6485_v30 = vsel %vm2630_vm5, %v2632_v51, %v2628_v40 }
 0x40e   : > { %v2460_v46 = vpop.permute.xlu1 %2459  ;;  %v2352_v62 = vpop.permute.xlu0 %2351  ;;  %v2613_v53 = vsel %vm6450_vm10, %v6406_v41, %v2609_v18  ;;  %v2640_v26 = vperm.slane %v6485_v30, 2  ;;  %v2638_v7 = vperm.slane %v6485_v30, 1 }
 0x40f   : > { %v6483_v58 = vsel %vm2615_vm4, %v2617_v24, %v2613_v53 }
 0x410   : > { %v2639_v18 = vperm.slane %v6483_v58, 2  ;;  %v2637_v5 = vperm.slane %v6483_v58, 1 }
 0x416   : > { %v6460_v56 = vpop.permute.xlu1 %2381 }
 0x417   : > { %v2458_v38 = vpop.permute.xlu0 %2457 }
 0x418   : > { %v2471_v45 = vsel %vm734_vm0, %v2458_v38, %v2466_v28  ;;  %v2475_v42 = vsel %vm734_vm0, %v2466_v28, %v2458_v38 }
 0x419   : > { %v2481_v23 = vsel %vm3776_vm15, %v2471_v45, %v2431_v6  ;;  %v2482_v41 = vsel %vm3780_vm1, %v2475_v42, %v2435_v9  ;;  %v6489_v6 = vsel %vm617_vm13, %v2352_v62, %v2360_v60  ;;  %v6493_v9 = vsel %vm617_vm13, %v2360_v60, %v2352_v62 }
 0x41a   : > { %v2489_v0 = vsel %vm3788_vm2, %v5397_v4, %v2481_v23  ;;  %v2490_v43 = vsel %vm3792_vm11, %v6935_v48, %v2482_v41  ;;  %v2507_v4 = vperm.slane %v5992_v29, 1  ;;  %v2375_v17 = vsel %vm3776_vm15, %v5798_v61, %v6493_v9 }
 0x41b   : > { %v2591_v28 = vmul.f32 %v2583_v33, %v2489_v0  ;;  %v2592_v11 = vmul.f32 %v2584_v34, %v2490_v43  ;;  %v2376_v60 = vsel %vm3780_vm1, %v5808_v2, %v6489_v6  ;;  %v2585_v45 = vperm.slane %v6043_v13, 3 }
 0x41c   : > { %v2586_v33 = vperm.slane %v6119_v47, 3  ;;  %v2541_v43 = vperm.slane %v6047_v16, 0 }
 0x41d   : > { %v2599_v25 = vadd.f32 %v2591_v28, %v2561_v44  ;;  %v2600_v48 = vadd.f32 %v2592_v11, %v2562_v3  ;;  %v2505_v28 = vperm.slane %v5992_v29, 0 }
 0x41e   : > { %v2392_v1 = vpop.permute.xlu1 %2391 }
 0x41f   : > { %v2398_v62 = vsel %vm655_vm14, %v2384_v32, %v2392_v1  ;;  %v2402_v44 = vsel %vm655_vm14, %v2392_v1, %v2384_v32  ;;  %v2468_v19 = vpop.permute.xlu0 %2467  ;;  %v2647_v21 = vmul.f32 %v2639_v18, %v2599_v25  ;;  %v2648_v24 = vmul.f32 %v2640_v26, %v2600_v48 }
 0x420   : > { %v2407_v3 = vsel %vm3788_vm2, %v2402_v44, %v2375_v17  ;;  %v2408_v35 = vsel %vm3792_vm11, %v2398_v62, %v2376_v60  ;;  %v2472_v53 = vsel %vm734_vm0, %v2460_v46, %v2468_v19  ;;  %v2476_v40 = vsel %vm734_vm0, %v2468_v19, %v2460_v46 }
 0x421   : > { %v2515_v51 = vmul.f32 %v2507_v4, %v2407_v3  ;;  %v2516_v38 = vmul.f32 %v2508_v59, %v2408_v35  ;;  %v2483_v42 = vsel %vm3776_vm15, %v2472_v53, %v6368_v54  ;;  %v2484_v32 = vsel %vm3780_vm1, %v2476_v40, %v6372_v50 }
 0x422   : > { %v2491_v46 = vsel %vm3788_vm2, %v6954_v14, %v2483_v42  ;;  %v2492_v34 = vsel %vm3792_vm11, %v6936_v52, %v2484_v32  ;;  %v2365_v54 = vsel %vm617_vm13, %v6356_v63, %v6412_v49  ;;  %v2369_v50 = vsel %vm617_vm13, %v6412_v49, %v6356_v63  ;;  %vm6962_vm13 = vmmov %vm6957_vm7 }
 0x423   : > { %v2523_v23 = vadd.f32 %v2515_v51, %v6415_v20  ;;  %v2524_v41 = vadd.f32 %v2516_v38, %v6418_v36  ;;  %v2414_v20 = vpop.permute.xlu2 %2413  ;;  %v2593_v36 = vmul.f32 %v2585_v45, %v2491_v46  ;;  %v2594_v0 = vmul.f32 %v2586_v33, %v2492_v34 }
 0x424   : > { %v2542_v14 = vperm.slane %v6091_v39, 0  ;;  %v2506_v52 = vperm.slane %v6058_v57, 0  ;;  %v2641_v25 = vperm.slane %v6483_v58, 3  ;;  %v2642_v63 = vperm.slane %v6485_v30, 3 }
 0x425   : > { %v2601_v11 = vadd.f32 %v2593_v36, %v6408_v55  ;;  %v2602_v4 = vadd.f32 %v2594_v0, %v6410_v15  ;;  %v2373_v49 = vsel %vm3776_vm15, %v5832_v12, %v2369_v50  ;;  %v2374_v48 = vsel %vm3780_vm1, %v6943_v22, %v2365_v54 }
 0x426   : > { %v2422_v59 = vpop.permute.xlu1 %2421 }
 0x427   : > { %v2429_v29 = vsel %vm6962_vm13, %v2414_v20, %v2422_v59  ;;  %v2433_v57 = vsel %vm6957_vm7, %v2422_v59, %v2414_v20  ;;  %v2390_v1 = vpop.permute.xlu0 %2389  ;;  %v2649_v18 = vmul.f32 %v2641_v25, %v2601_v11  ;;  %v2650_v26 = vmul.f32 %v2642_v63, %v2602_v4 }
 0x428   : > { %v2437_v55 = vsel %vm3776_vm15, %v2429_v29, %v5832_v12  ;;  %v2438_v15 = vsel %vm3780_vm1, %v2433_v57, %v6943_v22  ;;  %v2397_v62 = vsel %vm655_vm14, %v6460_v56, %v2390_v1  ;;  %v2401_v44 = vsel %vm655_vm14, %v2390_v1, %v6460_v56  ;;  %vm6963_vm14 = vmmov %vm6957_vm7 }
 0x429   : > { %v2445_v17 = vsel %vm3788_vm2, %v2369_v50, %v2437_v55  ;;  %v2446_v60 = vsel %vm3792_vm11, %v2365_v54, %v2438_v15  ;;  %v2405_v19 = vsel %vm3788_vm2, %v2401_v44, %v2373_v49  ;;  %v2406_v51 = vsel %vm3792_vm11, %v2397_v62, %v2374_v48 }
 0x42a   : > { %v2549_v3 = vmul.f32 %v2541_v43, %v2445_v17  ;;  %v2550_v35 = vmul.f32 %v2542_v14, %v2446_v60  ;;  %v2513_v38 = vmul.f32 %v2505_v28, %v2405_v19  ;;  %v2514_v53 = vmul.f32 %v2506_v52, %v2406_v51 }
 0x42b   : > { %v2657_v40 = vpack.c.bf16 %v2649_v18, %v2647_v21  ;;  %v2658_v45 = vpack.c.bf16 %v2650_v26, %v2648_v24  ;;  %v2424_v33 = vpop.permute.xlu2 %2423  ;;  %v2543_v20 = vperm.slane %v6047_v16, 1  ;;  %v2544_v21 = vperm.slane %v6091_v39, 1 }
 0x42c   : > { %v2521_v42 = vadd.f32 %v2513_v38, %v6360_v10  ;;  %v2522_v32 = vadd.f32 %v2514_v53, %v6363_v31  ;;  %v2579_v4 = vperm.slane %v6043_v13, 0  ;;  %v2580_v59 = vperm.slane %v6119_v47, 0 }
 0x42d   : > { %2681 = vmatpush.bf16.msrb.mxu2 %v2657_v40  ;;  %2700 = vmatpush.bf16.msrb.mxu3 %v2658_v45  ;;  %v2635_v48 = vperm.slane %v6483_v58, 0  ;;  %v2582_v62 = vperm.slane %v6119_v47, 1 }
 0x42e   : > { %v2557_v56 = vadd.f32 %v2549_v3, %v2521_v42  ;;  %v2558_v46 = vadd.f32 %v2550_v35, %v2522_v32  ;;  %v2456_v15 = vpop.permute.xlu1 %2455 }
 0x42f   : > { %v2416_v34 = vpop.permute.xlu0 %2415 }
 0x430   : > { %v2430_v54 = vsel %vm6963_vm14, %v2416_v34, %v2424_v33  ;;  %v2434_v50 = vsel %vm6964_vm8, %v2424_v33, %v2416_v34 }
 0x431   : > { %v2439_v10 = vsel %vm3776_vm15, %v2430_v54, %v5798_v61  ;;  %v2440_v31 = vsel %vm3780_vm1, %v2434_v50, %v5808_v2 }
 0x432   : > { %v2447_v24 = vsel %vm3788_vm2, %v6493_v9, %v2439_v10  ;;  %v2448_v36 = vsel %vm3792_vm11, %v6489_v6, %v2440_v31 }
 0x433   : > { %v2551_v0 = vmul.f32 %v2543_v20, %v2447_v24  ;;  %v2552_v16 = vmul.f32 %v2544_v21, %v2448_v36  ;;  %v2462_v28 = vpop.permute.xlu2 %2461 }
 0x435   : > { %v2559_v43 = vadd.f32 %v2551_v0, %v2523_v23  ;;  %v2560_v14 = vadd.f32 %v2552_v16, %v2524_v41 }
 0x437   : > { %v2454_v52 = vpop.permute.xlu0 %2453 }
 0x438   : > { %v2469_v11 = vsel %vm734_vm0, %v2454_v52, %v2462_v28  ;;  %v2473_v39 = vsel %vm734_vm0, %v2462_v28, %v2454_v52 }
 0x439   : > { %v2477_v9 = vsel %vm3776_vm15, %v2469_v11, %v2429_v29  ;;  %v2478_v6 = vsel %vm3780_vm1, %v2473_v39, %v2433_v57  ;;  %v2636_v29 = vperm.slane %v6485_v30, 0 }
 0x43a   : > { %v2485_v23 = vsel %vm3788_vm2, %v5832_v12, %v2477_v9  ;;  %v2486_v41 = vsel %vm3792_vm11, %v6943_v22, %v2478_v6  ;;  %v2581_v22 = vperm.slane %v6043_v13, 1 }
 0x43b   : > { %v2587_v25 = vmul.f32 %v2579_v4, %v2485_v23  ;;  %v2588_v63 = vmul.f32 %v2580_v59, %v2486_v41 }
 0x43d   : > { %v2595_v49 = vadd.f32 %v2587_v25, %v2557_v56  ;;  %v2596_v55 = vadd.f32 %v2588_v63, %v2558_v46 }
 0x43f   : > { %v2464_v57 = vpop.permute.xlu0 %2463  ;;  %v2643_v1 = vmul.f32 %v2635_v48, %v2595_v49  ;;  %v2644_v18 = vmul.f32 %v2636_v29, %v2596_v55 }
 0x440   : > { %v2470_v26 = vsel %vm734_vm0, %v2456_v15, %v2464_v57  ;;  %v2474_v12 = vsel %vm734_vm0, %v2464_v57, %v2456_v15  ;;  %vm6965_vm0 = vcmask 261120  }
 0x441   : > { %v2479_v17 = vsel %vm3776_vm15, %v2470_v26, %v2430_v54  ;;  %v2480_v60 = vsel %vm3780_vm1, %v2474_v12, %v2434_v50  ;;  %vm6966_vm15 = vmmov %vm6965_vm0 }
 0x442   : > { %v2487_v44 = vsel %vm3788_vm2, %v5798_v61, %v2479_v17  ;;  %v2488_v3 = vsel %vm3792_vm11, %v5808_v2, %v2480_v60  ;;  %vm6967_vm1 = vmmov %vm6965_vm0 }
 0x443   : > { %v2589_v37 = vmul.f32 %v2581_v22, %v2487_v44  ;;  %v2590_v35 = vmul.f32 %v2582_v62, %v2488_v3  ;;  %vm6968_vm2 = vmmov %vm6965_vm0 }
 0x445   : > { %v2597_v19 = vadd.f32 %v2589_v37, %v2559_v43  ;;  %v2598_v13 = vadd.f32 %v2590_v35, %v2560_v14 }
 0x447   : > { %v2645_v51 = vmul.f32 %v2637_v5, %v2597_v19  ;;  %v2646_v38 = vmul.f32 %v2638_v7, %v2598_v13 }
 0x449   : > { %v2655_v47 = vpack.c.bf16 %v2645_v51, %v2643_v1  ;;  %v2656_v53 = vpack.c.bf16 %v2646_v38, %v2644_v18 }
 0x44b   : > { %2682 = vmatpush.bf16.msrb.mxu2 %v2655_v47  ;;  %2701 = vmatpush.bf16.msrb.mxu3 %v2656_v53 }
 0x44e   : > { %3043 = vmatmul.msk.bf16.vlgmr.msrb.gmra.mxu2 %vm6965_vm0, %v3100_v8  ;;  %3045 = vmatmul.msk.bf16.vlgmr.msrb.gmra.mxu3 %vm6966_vm15, %v3100_v8 }
 0x45e   : > { %3044 = vmatmul.msk.bf16.gmra.mxu2 %vm6967_vm1, %v3101_v27  ;;  %3046 = vmatmul.msk.bf16.gmra.mxu3 %vm6968_vm2, %v3101_v27 }
 0x4d1   : > { %v2684_v61 = vpop.f32.mrf.mxu2  ;;  %v2703_v2 = vpop.f32.mrf.mxu3 }
 0x4d2   : > { %2713 = vst [vmem:[%s259_s12] sm:$0xff] %v2684_v61 }
 0x4d3   : > { %2714 = vst [vmem:[%s259_s12 + $0x8] sm:$0xff] %v2703_v2 }
 0x4d9   : > { %v2686_v58 = vpop.f32.mrf.mxu2  ;;  %v2705_v30 = vpop.f32.mrf.mxu3 }
 0x4da   : > { %2715 = vst [vmem:[%s259_s12 + $0x10] sm:$0xff] %v2686_v58 }
 0x4db   : > { %2716 = vst [vmem:[%s259_s12 + $0x18] sm:$0xff] %v2705_v30 }
 0x4e1   : > { %v2689_v40 = vpop.f32.mrf.mxu2  ;;  %v2708_v45 = vpop.f32.mrf.mxu3 }
 0x4e2   : > { %2717 = vst [vmem:[%s259_s12 + $0x20] sm:$0xff] %v2689_v40 }
 0x4e3   : > { %2718 = vst [vmem:[%s259_s12 + $0x28] sm:$0xff] %v2708_v45 }
 0x4e9   : > { %v2691_v42 = vpop.f32.mrf.mxu2  ;;  %v2710_v32 = vpop.f32.mrf.mxu3 }
 0x4ea   : > { %2719 = vst [vmem:[%s259_s12 + $0x30] sm:$0xff] %v2691_v42 }
 0x4eb   : > { %2720 = vst [vmem:[%s259_s12 + $0x38] sm:$0xff] %v2710_v32 }
 0x4ec   : > { %3219 = shalt.err (!%p3216_p3)
}
 0x4ed   : > { %s3265_s20 = smov 256  }
 0x4ee   : > { %3103 = dma.vmem_to_hbm [thread:$0]  (%p3339_p5), %s2735_s9, 1024, %s2737_s10, %s2722_s19, %s3265_s20, %s3265_s20, %s3257_s29  }
 0x4ef PF: > { %p3109_p4 = scmp.ge.s32.totalorder %s3254_s24, 2  ;;  %s2751_s12 = sand.u32 1, %s3242_s21  }
 0x4f0   : > { %s2752_s11 = scalar_lea.sflag [#allocation5], %s2751_s12 }
 0x4f1   : > { %p3106_p7 = pnand %p3109_p4, %p3343_p6 }
 0x4f3   : > { %p3107_p8 = pneg %p3106_p7 }
 0x4f5   : > { %3237 = dma.done.wait (%p3107_p8), %s2752_s11, 1024  }
 0x4f6   : > { %3239 = vsyncadd (%p3107_p8), %s2752_s11, 4294966272  ;;  %p16_p9 = scmp.ge.s32.totalorder %s3326_s27, 4   ;;  %s6969_s21 = smov %s3246_s22 }
 0x4f7   : > { %s6970_s22 = smov %s3250_s23  ;;  %s6971_s23 = smov %s3337_s30 }
 0x4f8   : > { %s6972_s24 = smov %s3326_s27  ;;  %18 = sbr.rel (!%p16_p9) target bundleno = 3 (0x3), region = 83 }
 0x4fd   :  { %2758 = vsyncpa [#allocation5], 1 }
 0x4fe   :  { %2760 = vsyncpa [#allocation5 + $0x1], 1 }

</bundles_post_ra>
